<compile_context>
chip_gen: v7x
topology: tpu7x:2x2x1
jax: 0.10.0
libtpu: 0.0.40
codegen_flags: <defaults>
</compile_context>

<pallas_src>
import functools

import jax
import jax.numpy as jnp
from jax.experimental import pallas as pl
from jax.experimental.pallas import tpu as pltpu

# Model hyper-parameters (from the PyTorch module definition).
INPUT_SIZE = 6
HIDDEN_SIZE = 64
NUM_LAYERS = 2
OUTPUT_SIZE = 6

HP = 128      # per-gate lane padding (one vreg lane width)
OUT_P = 128   # lane-padded FC output width -> unmasked vector stores

_VMEM = pl.BlockSpec(memory_space=pltpu.MemorySpace.VMEM)


# ----------------------------------------------------------------------------
# Pallas kernel
# ----------------------------------------------------------------------------
def _lstm_recurrence(xw, whh_ref, T, BP, collect):
    """Padded-gate LSTM recurrence.

    xw      : (T*BP, 4*HP)  precomputed x @ W_ih + (b_ih + b_hh), gate-padded
    whh_ref : (HP, 4*HP)    VMEM ref of the recurrent weight, gate-padded
    Returns (seq or None, last_h) where seq is (T*BP, HP).
    Gate order matches PyTorch: i, f, g, o.
    """
    whh = whh_ref[...]                       # hoist the weight load out of the loop
    h = jnp.zeros((BP, HP), jnp.float32)
    c = jnp.zeros((BP, HP), jnp.float32)
    hs = []
    for t in range(T):                       # static unroll: T small & trace-time known
        gates = xw[t * BP:(t + 1) * BP, :] + jnp.dot(
            h, whh, preferred_element_type=jnp.float32)
        i_g = jax.nn.sigmoid(gates[:, 0 * HP:1 * HP])
        f_g = jax.nn.sigmoid(gates[:, 1 * HP:2 * HP])
        g_g = jnp.tanh(gates[:, 2 * HP:3 * HP])
        o_g = jax.nn.sigmoid(gates[:, 3 * HP:4 * HP])
        c = f_g * c + i_g * g_g
        h = o_g * jnp.tanh(c)
        if collect:
            hs.append(h)
    seq = jnp.concatenate(hs, axis=0) if collect else None
    return seq, h


def _fused_lstm_fc_kernel(x_ref, wih1_ref, whh1_ref, b1_ref,
                          wih2_ref, whh2_ref, b2_ref,
                          wfc_ref, bfc_ref, out_ref, *, T, BP):
    """Fused 2-layer LSTM + Linear.

    x_ref  : (T*BP, D_in)   time-major, batch padded to BP (multiple of 8)
    wih*   : (D_in | HP, 4*HP)  transposed, gate-lane-padded input weights
    whh*   : (HP, 4*HP)     transposed, gate-lane-padded recurrent weights
    b*     : (1,  4*HP)     bias_ih + bias_hh, gate-lane-padded
    wfc    : (HP, OUT_P)    transposed FC weight (rows >= H and cols >= OUT are 0)
    bfc    : (1,  OUT_P)
    out_ref: (BP, OUT_P)
    """
    # ---- Layer 1: hoisted input projection (single MXU pass over all t) ----
    xw1 = jnp.dot(x_ref[...], wih1_ref[...],
                  preferred_element_type=jnp.float32) + b1_ref[...]
    seq1, _ = _lstm_recurrence(xw1, whh1_ref, T, BP, collect=True)

    # ---- Layer 2: only the final hidden state is needed (feeds the FC) ----
    xw2 = jnp.dot(seq1, wih2_ref[...],
                  preferred_element_type=jnp.float32) + b2_ref[...]
    _, h_last = _lstm_recurrence(xw2, whh2_ref, T, BP, collect=False)

    # ---- FC head (lane-padded output -> unmasked stores) ----
    out_ref[...] = jnp.dot(h_last, wfc_ref[...],
                           preferred_element_type=jnp.float32) + bfc_ref[...]


# ----------------------------------------------------------------------------
# Wrapper
# ----------------------------------------------------------------------------
def lstm_model_forward(x_btd, packed):
    """Equivalent of LSTMModel.forward.  x_btd: (B, T, INPUT_SIZE) float32."""
    B, T, D = x_btd.shape
    BP = ((B + 7) // 8) * 8                       # pad batch to sublane multiple

    x_tbd = jnp.transpose(x_btd, (1, 0, 2))       # time-major (T, B, D)
    x_tbd = jnp.pad(x_tbd, ((0, 0), (0, BP - B), (0, 0)))
    x2d = x_tbd.reshape(T * BP, D)                # (T*BP, D)

    kernel = functools.partial(_fused_lstm_fc_kernel, T=T, BP=BP)
    out = pl.pallas_call(
        kernel,
        out_shape=jax.ShapeDtypeStruct((BP, OUT_P), jnp.float32),
        in_specs=[_VMEM] * 9,
        out_specs=_VMEM,
    )(x2d,
      packed["wih1"], packed["whh1"], packed["b1"],
      packed["wih2"], packed["whh2"], packed["b2"],
      packed["wfc"], packed["bfc"])
    return out[:B, :OUTPUT_SIZE]
    # TODO(synk): if B or T grow large, add a batch grid ("parallel") and/or a
    # pipelined BlockSpec over the time axis instead of whole-array VMEM residency.


# ----------------------------------------------------------------------------
# Parameters: PyTorch-style raw init + gate-padded packing for the kernel
# ----------------------------------------------------------------------------
def init_raw_params(key):
    """PyTorch default init: U(-1/sqrt(H), 1/sqrt(H)), raw (untransposed) layout."""
    bound = 1.0 / jnp.sqrt(jnp.float32(HIDDEN_SIZE))
    raw = {"lstm": []}
    for layer in range(NUM_LAYERS):
        d_in = INPUT_SIZE if layer == 0 else HIDDEN_SIZE
        key, k1, k2, k3, k4 = jax.random.split(key, 5)
        w_ih = jax.random.uniform(k1, (4 * HIDDEN_SIZE, d_in), jnp.float32, -bound, bound)
        w_hh = jax.random.uniform(k2, (4 * HIDDEN_SIZE, HIDDEN_SIZE), jnp.float32, -bound, bound)
        b_ih = jax.random.uniform(k3, (4 * HIDDEN_SIZE,), jnp.float32, -bound, bound)
        b_hh = jax.random.uniform(k4, (4 * HIDDEN_SIZE,), jnp.float32, -bound, bound)
        raw["lstm"].append((w_ih, w_hh, b_ih, b_hh))
    key, k1, k2 = jax.random.split(key, 3)
    raw["fc_w"] = jax.random.uniform(k1, (OUTPUT_SIZE, HIDDEN_SIZE), jnp.float32, -bound, bound)
    raw["fc_b"] = jax.random.uniform(k2, (OUTPUT_SIZE,), jnp.float32, -bound, bound)
    return raw


def pack_params(raw):
    """Transpose + zero-pad each gate to HP lanes (i,f,g,o order preserved)."""
    H = HIDDEN_SIZE
    packed = {}
    for layer in range(NUM_LAYERS):
        w_ih, w_hh, b_ih, b_hh = raw["lstm"][layer]
        D = w_ih.shape[1]
        DP = D if layer == 0 else HP            # layer>=1 consumes the padded hidden
        wih_p = (jnp.zeros((DP, 4, HP), jnp.float32)
                 .at[:D, :, :H].set(w_ih.T.reshape(D, 4, H))
                 .reshape(DP, 4 * HP))
        whh_p = (jnp.zeros((HP, 4, HP), jnp.float32)
                 .at[:H, :, :H].set(w_hh.T.reshape(H, 4, H))
                 .reshape(HP, 4 * HP))
        b_p = (jnp.zeros((4, HP), jnp.float32)
               .at[:, :H].set((b_ih + b_hh).reshape(4, H))
               .reshape(1, 4 * HP))
        packed[f"wih{layer + 1}"] = wih_p
        packed[f"whh{layer + 1}"] = whh_p
        packed[f"b{layer + 1}"] = b_p
    packed["wfc"] = (jnp.zeros((HP, OUT_P), jnp.float32)
                     .at[:H, :OUTPUT_SIZE].set(raw["fc_w"].T))
    packed["bfc"] = (jnp.zeros((1, OUT_P), jnp.float32)
                     .at[0, :OUTPUT_SIZE].set(raw["fc_b"]))
    return packed


# ----------------------------------------------------------------------------
# Pure-JAX reference (sanity check only), using the raw PyTorch-layout weights
# ----------------------------------------------------------------------------
def reference_forward(x_btd, raw):
    H = HIDDEN_SIZE
    seq = jnp.transpose(x_btd, (1, 0, 2))
    B = x_btd.shape[0]
    for layer in range(NUM_LAYERS):
        w_ih, w_hh, b_ih, b_hh = raw["lstm"][layer]
        h = jnp.zeros((B, H), jnp.float32)
        c = jnp.zeros((B, H), jnp.float32)
        outs = []
        for t in range(seq.shape[0]):
            gates = seq[t] @ w_ih.T + h @ w_hh.T + b_ih + b_hh
            i_g = jax.nn.sigmoid(gates[:, 0 * H:1 * H])
            f_g = jax.nn.sigmoid(gates[:, 1 * H:2 * H])
            g_g = jnp.tanh(gates[:, 2 * H:3 * H])
            o_g = jax.nn.sigmoid(gates[:, 3 * H:4 * H])
            c = f_g * c + i_g * g_g
            h = o_g * jnp.tanh(c)
            outs.append(h)
        seq = jnp.stack(outs, axis=0)
    return seq[-1] @ raw["fc_w"].T + raw["fc_b"]


# ----------------------------------------------------------------------------
if __name__ == "__main__":
    key = jax.random.PRNGKey(0)
    key, pkey, xkey = jax.random.split(key, 3)

    raw = init_raw_params(pkey)
    packed = pack_params(raw)

    B, T = 32, 8   # batch_size from the original training script
    x = jax.random.normal(xkey, (B, T, INPUT_SIZE), dtype=jnp.float32)

    out = lstm_model_forward(x, packed)
    out = jax.block_until_ready(out)
    assert out.shape == (B, OUTPUT_SIZE), out.shape

    ref = jax.block_until_ready(reference_forward(x, raw))
    max_err = float(jnp.max(jnp.abs(out - ref)))
    assert jnp.allclose(out, ref, rtol=1e-3, atol=1e-3), max_err

    print("KERNEL_OK")
</pallas_src>

<mosaic_0001>
module attributes {stable_mosaic.version = 11 : i64} {
  func.func @_fused_lstm_fc_kernel(%arg0: memref<256x6xf32, #tpu.memory_space<vmem>>, %arg1: memref<6x512xf32, #tpu.memory_space<vmem>>, %arg2: memref<128x512xf32, #tpu.memory_space<vmem>>, %arg3: memref<1x512xf32, #tpu.memory_space<vmem>>, %arg4: memref<128x512xf32, #tpu.memory_space<vmem>>, %arg5: memref<128x512xf32, #tpu.memory_space<vmem>>, %arg6: memref<1x512xf32, #tpu.memory_space<vmem>>, %arg7: memref<128x128xf32, #tpu.memory_space<vmem>>, %arg8: memref<1x128xf32, #tpu.memory_space<vmem>>, %arg9: memref<32x128xf32, #tpu.memory_space<vmem>>) attributes {dimension_semantics = [], scalar_prefetch = 0 : i64, scratch_operands = 0 : i64, tpu.core_type = #tpu.core_type<tc>} {
    %c0 = arith.constant 0 : index
    %c0_0 = arith.constant 0 : index
    %0 = vector.load %arg0[%c0, %c0_0] : memref<256x6xf32, #tpu.memory_space<vmem>>, vector<256x6xf32>
    %c0_1 = arith.constant 0 : index
    %c0_2 = arith.constant 0 : index
    %1 = vector.load %arg1[%c0_1, %c0_2] : memref<6x512xf32, #tpu.memory_space<vmem>>, vector<6x512xf32>
    %cst = arith.constant dense<0.000000e+00> : vector<256x512xf32>
    %2 = tpu.matmul %0, %1, %cst {dimension_numbers = #tpu.dot_dimension_numbers<[1], [0], [0], [1], [0, 0, 1, 1], [], []>} : vector<256x6xf32>, vector<6x512xf32>, vector<256x512xf32> -> vector<256x512xf32>
    %c0_3 = arith.constant 0 : index
    %c0_4 = arith.constant 0 : index
    %3 = vector.load %arg3[%c0_3, %c0_4] : memref<1x512xf32, #tpu.memory_space<vmem>>, vector<1x512xf32>
    %4 = vector.broadcast %3 : vector<1x512xf32> to vector<256x512xf32>
    %5 = arith.addf %2, %4 : vector<256x512xf32>
    %c0_5 = arith.constant 0 : index
    %c0_6 = arith.constant 0 : index
    %6 = vector.load %arg2[%c0_5, %c0_6] : memref<128x512xf32, #tpu.memory_space<vmem>>, vector<128x512xf32>
    %cst_7 = arith.constant 0.000000e+00 : f32
    %7 = vector.broadcast %cst_7 : f32 to vector<32x128xf32>
    %cst_8 = arith.constant 0.000000e+00 : f32
    %8 = vector.broadcast %cst_8 : f32 to vector<32x128xf32>
    %9 = vector.extract_strided_slice %5 {offsets = [0, 0], sizes = [32, 512], strides = [1, 1]} : vector<256x512xf32> to vector<32x512xf32>
    %cst_9 = arith.constant dense<0.000000e+00> : vector<32x512xf32>
    %10 = tpu.matmul %7, %6, %cst_9 {dimension_numbers = #tpu.dot_dimension_numbers<[1], [0], [0], [1], [0, 0, 1, 1], [], []>} : vector<32x128xf32>, vector<128x512xf32>, vector<32x512xf32> -> vector<32x512xf32>
    %11 = arith.addf %9, %10 : vector<32x512xf32>
    %12 = vector.extract_strided_slice %11 {offsets = [0, 0], sizes = [32, 128], strides = [1, 1]} : vector<32x512xf32> to vector<32x128xf32>
    %13 = arith.negf %12 : vector<32x128xf32>
    %14 = math.exp %13 : vector<32x128xf32>
    %cst_10 = arith.constant 1.000000e+00 : f32
    %15 = vector.broadcast %cst_10 : f32 to vector<32x128xf32>
    %16 = arith.addf %15, %14 : vector<32x128xf32>
    %17 = arith.divf %15, %16 : vector<32x128xf32>
    %18 = vector.extract_strided_slice %11 {offsets = [0, 128], sizes = [32, 128], strides = [1, 1]} : vector<32x512xf32> to vector<32x128xf32>
    %19 = arith.negf %18 : vector<32x128xf32>
    %20 = math.exp %19 : vector<32x128xf32>
    %cst_11 = arith.constant 1.000000e+00 : f32
    %21 = vector.broadcast %cst_11 : f32 to vector<32x128xf32>
    %22 = arith.addf %21, %20 : vector<32x128xf32>
    %23 = arith.divf %21, %22 : vector<32x128xf32>
    %24 = vector.extract_strided_slice %11 {offsets = [0, 256], sizes = [32, 128], strides = [1, 1]} : vector<32x512xf32> to vector<32x128xf32>
    %25 = math.tanh %24 : vector<32x128xf32>
    %26 = vector.extract_strided_slice %11 {offsets = [0, 384], sizes = [32, 128], strides = [1, 1]} : vector<32x512xf32> to vector<32x128xf32>
    %27 = arith.negf %26 : vector<32x128xf32>
    %28 = math.exp %27 : vector<32x128xf32>
    %cst_12 = arith.constant 1.000000e+00 : f32
    %29 = vector.broadcast %cst_12 : f32 to vector<32x128xf32>
    %30 = arith.addf %29, %28 : vector<32x128xf32>
    %31 = arith.divf %29, %30 : vector<32x128xf32>
    %32 = arith.mulf %23, %8 : vector<32x128xf32>
    %33 = arith.mulf %17, %25 : vector<32x128xf32>
    %34 = arith.addf %32, %33 : vector<32x128xf32>
    %35 = math.tanh %34 : vector<32x128xf32>
    %36 = arith.mulf %31, %35 : vector<32x128xf32>
    %37 = vector.extract_strided_slice %5 {offsets = [32, 0], sizes = [32, 512], strides = [1, 1]} : vector<256x512xf32> to vector<32x512xf32>
    %cst_13 = arith.constant dense<0.000000e+00> : vector<32x512xf32>
    %38 = tpu.matmul %36, %6, %cst_13 {dimension_numbers = #tpu.dot_dimension_numbers<[1], [0], [0], [1], [0, 0, 1, 1], [], []>} : vector<32x128xf32>, vector<128x512xf32>, vector<32x512xf32> -> vector<32x512xf32>
    %39 = arith.addf %37, %38 : vector<32x512xf32>
    %40 = vector.extract_strided_slice %39 {offsets = [0, 0], sizes = [32, 128], strides = [1, 1]} : vector<32x512xf32> to vector<32x128xf32>
    %41 = arith.negf %40 : vector<32x128xf32>
    %42 = math.exp %41 : vector<32x128xf32>
    %cst_14 = arith.constant 1.000000e+00 : f32
    %43 = vector.broadcast %cst_14 : f32 to vector<32x128xf32>
    %44 = arith.addf %43, %42 : vector<32x128xf32>
    %45 = arith.divf %43, %44 : vector<32x128xf32>
    %46 = vector.extract_strided_slice %39 {offsets = [0, 128], sizes = [32, 128], strides = [1, 1]} : vector<32x512xf32> to vector<32x128xf32>
    %47 = arith.negf %46 : vector<32x128xf32>
    %48 = math.exp %47 : vector<32x128xf32>
    %cst_15 = arith.constant 1.000000e+00 : f32
    %49 = vector.broadcast %cst_15 : f32 to vector<32x128xf32>
    %50 = arith.addf %49, %48 : vector<32x128xf32>
    %51 = arith.divf %49, %50 : vector<32x128xf32>
    %52 = vector.extract_strided_slice %39 {offsets = [0, 256], sizes = [32, 128], strides = [1, 1]} : vector<32x512xf32> to vector<32x128xf32>
    %53 = math.tanh %52 : vector<32x128xf32>
    %54 = vector.extract_strided_slice %39 {offsets = [0, 384], sizes = [32, 128], strides = [1, 1]} : vector<32x512xf32> to vector<32x128xf32>
    %55 = arith.negf %54 : vector<32x128xf32>
    %56 = math.exp %55 : vector<32x128xf32>
    %cst_16 = arith.constant 1.000000e+00 : f32
    %57 = vector.broadcast %cst_16 : f32 to vector<32x128xf32>
    %58 = arith.addf %57, %56 : vector<32x128xf32>
    %59 = arith.divf %57, %58 : vector<32x128xf32>
    %60 = arith.mulf %51, %34 : vector<32x128xf32>
    %61 = arith.mulf %45, %53 : vector<32x128xf32>
    %62 = arith.addf %60, %61 : vector<32x128xf32>
    %63 = math.tanh %62 : vector<32x128xf32>
    %64 = arith.mulf %59, %63 : vector<32x128xf32>
    %65 = vector.extract_strided_slice %5 {offsets = [64, 0], sizes = [32, 512], strides = [1, 1]} : vector<256x512xf32> to vector<32x512xf32>
    %cst_17 = arith.constant dense<0.000000e+00> : vector<32x512xf32>
    %66 = tpu.matmul %64, %6, %cst_17 {dimension_numbers = #tpu.dot_dimension_numbers<[1], [0], [0], [1], [0, 0, 1, 1], [], []>} : vector<32x128xf32>, vector<128x512xf32>, vector<32x512xf32> -> vector<32x512xf32>
    %67 = arith.addf %65, %66 : vector<32x512xf32>
    %68 = vector.extract_strided_slice %67 {offsets = [0, 0], sizes = [32, 128], strides = [1, 1]} : vector<32x512xf32> to vector<32x128xf32>
    %69 = arith.negf %68 : vector<32x128xf32>
    %70 = math.exp %69 : vector<32x128xf32>
    %cst_18 = arith.constant 1.000000e+00 : f32
    %71 = vector.broadcast %cst_18 : f32 to vector<32x128xf32>
    %72 = arith.addf %71, %70 : vector<32x128xf32>
    %73 = arith.divf %71, %72 : vector<32x128xf32>
    %74 = vector.extract_strided_slice %67 {offsets = [0, 128], sizes = [32, 128], strides = [1, 1]} : vector<32x512xf32> to vector<32x128xf32>
    %75 = arith.negf %74 : vector<32x128xf32>
    %76 = math.exp %75 : vector<32x128xf32>
    %cst_19 = arith.constant 1.000000e+00 : f32
    %77 = vector.broadcast %cst_19 : f32 to vector<32x128xf32>
    %78 = arith.addf %77, %76 : vector<32x128xf32>
    %79 = arith.divf %77, %78 : vector<32x128xf32>
    %80 = vector.extract_strided_slice %67 {offsets = [0, 256], sizes = [32, 128], strides = [1, 1]} : vector<32x512xf32> to vector<32x128xf32>
    %81 = math.tanh %80 : vector<32x128xf32>
    %82 = vector.extract_strided_slice %67 {offsets = [0, 384], sizes = [32, 128], strides = [1, 1]} : vector<32x512xf32> to vector<32x128xf32>
    %83 = arith.negf %82 : vector<32x128xf32>
    %84 = math.exp %83 : vector<32x128xf32>
    %cst_20 = arith.constant 1.000000e+00 : f32
    %85 = vector.broadcast %cst_20 : f32 to vector<32x128xf32>
    %86 = arith.addf %85, %84 : vector<32x128xf32>
    %87 = arith.divf %85, %86 : vector<32x128xf32>
    %88 = arith.mulf %79, %62 : vector<32x128xf32>
    %89 = arith.mulf %73, %81 : vector<32x128xf32>
    %90 = arith.addf %88, %89 : vector<32x128xf32>
    %91 = math.tanh %90 : vector<32x128xf32>
    %92 = arith.mulf %87, %91 : vector<32x128xf32>
    %93 = vector.extract_strided_slice %5 {offsets = [96, 0], sizes = [32, 512], strides = [1, 1]} : vector<256x512xf32> to vector<32x512xf32>
    %cst_21 = arith.constant dense<0.000000e+00> : vector<32x512xf32>
    %94 = tpu.matmul %92, %6, %cst_21 {dimension_numbers = #tpu.dot_dimension_numbers<[1], [0], [0], [1], [0, 0, 1, 1], [], []>} : vector<32x128xf32>, vector<128x512xf32>, vector<32x512xf32> -> vector<32x512xf32>
    %95 = arith.addf %93, %94 : vector<32x512xf32>
    %96 = vector.extract_strided_slice %95 {offsets = [0, 0], sizes = [32, 128], strides = [1, 1]} : vector<32x512xf32> to vector<32x128xf32>
    %97 = arith.negf %96 : vector<32x128xf32>
    %98 = math.exp %97 : vector<32x128xf32>
    %cst_22 = arith.constant 1.000000e+00 : f32
    %99 = vector.broadcast %cst_22 : f32 to vector<32x128xf32>
    %100 = arith.addf %99, %98 : vector<32x128xf32>
    %101 = arith.divf %99, %100 : vector<32x128xf32>
    %102 = vector.extract_strided_slice %95 {offsets = [0, 128], sizes = [32, 128], strides = [1, 1]} : vector<32x512xf32> to vector<32x128xf32>
    %103 = arith.negf %102 : vector<32x128xf32>
    %104 = math.exp %103 : vector<32x128xf32>
    %cst_23 = arith.constant 1.000000e+00 : f32
    %105 = vector.broadcast %cst_23 : f32 to vector<32x128xf32>
    %106 = arith.addf %105, %104 : vector<32x128xf32>
    %107 = arith.divf %105, %106 : vector<32x128xf32>
    %108 = vector.extract_strided_slice %95 {offsets = [0, 256], sizes = [32, 128], strides = [1, 1]} : vector<32x512xf32> to vector<32x128xf32>
    %109 = math.tanh %108 : vector<32x128xf32>
    %110 = vector.extract_strided_slice %95 {offsets = [0, 384], sizes = [32, 128], strides = [1, 1]} : vector<32x512xf32> to vector<32x128xf32>
    %111 = arith.negf %110 : vector<32x128xf32>
    %112 = math.exp %111 : vector<32x128xf32>
    %cst_24 = arith.constant 1.000000e+00 : f32
    %113 = vector.broadcast %cst_24 : f32 to vector<32x128xf32>
    %114 = arith.addf %113, %112 : vector<32x128xf32>
    %115 = arith.divf %113, %114 : vector<32x128xf32>
    %116 = arith.mulf %107, %90 : vector<32x128xf32>
    %117 = arith.mulf %101, %109 : vector<32x128xf32>
    %118 = arith.addf %116, %117 : vector<32x128xf32>
    %119 = math.tanh %118 : vector<32x128xf32>
    %120 = arith.mulf %115, %119 : vector<32x128xf32>
    %121 = vector.extract_strided_slice %5 {offsets = [128, 0], sizes = [32, 512], strides = [1, 1]} : vector<256x512xf32> to vector<32x512xf32>
    %cst_25 = arith.constant dense<0.000000e+00> : vector<32x512xf32>
    %122 = tpu.matmul %120, %6, %cst_25 {dimension_numbers = #tpu.dot_dimension_numbers<[1], [0], [0], [1], [0, 0, 1, 1], [], []>} : vector<32x128xf32>, vector<128x512xf32>, vector<32x512xf32> -> vector<32x512xf32>
    %123 = arith.addf %121, %122 : vector<32x512xf32>
    %124 = vector.extract_strided_slice %123 {offsets = [0, 0], sizes = [32, 128], strides = [1, 1]} : vector<32x512xf32> to vector<32x128xf32>
    %125 = arith.negf %124 : vector<32x128xf32>
    %126 = math.exp %125 : vector<32x128xf32>
    %cst_26 = arith.constant 1.000000e+00 : f32
    %127 = vector.broadcast %cst_26 : f32 to vector<32x128xf32>
    %128 = arith.addf %127, %126 : vector<32x128xf32>
    %129 = arith.divf %127, %128 : vector<32x128xf32>
    %130 = vector.extract_strided_slice %123 {offsets = [0, 128], sizes = [32, 128], strides = [1, 1]} : vector<32x512xf32> to vector<32x128xf32>
    %131 = arith.negf %130 : vector<32x128xf32>
    %132 = math.exp %131 : vector<32x128xf32>
    %cst_27 = arith.constant 1.000000e+00 : f32
    %133 = vector.broadcast %cst_27 : f32 to vector<32x128xf32>
    %134 = arith.addf %133, %132 : vector<32x128xf32>
    %135 = arith.divf %133, %134 : vector<32x128xf32>
    %136 = vector.extract_strided_slice %123 {offsets = [0, 256], sizes = [32, 128], strides = [1, 1]} : vector<32x512xf32> to vector<32x128xf32>
    %137 = math.tanh %136 : vector<32x128xf32>
    %138 = vector.extract_strided_slice %123 {offsets = [0, 384], sizes = [32, 128], strides = [1, 1]} : vector<32x512xf32> to vector<32x128xf32>
    %139 = arith.negf %138 : vector<32x128xf32>
    %140 = math.exp %139 : vector<32x128xf32>
    %cst_28 = arith.constant 1.000000e+00 : f32
    %141 = vector.broadcast %cst_28 : f32 to vector<32x128xf32>
    %142 = arith.addf %141, %140 : vector<32x128xf32>
    %143 = arith.divf %141, %142 : vector<32x128xf32>
    %144 = arith.mulf %135, %118 : vector<32x128xf32>
    %145 = arith.mulf %129, %137 : vector<32x128xf32>
    %146 = arith.addf %144, %145 : vector<32x128xf32>
    %147 = math.tanh %146 : vector<32x128xf32>
    %148 = arith.mulf %143, %147 : vector<32x128xf32>
    %149 = vector.extract_strided_slice %5 {offsets = [160, 0], sizes = [32, 512], strides = [1, 1]} : vector<256x512xf32> to vector<32x512xf32>
    %cst_29 = arith.constant dense<0.000000e+00> : vector<32x512xf32>
    %150 = tpu.matmul %148, %6, %cst_29 {dimension_numbers = #tpu.dot_dimension_numbers<[1], [0], [0], [1], [0, 0, 1, 1], [], []>} : vector<32x128xf32>, vector<128x512xf32>, vector<32x512xf32> -> vector<32x512xf32>
    %151 = arith.addf %149, %150 : vector<32x512xf32>
    %152 = vector.extract_strided_slice %151 {offsets = [0, 0], sizes = [32, 128], strides = [1, 1]} : vector<32x512xf32> to vector<32x128xf32>
    %153 = arith.negf %152 : vector<32x128xf32>
    %154 = math.exp %153 : vector<32x128xf32>
    %cst_30 = arith.constant 1.000000e+00 : f32
    %155 = vector.broadcast %cst_30 : f32 to vector<32x128xf32>
    %156 = arith.addf %155, %154 : vector<32x128xf32>
    %157 = arith.divf %155, %156 : vector<32x128xf32>
    %158 = vector.extract_strided_slice %151 {offsets = [0, 128], sizes = [32, 128], strides = [1, 1]} : vector<32x512xf32> to vector<32x128xf32>
    %159 = arith.negf %158 : vector<32x128xf32>
    %160 = math.exp %159 : vector<32x128xf32>
    %cst_31 = arith.constant 1.000000e+00 : f32
    %161 = vector.broadcast %cst_31 : f32 to vector<32x128xf32>
    %162 = arith.addf %161, %160 : vector<32x128xf32>
    %163 = arith.divf %161, %162 : vector<32x128xf32>
    %164 = vector.extract_strided_slice %151 {offsets = [0, 256], sizes = [32, 128], strides = [1, 1]} : vector<32x512xf32> to vector<32x128xf32>
    %165 = math.tanh %164 : vector<32x128xf32>
    %166 = vector.extract_strided_slice %151 {offsets = [0, 384], sizes = [32, 128], strides = [1, 1]} : vector<32x512xf32> to vector<32x128xf32>
    %167 = arith.negf %166 : vector<32x128xf32>
    %168 = math.exp %167 : vector<32x128xf32>
    %cst_32 = arith.constant 1.000000e+00 : f32
    %169 = vector.broadcast %cst_32 : f32 to vector<32x128xf32>
    %170 = arith.addf %169, %168 : vector<32x128xf32>
    %171 = arith.divf %169, %170 : vector<32x128xf32>
    %172 = arith.mulf %163, %146 : vector<32x128xf32>
    %173 = arith.mulf %157, %165 : vector<32x128xf32>
    %174 = arith.addf %172, %173 : vector<32x128xf32>
    %175 = math.tanh %174 : vector<32x128xf32>
    %176 = arith.mulf %171, %175 : vector<32x128xf32>
    %177 = vector.extract_strided_slice %5 {offsets = [192, 0], sizes = [32, 512], strides = [1, 1]} : vector<256x512xf32> to vector<32x512xf32>
    %cst_33 = arith.constant dense<0.000000e+00> : vector<32x512xf32>
    %178 = tpu.matmul %176, %6, %cst_33 {dimension_numbers = #tpu.dot_dimension_numbers<[1], [0], [0], [1], [0, 0, 1, 1], [], []>} : vector<32x128xf32>, vector<128x512xf32>, vector<32x512xf32> -> vector<32x512xf32>
    %179 = arith.addf %177, %178 : vector<32x512xf32>
    %180 = vector.extract_strided_slice %179 {offsets = [0, 0], sizes = [32, 128], strides = [1, 1]} : vector<32x512xf32> to vector<32x128xf32>
    %181 = arith.negf %180 : vector<32x128xf32>
    %182 = math.exp %181 : vector<32x128xf32>
    %cst_34 = arith.constant 1.000000e+00 : f32
    %183 = vector.broadcast %cst_34 : f32 to vector<32x128xf32>
    %184 = arith.addf %183, %182 : vector<32x128xf32>
    %185 = arith.divf %183, %184 : vector<32x128xf32>
    %186 = vector.extract_strided_slice %179 {offsets = [0, 128], sizes = [32, 128], strides = [1, 1]} : vector<32x512xf32> to vector<32x128xf32>
    %187 = arith.negf %186 : vector<32x128xf32>
    %188 = math.exp %187 : vector<32x128xf32>
    %cst_35 = arith.constant 1.000000e+00 : f32
    %189 = vector.broadcast %cst_35 : f32 to vector<32x128xf32>
    %190 = arith.addf %189, %188 : vector<32x128xf32>
    %191 = arith.divf %189, %190 : vector<32x128xf32>
    %192 = vector.extract_strided_slice %179 {offsets = [0, 256], sizes = [32, 128], strides = [1, 1]} : vector<32x512xf32> to vector<32x128xf32>
    %193 = math.tanh %192 : vector<32x128xf32>
    %194 = vector.extract_strided_slice %179 {offsets = [0, 384], sizes = [32, 128], strides = [1, 1]} : vector<32x512xf32> to vector<32x128xf32>
    %195 = arith.negf %194 : vector<32x128xf32>
    %196 = math.exp %195 : vector<32x128xf32>
    %cst_36 = arith.constant 1.000000e+00 : f32
    %197 = vector.broadcast %cst_36 : f32 to vector<32x128xf32>
    %198 = arith.addf %197, %196 : vector<32x128xf32>
    %199 = arith.divf %197, %198 : vector<32x128xf32>
    %200 = arith.mulf %191, %174 : vector<32x128xf32>
    %201 = arith.mulf %185, %193 : vector<32x128xf32>
    %202 = arith.addf %200, %201 : vector<32x128xf32>
    %203 = math.tanh %202 : vector<32x128xf32>
    %204 = arith.mulf %199, %203 : vector<32x128xf32>
    %205 = vector.extract_strided_slice %5 {offsets = [224, 0], sizes = [32, 512], strides = [1, 1]} : vector<256x512xf32> to vector<32x512xf32>
    %cst_37 = arith.constant dense<0.000000e+00> : vector<32x512xf32>
    %206 = tpu.matmul %204, %6, %cst_37 {dimension_numbers = #tpu.dot_dimension_numbers<[1], [0], [0], [1], [0, 0, 1, 1], [], []>} : vector<32x128xf32>, vector<128x512xf32>, vector<32x512xf32> -> vector<32x512xf32>
    %207 = arith.addf %205, %206 : vector<32x512xf32>
    %208 = vector.extract_strided_slice %207 {offsets = [0, 0], sizes = [32, 128], strides = [1, 1]} : vector<32x512xf32> to vector<32x128xf32>
    %209 = arith.negf %208 : vector<32x128xf32>
    %210 = math.exp %209 : vector<32x128xf32>
    %cst_38 = arith.constant 1.000000e+00 : f32
    %211 = vector.broadcast %cst_38 : f32 to vector<32x128xf32>
    %212 = arith.addf %211, %210 : vector<32x128xf32>
    %213 = arith.divf %211, %212 : vector<32x128xf32>
    %214 = vector.extract_strided_slice %207 {offsets = [0, 128], sizes = [32, 128], strides = [1, 1]} : vector<32x512xf32> to vector<32x128xf32>
    %215 = arith.negf %214 : vector<32x128xf32>
    %216 = math.exp %215 : vector<32x128xf32>
    %cst_39 = arith.constant 1.000000e+00 : f32
    %217 = vector.broadcast %cst_39 : f32 to vector<32x128xf32>
    %218 = arith.addf %217, %216 : vector<32x128xf32>
    %219 = arith.divf %217, %218 : vector<32x128xf32>
    %220 = vector.extract_strided_slice %207 {offsets = [0, 256], sizes = [32, 128], strides = [1, 1]} : vector<32x512xf32> to vector<32x128xf32>
    %221 = math.tanh %220 : vector<32x128xf32>
    %222 = vector.extract_strided_slice %207 {offsets = [0, 384], sizes = [32, 128], strides = [1, 1]} : vector<32x512xf32> to vector<32x128xf32>
    %223 = arith.negf %222 : vector<32x128xf32>
    %224 = math.exp %223 : vector<32x128xf32>
    %cst_40 = arith.constant 1.000000e+00 : f32
    %225 = vector.broadcast %cst_40 : f32 to vector<32x128xf32>
    %226 = arith.addf %225, %224 : vector<32x128xf32>
    %227 = arith.divf %225, %226 : vector<32x128xf32>
    %228 = arith.mulf %219, %202 : vector<32x128xf32>
    %229 = arith.mulf %213, %221 : vector<32x128xf32>
    %230 = arith.addf %228, %229 : vector<32x128xf32>
    %231 = math.tanh %230 : vector<32x128xf32>
    %232 = arith.mulf %227, %231 : vector<32x128xf32>
    %233 = tpu.concatenate %36, %64, %92, %120, %148, %176, %204, %232 in 0 : vector<32x128xf32>, vector<32x128xf32>, vector<32x128xf32>, vector<32x128xf32>, vector<32x128xf32>, vector<32x128xf32>, vector<32x128xf32>, vector<32x128xf32> -> vector<256x128xf32>
    %c0_41 = arith.constant 0 : index
    %c0_42 = arith.constant 0 : index
    %234 = vector.load %arg4[%c0_41, %c0_42] : memref<128x512xf32, #tpu.memory_space<vmem>>, vector<128x512xf32>
    %cst_43 = arith.constant dense<0.000000e+00> : vector<256x512xf32>
    %235 = tpu.matmul %233, %234, %cst_43 {dimension_numbers = #tpu.dot_dimension_numbers<[1], [0], [0], [1], [0, 0, 1, 1], [], []>} : vector<256x128xf32>, vector<128x512xf32>, vector<256x512xf32> -> vector<256x512xf32>
    %c0_44 = arith.constant 0 : index
    %c0_45 = arith.constant 0 : index
    %236 = vector.load %arg6[%c0_44, %c0_45] : memref<1x512xf32, #tpu.memory_space<vmem>>, vector<1x512xf32>
    %237 = vector.broadcast %236 : vector<1x512xf32> to vector<256x512xf32>
    %238 = arith.addf %235, %237 : vector<256x512xf32>
    %c0_46 = arith.constant 0 : index
    %c0_47 = arith.constant 0 : index
    %239 = vector.load %arg5[%c0_46, %c0_47] : memref<128x512xf32, #tpu.memory_space<vmem>>, vector<128x512xf32>
    %cst_48 = arith.constant 0.000000e+00 : f32
    %240 = vector.broadcast %cst_48 : f32 to vector<32x128xf32>
    %cst_49 = arith.constant 0.000000e+00 : f32
    %241 = vector.broadcast %cst_49 : f32 to vector<32x128xf32>
    %242 = vector.extract_strided_slice %238 {offsets = [0, 0], sizes = [32, 512], strides = [1, 1]} : vector<256x512xf32> to vector<32x512xf32>
    %cst_50 = arith.constant dense<0.000000e+00> : vector<32x512xf32>
    %243 = tpu.matmul %240, %239, %cst_50 {dimension_numbers = #tpu.dot_dimension_numbers<[1], [0], [0], [1], [0, 0, 1, 1], [], []>} : vector<32x128xf32>, vector<128x512xf32>, vector<32x512xf32> -> vector<32x512xf32>
    %244 = arith.addf %242, %243 : vector<32x512xf32>
    %245 = vector.extract_strided_slice %244 {offsets = [0, 0], sizes = [32, 128], strides = [1, 1]} : vector<32x512xf32> to vector<32x128xf32>
    %246 = arith.negf %245 : vector<32x128xf32>
    %247 = math.exp %246 : vector<32x128xf32>
    %cst_51 = arith.constant 1.000000e+00 : f32
    %248 = vector.broadcast %cst_51 : f32 to vector<32x128xf32>
    %249 = arith.addf %248, %247 : vector<32x128xf32>
    %250 = arith.divf %248, %249 : vector<32x128xf32>
    %251 = vector.extract_strided_slice %244 {offsets = [0, 128], sizes = [32, 128], strides = [1, 1]} : vector<32x512xf32> to vector<32x128xf32>
    %252 = arith.negf %251 : vector<32x128xf32>
    %253 = math.exp %252 : vector<32x128xf32>
    %cst_52 = arith.constant 1.000000e+00 : f32
    %254 = vector.broadcast %cst_52 : f32 to vector<32x128xf32>
    %255 = arith.addf %254, %253 : vector<32x128xf32>
    %256 = arith.divf %254, %255 : vector<32x128xf32>
    %257 = vector.extract_strided_slice %244 {offsets = [0, 256], sizes = [32, 128], strides = [1, 1]} : vector<32x512xf32> to vector<32x128xf32>
    %258 = math.tanh %257 : vector<32x128xf32>
    %259 = vector.extract_strided_slice %244 {offsets = [0, 384], sizes = [32, 128], strides = [1, 1]} : vector<32x512xf32> to vector<32x128xf32>
    %260 = arith.negf %259 : vector<32x128xf32>
    %261 = math.exp %260 : vector<32x128xf32>
    %cst_53 = arith.constant 1.000000e+00 : f32
    %262 = vector.broadcast %cst_53 : f32 to vector<32x128xf32>
    %263 = arith.addf %262, %261 : vector<32x128xf32>
    %264 = arith.divf %262, %263 : vector<32x128xf32>
    %265 = arith.mulf %256, %241 : vector<32x128xf32>
    %266 = arith.mulf %250, %258 : vector<32x128xf32>
    %267 = arith.addf %265, %266 : vector<32x128xf32>
    %268 = math.tanh %267 : vector<32x128xf32>
    %269 = arith.mulf %264, %268 : vector<32x128xf32>
    %270 = vector.extract_strided_slice %238 {offsets = [32, 0], sizes = [32, 512], strides = [1, 1]} : vector<256x512xf32> to vector<32x512xf32>
    %cst_54 = arith.constant dense<0.000000e+00> : vector<32x512xf32>
    %271 = tpu.matmul %269, %239, %cst_54 {dimension_numbers = #tpu.dot_dimension_numbers<[1], [0], [0], [1], [0, 0, 1, 1], [], []>} : vector<32x128xf32>, vector<128x512xf32>, vector<32x512xf32> -> vector<32x512xf32>
    %272 = arith.addf %270, %271 : vector<32x512xf32>
    %273 = vector.extract_strided_slice %272 {offsets = [0, 0], sizes = [32, 128], strides = [1, 1]} : vector<32x512xf32> to vector<32x128xf32>
    %274 = arith.negf %273 : vector<32x128xf32>
    %275 = math.exp %274 : vector<32x128xf32>
    %cst_55 = arith.constant 1.000000e+00 : f32
    %276 = vector.broadcast %cst_55 : f32 to vector<32x128xf32>
    %277 = arith.addf %276, %275 : vector<32x128xf32>
    %278 = arith.divf %276, %277 : vector<32x128xf32>
    %279 = vector.extract_strided_slice %272 {offsets = [0, 128], sizes = [32, 128], strides = [1, 1]} : vector<32x512xf32> to vector<32x128xf32>
    %280 = arith.negf %279 : vector<32x128xf32>
    %281 = math.exp %280 : vector<32x128xf32>
    %cst_56 = arith.constant 1.000000e+00 : f32
    %282 = vector.broadcast %cst_56 : f32 to vector<32x128xf32>
    %283 = arith.addf %282, %281 : vector<32x128xf32>
    %284 = arith.divf %282, %283 : vector<32x128xf32>
    %285 = vector.extract_strided_slice %272 {offsets = [0, 256], sizes = [32, 128], strides = [1, 1]} : vector<32x512xf32> to vector<32x128xf32>
    %286 = math.tanh %285 : vector<32x128xf32>
    %287 = vector.extract_strided_slice %272 {offsets = [0, 384], sizes = [32, 128], strides = [1, 1]} : vector<32x512xf32> to vector<32x128xf32>
    %288 = arith.negf %287 : vector<32x128xf32>
    %289 = math.exp %288 : vector<32x128xf32>
    %cst_57 = arith.constant 1.000000e+00 : f32
    %290 = vector.broadcast %cst_57 : f32 to vector<32x128xf32>
    %291 = arith.addf %290, %289 : vector<32x128xf32>
    %292 = arith.divf %290, %291 : vector<32x128xf32>
    %293 = arith.mulf %284, %267 : vector<32x128xf32>
    %294 = arith.mulf %278, %286 : vector<32x128xf32>
    %295 = arith.addf %293, %294 : vector<32x128xf32>
    %296 = math.tanh %295 : vector<32x128xf32>
    %297 = arith.mulf %292, %296 : vector<32x128xf32>
    %298 = vector.extract_strided_slice %238 {offsets = [64, 0], sizes = [32, 512], strides = [1, 1]} : vector<256x512xf32> to vector<32x512xf32>
    %cst_58 = arith.constant dense<0.000000e+00> : vector<32x512xf32>
    %299 = tpu.matmul %297, %239, %cst_58 {dimension_numbers = #tpu.dot_dimension_numbers<[1], [0], [0], [1], [0, 0, 1, 1], [], []>} : vector<32x128xf32>, vector<128x512xf32>, vector<32x512xf32> -> vector<32x512xf32>
    %300 = arith.addf %298, %299 : vector<32x512xf32>
    %301 = vector.extract_strided_slice %300 {offsets = [0, 0], sizes = [32, 128], strides = [1, 1]} : vector<32x512xf32> to vector<32x128xf32>
    %302 = arith.negf %301 : vector<32x128xf32>
    %303 = math.exp %302 : vector<32x128xf32>
    %cst_59 = arith.constant 1.000000e+00 : f32
    %304 = vector.broadcast %cst_59 : f32 to vector<32x128xf32>
    %305 = arith.addf %304, %303 : vector<32x128xf32>
    %306 = arith.divf %304, %305 : vector<32x128xf32>
    %307 = vector.extract_strided_slice %300 {offsets = [0, 128], sizes = [32, 128], strides = [1, 1]} : vector<32x512xf32> to vector<32x128xf32>
    %308 = arith.negf %307 : vector<32x128xf32>
    %309 = math.exp %308 : vector<32x128xf32>
    %cst_60 = arith.constant 1.000000e+00 : f32
    %310 = vector.broadcast %cst_60 : f32 to vector<32x128xf32>
    %311 = arith.addf %310, %309 : vector<32x128xf32>
    %312 = arith.divf %310, %311 : vector<32x128xf32>
    %313 = vector.extract_strided_slice %300 {offsets = [0, 256], sizes = [32, 128], strides = [1, 1]} : vector<32x512xf32> to vector<32x128xf32>
    %314 = math.tanh %313 : vector<32x128xf32>
    %315 = vector.extract_strided_slice %300 {offsets = [0, 384], sizes = [32, 128], strides = [1, 1]} : vector<32x512xf32> to vector<32x128xf32>
    %316 = arith.negf %315 : vector<32x128xf32>
    %317 = math.exp %316 : vector<32x128xf32>
    %cst_61 = arith.constant 1.000000e+00 : f32
    %318 = vector.broadcast %cst_61 : f32 to vector<32x128xf32>
    %319 = arith.addf %318, %317 : vector<32x128xf32>
    %320 = arith.divf %318, %319 : vector<32x128xf32>
    %321 = arith.mulf %312, %295 : vector<32x128xf32>
    %322 = arith.mulf %306, %314 : vector<32x128xf32>
    %323 = arith.addf %321, %322 : vector<32x128xf32>
    %324 = math.tanh %323 : vector<32x128xf32>
    %325 = arith.mulf %320, %324 : vector<32x128xf32>
    %326 = vector.extract_strided_slice %238 {offsets = [96, 0], sizes = [32, 512], strides = [1, 1]} : vector<256x512xf32> to vector<32x512xf32>
    %cst_62 = arith.constant dense<0.000000e+00> : vector<32x512xf32>
    %327 = tpu.matmul %325, %239, %cst_62 {dimension_numbers = #tpu.dot_dimension_numbers<[1], [0], [0], [1], [0, 0, 1, 1], [], []>} : vector<32x128xf32>, vector<128x512xf32>, vector<32x512xf32> -> vector<32x512xf32>
    %328 = arith.addf %326, %327 : vector<32x512xf32>
    %329 = vector.extract_strided_slice %328 {offsets = [0, 0], sizes = [32, 128], strides = [1, 1]} : vector<32x512xf32> to vector<32x128xf32>
    %330 = arith.negf %329 : vector<32x128xf32>
    %331 = math.exp %330 : vector<32x128xf32>
    %cst_63 = arith.constant 1.000000e+00 : f32
    %332 = vector.broadcast %cst_63 : f32 to vector<32x128xf32>
    %333 = arith.addf %332, %331 : vector<32x128xf32>
    %334 = arith.divf %332, %333 : vector<32x128xf32>
    %335 = vector.extract_strided_slice %328 {offsets = [0, 128], sizes = [32, 128], strides = [1, 1]} : vector<32x512xf32> to vector<32x128xf32>
    %336 = arith.negf %335 : vector<32x128xf32>
    %337 = math.exp %336 : vector<32x128xf32>
    %cst_64 = arith.constant 1.000000e+00 : f32
    %338 = vector.broadcast %cst_64 : f32 to vector<32x128xf32>
    %339 = arith.addf %338, %337 : vector<32x128xf32>
    %340 = arith.divf %338, %339 : vector<32x128xf32>
    %341 = vector.extract_strided_slice %328 {offsets = [0, 256], sizes = [32, 128], strides = [1, 1]} : vector<32x512xf32> to vector<32x128xf32>
    %342 = math.tanh %341 : vector<32x128xf32>
    %343 = vector.extract_strided_slice %328 {offsets = [0, 384], sizes = [32, 128], strides = [1, 1]} : vector<32x512xf32> to vector<32x128xf32>
    %344 = arith.negf %343 : vector<32x128xf32>
    %345 = math.exp %344 : vector<32x128xf32>
    %cst_65 = arith.constant 1.000000e+00 : f32
    %346 = vector.broadcast %cst_65 : f32 to vector<32x128xf32>
    %347 = arith.addf %346, %345 : vector<32x128xf32>
    %348 = arith.divf %346, %347 : vector<32x128xf32>
    %349 = arith.mulf %340, %323 : vector<32x128xf32>
    %350 = arith.mulf %334, %342 : vector<32x128xf32>
    %351 = arith.addf %349, %350 : vector<32x128xf32>
    %352 = math.tanh %351 : vector<32x128xf32>
    %353 = arith.mulf %348, %352 : vector<32x128xf32>
    %354 = vector.extract_strided_slice %238 {offsets = [128, 0], sizes = [32, 512], strides = [1, 1]} : vector<256x512xf32> to vector<32x512xf32>
    %cst_66 = arith.constant dense<0.000000e+00> : vector<32x512xf32>
    %355 = tpu.matmul %353, %239, %cst_66 {dimension_numbers = #tpu.dot_dimension_numbers<[1], [0], [0], [1], [0, 0, 1, 1], [], []>} : vector<32x128xf32>, vector<128x512xf32>, vector<32x512xf32> -> vector<32x512xf32>
    %356 = arith.addf %354, %355 : vector<32x512xf32>
    %357 = vector.extract_strided_slice %356 {offsets = [0, 0], sizes = [32, 128], strides = [1, 1]} : vector<32x512xf32> to vector<32x128xf32>
    %358 = arith.negf %357 : vector<32x128xf32>
    %359 = math.exp %358 : vector<32x128xf32>
    %cst_67 = arith.constant 1.000000e+00 : f32
    %360 = vector.broadcast %cst_67 : f32 to vector<32x128xf32>
    %361 = arith.addf %360, %359 : vector<32x128xf32>
    %362 = arith.divf %360, %361 : vector<32x128xf32>
    %363 = vector.extract_strided_slice %356 {offsets = [0, 128], sizes = [32, 128], strides = [1, 1]} : vector<32x512xf32> to vector<32x128xf32>
    %364 = arith.negf %363 : vector<32x128xf32>
    %365 = math.exp %364 : vector<32x128xf32>
    %cst_68 = arith.constant 1.000000e+00 : f32
    %366 = vector.broadcast %cst_68 : f32 to vector<32x128xf32>
    %367 = arith.addf %366, %365 : vector<32x128xf32>
    %368 = arith.divf %366, %367 : vector<32x128xf32>
    %369 = vector.extract_strided_slice %356 {offsets = [0, 256], sizes = [32, 128], strides = [1, 1]} : vector<32x512xf32> to vector<32x128xf32>
    %370 = math.tanh %369 : vector<32x128xf32>
    %371 = vector.extract_strided_slice %356 {offsets = [0, 384], sizes = [32, 128], strides = [1, 1]} : vector<32x512xf32> to vector<32x128xf32>
    %372 = arith.negf %371 : vector<32x128xf32>
    %373 = math.exp %372 : vector<32x128xf32>
    %cst_69 = arith.constant 1.000000e+00 : f32
    %374 = vector.broadcast %cst_69 : f32 to vector<32x128xf32>
    %375 = arith.addf %374, %373 : vector<32x128xf32>
    %376 = arith.divf %374, %375 : vector<32x128xf32>
    %377 = arith.mulf %368, %351 : vector<32x128xf32>
    %378 = arith.mulf %362, %370 : vector<32x128xf32>
    %379 = arith.addf %377, %378 : vector<32x128xf32>
    %380 = math.tanh %379 : vector<32x128xf32>
    %381 = arith.mulf %376, %380 : vector<32x128xf32>
    %382 = vector.extract_strided_slice %238 {offsets = [160, 0], sizes = [32, 512], strides = [1, 1]} : vector<256x512xf32> to vector<32x512xf32>
    %cst_70 = arith.constant dense<0.000000e+00> : vector<32x512xf32>
    %383 = tpu.matmul %381, %239, %cst_70 {dimension_numbers = #tpu.dot_dimension_numbers<[1], [0], [0], [1], [0, 0, 1, 1], [], []>} : vector<32x128xf32>, vector<128x512xf32>, vector<32x512xf32> -> vector<32x512xf32>
    %384 = arith.addf %382, %383 : vector<32x512xf32>
    %385 = vector.extract_strided_slice %384 {offsets = [0, 0], sizes = [32, 128], strides = [1, 1]} : vector<32x512xf32> to vector<32x128xf32>
    %386 = arith.negf %385 : vector<32x128xf32>
    %387 = math.exp %386 : vector<32x128xf32>
    %cst_71 = arith.constant 1.000000e+00 : f32
    %388 = vector.broadcast %cst_71 : f32 to vector<32x128xf32>
    %389 = arith.addf %388, %387 : vector<32x128xf32>
    %390 = arith.divf %388, %389 : vector<32x128xf32>
    %391 = vector.extract_strided_slice %384 {offsets = [0, 128], sizes = [32, 128], strides = [1, 1]} : vector<32x512xf32> to vector<32x128xf32>
    %392 = arith.negf %391 : vector<32x128xf32>
    %393 = math.exp %392 : vector<32x128xf32>
    %cst_72 = arith.constant 1.000000e+00 : f32
    %394 = vector.broadcast %cst_72 : f32 to vector<32x128xf32>
    %395 = arith.addf %394, %393 : vector<32x128xf32>
    %396 = arith.divf %394, %395 : vector<32x128xf32>
    %397 = vector.extract_strided_slice %384 {offsets = [0, 256], sizes = [32, 128], strides = [1, 1]} : vector<32x512xf32> to vector<32x128xf32>
    %398 = math.tanh %397 : vector<32x128xf32>
    %399 = vector.extract_strided_slice %384 {offsets = [0, 384], sizes = [32, 128], strides = [1, 1]} : vector<32x512xf32> to vector<32x128xf32>
    %400 = arith.negf %399 : vector<32x128xf32>
    %401 = math.exp %400 : vector<32x128xf32>
    %cst_73 = arith.constant 1.000000e+00 : f32
    %402 = vector.broadcast %cst_73 : f32 to vector<32x128xf32>
    %403 = arith.addf %402, %401 : vector<32x128xf32>
    %404 = arith.divf %402, %403 : vector<32x128xf32>
    %405 = arith.mulf %396, %379 : vector<32x128xf32>
    %406 = arith.mulf %390, %398 : vector<32x128xf32>
    %407 = arith.addf %405, %406 : vector<32x128xf32>
    %408 = math.tanh %407 : vector<32x128xf32>
    %409 = arith.mulf %404, %408 : vector<32x128xf32>
    %410 = vector.extract_strided_slice %238 {offsets = [192, 0], sizes = [32, 512], strides = [1, 1]} : vector<256x512xf32> to vector<32x512xf32>
    %cst_74 = arith.constant dense<0.000000e+00> : vector<32x512xf32>
    %411 = tpu.matmul %409, %239, %cst_74 {dimension_numbers = #tpu.dot_dimension_numbers<[1], [0], [0], [1], [0, 0, 1, 1], [], []>} : vector<32x128xf32>, vector<128x512xf32>, vector<32x512xf32> -> vector<32x512xf32>
    %412 = arith.addf %410, %411 : vector<32x512xf32>
    %413 = vector.extract_strided_slice %412 {offsets = [0, 0], sizes = [32, 128], strides = [1, 1]} : vector<32x512xf32> to vector<32x128xf32>
    %414 = arith.negf %413 : vector<32x128xf32>
    %415 = math.exp %414 : vector<32x128xf32>
    %cst_75 = arith.constant 1.000000e+00 : f32
    %416 = vector.broadcast %cst_75 : f32 to vector<32x128xf32>
    %417 = arith.addf %416, %415 : vector<32x128xf32>
    %418 = arith.divf %416, %417 : vector<32x128xf32>
    %419 = vector.extract_strided_slice %412 {offsets = [0, 128], sizes = [32, 128], strides = [1, 1]} : vector<32x512xf32> to vector<32x128xf32>
    %420 = arith.negf %419 : vector<32x128xf32>
    %421 = math.exp %420 : vector<32x128xf32>
    %cst_76 = arith.constant 1.000000e+00 : f32
    %422 = vector.broadcast %cst_76 : f32 to vector<32x128xf32>
    %423 = arith.addf %422, %421 : vector<32x128xf32>
    %424 = arith.divf %422, %423 : vector<32x128xf32>
    %425 = vector.extract_strided_slice %412 {offsets = [0, 256], sizes = [32, 128], strides = [1, 1]} : vector<32x512xf32> to vector<32x128xf32>
    %426 = math.tanh %425 : vector<32x128xf32>
    %427 = vector.extract_strided_slice %412 {offsets = [0, 384], sizes = [32, 128], strides = [1, 1]} : vector<32x512xf32> to vector<32x128xf32>
    %428 = arith.negf %427 : vector<32x128xf32>
    %429 = math.exp %428 : vector<32x128xf32>
    %cst_77 = arith.constant 1.000000e+00 : f32
    %430 = vector.broadcast %cst_77 : f32 to vector<32x128xf32>
    %431 = arith.addf %430, %429 : vector<32x128xf32>
    %432 = arith.divf %430, %431 : vector<32x128xf32>
    %433 = arith.mulf %424, %407 : vector<32x128xf32>
    %434 = arith.mulf %418, %426 : vector<32x128xf32>
    %435 = arith.addf %433, %434 : vector<32x128xf32>
    %436 = math.tanh %435 : vector<32x128xf32>
    %437 = arith.mulf %432, %436 : vector<32x128xf32>
    %438 = vector.extract_strided_slice %238 {offsets = [224, 0], sizes = [32, 512], strides = [1, 1]} : vector<256x512xf32> to vector<32x512xf32>
    %cst_78 = arith.constant dense<0.000000e+00> : vector<32x512xf32>
    %439 = tpu.matmul %437, %239, %cst_78 {dimension_numbers = #tpu.dot_dimension_numbers<[1], [0], [0], [1], [0, 0, 1, 1], [], []>} : vector<32x128xf32>, vector<128x512xf32>, vector<32x512xf32> -> vector<32x512xf32>
    %440 = arith.addf %438, %439 : vector<32x512xf32>
    %441 = vector.extract_strided_slice %440 {offsets = [0, 0], sizes = [32, 128], strides = [1, 1]} : vector<32x512xf32> to vector<32x128xf32>
    %442 = arith.negf %441 : vector<32x128xf32>
    %443 = math.exp %442 : vector<32x128xf32>
    %cst_79 = arith.constant 1.000000e+00 : f32
    %444 = vector.broadcast %cst_79 : f32 to vector<32x128xf32>
    %445 = arith.addf %444, %443 : vector<32x128xf32>
    %446 = arith.divf %444, %445 : vector<32x128xf32>
    %447 = vector.extract_strided_slice %440 {offsets = [0, 128], sizes = [32, 128], strides = [1, 1]} : vector<32x512xf32> to vector<32x128xf32>
    %448 = arith.negf %447 : vector<32x128xf32>
    %449 = math.exp %448 : vector<32x128xf32>
    %cst_80 = arith.constant 1.000000e+00 : f32
    %450 = vector.broadcast %cst_80 : f32 to vector<32x128xf32>
    %451 = arith.addf %450, %449 : vector<32x128xf32>
    %452 = arith.divf %450, %451 : vector<32x128xf32>
    %453 = vector.extract_strided_slice %440 {offsets = [0, 256], sizes = [32, 128], strides = [1, 1]} : vector<32x512xf32> to vector<32x128xf32>
    %454 = math.tanh %453 : vector<32x128xf32>
    %455 = vector.extract_strided_slice %440 {offsets = [0, 384], sizes = [32, 128], strides = [1, 1]} : vector<32x512xf32> to vector<32x128xf32>
    %456 = arith.negf %455 : vector<32x128xf32>
    %457 = math.exp %456 : vector<32x128xf32>
    %cst_81 = arith.constant 1.000000e+00 : f32
    %458 = vector.broadcast %cst_81 : f32 to vector<32x128xf32>
    %459 = arith.addf %458, %457 : vector<32x128xf32>
    %460 = arith.divf %458, %459 : vector<32x128xf32>
    %461 = arith.mulf %452, %435 : vector<32x128xf32>
    %462 = arith.mulf %446, %454 : vector<32x128xf32>
    %463 = arith.addf %461, %462 : vector<32x128xf32>
    %464 = math.tanh %463 : vector<32x128xf32>
    %465 = arith.mulf %460, %464 : vector<32x128xf32>
    %c0_82 = arith.constant 0 : index
    %c0_83 = arith.constant 0 : index
    %466 = vector.load %arg7[%c0_82, %c0_83] : memref<128x128xf32, #tpu.memory_space<vmem>>, vector<128x128xf32>
    %cst_84 = arith.constant dense<0.000000e+00> : vector<32x128xf32>
    %467 = tpu.matmul %465, %466, %cst_84 {dimension_numbers = #tpu.dot_dimension_numbers<[1], [0], [0], [1], [0, 0, 1, 1], [], []>} : vector<32x128xf32>, vector<128x128xf32>, vector<32x128xf32> -> vector<32x128xf32>
    %c0_85 = arith.constant 0 : index
    %c0_86 = arith.constant 0 : index
    %468 = vector.load %arg8[%c0_85, %c0_86] : memref<1x128xf32, #tpu.memory_space<vmem>>, vector<1x128xf32>
    %469 = vector.broadcast %468 : vector<1x128xf32> to vector<32x128xf32>
    %470 = arith.addf %467, %469 : vector<32x128xf32>
    %c0_87 = arith.constant 0 : index
    %c0_88 = arith.constant 0 : index
    %471 = vector.load %arg9[%c0_87, %c0_88] : memref<32x128xf32, #tpu.memory_space<vmem>>, vector<32x128xf32>
    tpu.vector_store %arg9[%c0_87, %c0_88], %470 {strides = array<i32>} : memref<32x128xf32, #tpu.memory_space<vmem>>, vector<32x128xf32>,
    return
  }
}

</mosaic_0001>

<bundles_post_ra>
// kernel: tpu_custom_call.1
= control target key start
LH: loop header
LB: loop body
LE: loop exit
PB: predicated region body
PF: predicated region fallthrough
CT: control target
= control target key end

     0   :  { %14 = vsyncpa [#allocation3], 0  ;;  %s11348_s0 = inlined_call_operand.vmem [shape: f32[256,6], index: 0, kind: input, shape index: {}]   ;;  %s11349_s1 = inlined_call_operand.vmem [shape: f32[6,512], index: 1, kind: input, shape index: {}]   ;;  %s11350_s2 = inlined_call_operand.hbm [shape: f32[128,512], index: 2, kind: input, shape index: {}]   ;;  %s11351_s3 = inlined_call_operand.vmem [shape: f32[1,512], index: 3, kind: input, shape index: {}]   ;;  %s11352_s4 = inlined_call_operand.hbm [shape: f32[128,512], index: 4, kind: input, shape index: {}]   ;;  %s11353_s5 = inlined_call_operand.hbm [shape: f32[128,512], index: 5, kind: input, shape index: {}]   ;;  %s11354_s6 = inlined_call_operand.vmem [shape: f32[1,512], index: 6, kind: input, shape index: {}]   ;;  %s11355_s7 = inlined_call_operand.vmem [shape: f32[128,128], index: 7, kind: input, shape index: {}]   ;;  %s11356_s8 = inlined_call_operand.vmem [shape: f32[1,128], index: 8, kind: input, shape index: {}]   ;;  %s11357_s9 = inlined_call_operand.hbm [shape: f32[32,128], index: 9, kind: output, shape index: {}]  }
   0x1   :  { %15 = vsyncpa [#allocation6], 0 }
   0x2   :  { %16 = vsyncpa [#allocation4], 0  ;;  %s9334_s30 = smov [#allocation5]   ;;  %s9335_s11 = smov [#allocation2]  }
   0x3   :  { %s40_s10 = sshll.u32 %s9334_s30, 4  ;;  %s26_s12 = sshll.u32 %s9335_s11, 4  ;;  %s41_s10 = int_to_ptr.vmem [resolvable:$true] %s40_s10  ;;  %s9393_s12 = int_to_ptr.vmem [resolvable:$true] %s26_s12 }
   0x4   :  { %s9240_s15 = scalar_lea.hbm %s11352_s4, 8192 }
   0x5   :  { %p9241_p0 = scmp.ne.s32.totalorder %s11352_s4, %s9240_s15  ;;  %p9244_p1 = scmp.lt.u32.totalorder %s9240_s15, %s11352_s4 }
   0x7   :  { %p9246_p2 = pnand %p9244_p1, %p9241_p0 }
   0x9   :  { %9249 = shalt.err (!%p9246_p2)
}
   0xa   :  { %s9250_s20 = scalar_lea.vmem %s41_s10, 8192  ;;  %p9255_p4 = scmp.lt.s32.totalorder %s41_s10, %s41_s10 }
   0xb   :  { %p9251_p3 = scmp.ne.s32.totalorder %s41_s10, %s9250_s20  ;;  %p9256_p5 = scmp.lt.s32.totalorder %s9250_s20, %s9250_s20 }
   0xd   :  { %p9257_p6 = por %p9256_p5, %p9255_p4 }
   0xf   :  { %p9258_p7 = pnand %p9257_p6, %p9251_p3 }
  0x11   :  { %9261 = shalt.err (!%p9258_p7)
}
  0x12   :  { %s9336_s21 = smov 512   ;;  %s9337_s22 = smov 32  }
  0x13   :  { %46 = dma.hbm_to_vmem [thread:$0]  %s11352_s4, 8192, %s41_s10, [#allocation6], %s9336_s21, %s9336_s21, %s9337_s22  }
  0x14   :  { %s9262_s27 = scalar_lea.hbm %s11350_s2, 8192 }
  0x15   :  { %p9263_p8 = scmp.ne.s32.totalorder %s11350_s2, %s9262_s27  ;;  %p9266_p9 = scmp.lt.u32.totalorder %s9262_s27, %s11350_s2 }
  0x17   :  { %p9268_p10 = pnand %p9266_p9, %p9263_p8 }
  0x19   :  { %9271 = shalt.err (!%p9268_p10)
}
  0x1a   :  { %s9272_s13 = scalar_lea.vmem %s9393_s12, 8192  ;;  %p9277_p12 = scmp.lt.s32.totalorder %s9393_s12, %s9393_s12 }
  0x1b   :  { %p9273_p11 = scmp.ne.s32.totalorder %s9393_s12, %s9272_s13  ;;  %p9278_p13 = scmp.lt.s32.totalorder %s9272_s13, %s9272_s13 }
  0x1d   :  { %p9279_p0 = por %p9278_p13, %p9277_p12 }
  0x1f   :  { %p9280_p1 = pnand %p9279_p0, %p9273_p11 }
  0x21   :  { %9283 = shalt.err (!%p9280_p1)
}
  0x22   :  { %32 = dma.hbm_to_vmem [thread:$0]  %s11350_s2, 8192, %s9393_s12, [#allocation3], %s9336_s21, %s9336_s21, %s9337_s22  }
  0x23   :  { %s9338_s14 = smov [#allocation7]   ;;  %s9284_s18 = scalar_lea.hbm %s11353_s5, 8192 }
  0x24   :  { %s52_s15 = sshll.u32 %s9338_s14, 4  ;;  %p9285_p2 = scmp.ne.s32.totalorder %s11353_s5, %s9284_s18  ;;  %s53_s15 = int_to_ptr.vmem [resolvable:$true] %s52_s15 }
  0x25   :  { %p9288_p3 = scmp.lt.u32.totalorder %s9284_s18, %s11353_s5 }
  0x27   :  { %p9290_p4 = pnand %p9288_p3, %p9285_p2 }
  0x29   :  { %9293 = shalt.err (!%p9290_p4)
}
  0x2a   :  { %s9294_s25 = scalar_lea.vmem %s53_s15, 8192  ;;  %p9299_p6 = scmp.lt.s32.totalorder %s53_s15, %s53_s15 }
  0x2b   :  { %p9295_p5 = scmp.ne.s32.totalorder %s53_s15, %s9294_s25  ;;  %p9300_p7 = scmp.lt.s32.totalorder %s9294_s25, %s9294_s25 }
  0x2d   :  { %p9301_p8 = por %p9300_p7, %p9299_p6 }
  0x2f   :  { %p9302_p9 = pnand %p9301_p8, %p9295_p5 }
  0x31   :  { %9305 = shalt.err (!%p9302_p9)
}
  0x32   :  { %58 = dma.hbm_to_vmem [thread:$0]  %s11353_s5, 8192, %s53_s15, [#allocation6], %s9336_s21, %s9336_s21, %s9337_s22  }
  0x33   :  { %9328 = dma.done.wait [#allocation3], 8192  }
  0x34   :  { %9329 = vsyncadd [#allocation3], 4294959104 }
  0x35   :  { %9330 = dma.done.wait [#allocation6], 16384  }
  0x36   :  { %9331 = vsyncadd [#allocation6], 4294950912  ;;  %v11362_v0 = vmov 0.0   ;;  %vm229_vm0 = vcmask 1045504   ;;  %v107_v1 = vld [vmem:[%s11349_s1 + $0x8] sm:$0x3f] }
  0x37   :  { %306 = vmatprep.mubr.f32.mxu0 %v11362_v0  ;;  %480 = vmatprep.mubr.f32.mxu1 %v11362_v0  ;;  %v106_v2 = vld [vmem:[%s11349_s1] sm:$0x3f]  ;;  %vm132_vm1 = vcmask 48128   ;;  %v9463_v4 = vld [vmem:[%s11348_s0 + $0xe8] sm:$0xff]  ;;  %v109_v5 = vld [vmem:[%s11349_s1 + $0x18] sm:$0x3f] }
  0x38   :  { %v9456_v3 = vld [vmem:[%s11348_s0] sm:$0xff]  ;;  %6254 = vmatprep.subr.msk.mxu0 %vm229_vm0, %v107_v1  ;;  %7693 = vmatprep.subr.msk.mxu1 %vm229_vm0, %v107_v1  ;;  %v108_v6 = vld [vmem:[%s11349_s1 + $0x10] sm:$0x3f]  ;;  %v9480_v7 = vld [vmem:[%s11348_s0 + $0x8] sm:$0xff]  ;;  %s9340_s29 = smov [#allocation8]  }
  0x39   :  { %6255 = vmatpush1.msk.msra.mxu0 %vm229_vm0, %v106_v2  ;;  %7694 = vmatpush1.msk.msra.mxu1 %vm229_vm0, %v106_v2  ;;  %v757_v8 = vld [vmem:[#allocation2 + $0x8] sm:$0xff]  ;;  %v9487_v10 = vld [vmem:[%s11348_s0 + $0xf0] sm:$0xff]  ;;  %v756_v12 = vld [vmem:[#allocation2] sm:$0xff]  ;;  %s6241_s30 = sshll.u32 %s9340_s29, 4  ;;  %s6242_s30 = int_to_ptr.vmem [resolvable:$true] %s6241_s30 }
  0x3a   :  { %6256 = vmatmul.mubr.msk.f32.vlgmr.msra.gmra.mrb[0].mxu0 %vm132_vm1, %v9456_v3  ;;  %6285 = vmatmul.mubr.msk.f32.vlgmr.msra.gmra.mrb[0].mxu1 %vm132_vm1, %v9463_v4  ;;  %v761_v9 = vld [vmem:[#allocation2 + $0x28] sm:$0xff]  ;;  %v760_v13 = vld [vmem:[#allocation2 + $0x20] sm:$0xff]  ;;  %v759_v15 = vld [vmem:[#allocation2 + $0x18] sm:$0xff]  ;;  %s9306_s5 = scalar_lea.vmem %s6242_s30, 512  ;;  %p9311_p11 = scmp.lt.s32.totalorder %s6242_s30, %s6242_s30 }
  0x3b   :  { %6288 = vmatprep.subr.msk.mxu1 %vm229_vm0, %v109_v5  ;;  %312 = vmatprep.mubr.f32.mxu0 %v11362_v0  ;;  %v9489_v11 = vpack.c.bf16 %v761_v9, %v757_v8  ;;  %v9493_v14 = vpack.c.bf16 %v760_v13, %v756_v12  ;;  %v763_v16 = vld [vmem:[#allocation2 + $0x38] sm:$0xff]  ;;  %v9505_v18 = vld [vmem:[%s11348_s0 + $0x10] sm:$0xff]  ;;  %v765_v19 = vld [vmem:[#allocation2 + $0x48] sm:$0xff]  ;;  %p9307_p10 = scmp.ne.s32.totalorder %s6242_s30, %s9306_s5  ;;  %p9312_p12 = scmp.lt.s32.totalorder %s9306_s5, %s9306_s5 }
  0x3c   :  { %6289 = vmatpush1.msk.msra.mxu1 %vm229_vm0, %v108_v6  ;;  %486 = vmatprep.mubr.f32.mxu1 %v11362_v0  ;;  %v9496_v17 = vpack.c.bf16 %v763_v16, %v759_v15  ;;  %v769_v20 = vld [vmem:[#allocation2 + $0x68] sm:$0xff]  ;;  %v9512_v21 = vld [vmem:[%s11348_s0 + $0xf8] sm:$0xff]  ;;  %v764_v23 = vld [vmem:[#allocation2 + $0x40] sm:$0xff] }
  0x3d   :  { %6574 = vmatprep.subr.bf16.mxu0 %v9489_v11  ;;  %v9514_v22 = vpack.c.bf16 %v769_v20, %v765_v19  ;;  %v768_v24 = vld [vmem:[#allocation2 + $0x60] sm:$0xff]  ;;  %v758_v25 = vld [vmem:[#allocation2 + $0x10] sm:$0xff]  ;;  %v767_v28 = vld [vmem:[#allocation2 + $0x58] sm:$0xff]  ;;  %p9313_p13 = por %p9312_p12, %p9311_p11 }
  0x3e   :  { %6257 = vmatmul.mubr.msk.f32.gmra.mrb[2].mxu0 %vm132_vm1, %v9480_v7  ;;  %6286 = vmatmul.mubr.msk.f32.gmra.mrb[2].mxu1 %vm132_vm1, %v9487_v10  ;;  %v762_v26 = vld [vmem:[#allocation2 + $0x30] sm:$0xff]  ;;  %v9518_v27 = vpack.c.bf16 %v768_v24, %v764_v23  ;;  %v771_v29 = vld [vmem:[#allocation2 + $0x78] sm:$0xff]  ;;  %v773_v30 = vld [vmem:[#allocation2 + $0x88] sm:$0xff] }
  0x3f   :  { %318 = vmatprep.mubr.f32.mxu0 %v11362_v0  ;;  %492 = vmatprep.mubr.f32.mxu1 %v11362_v0  ;;  %v777_v31 = vld [vmem:[#allocation2 + $0xa8] sm:$0xff]  ;;  %v772_v32 = vld [vmem:[#allocation2 + $0x80] sm:$0xff]  ;;  %v9530_v33 = vld [vmem:[%s11348_s0 + $0x18] sm:$0xff]  ;;  %v9532_v34 = vpack.c.bf16 %v762_v26, %v758_v25  ;;  %v9537_v37 = vpack.c.bf16 %v771_v29, %v767_v28  ;;  %p9314_p0 = pnand %p9313_p13, %p9307_p10 }
  0x40   :  { %6576 = vmatpush1.bf16.msra.mxu0 %v9493_v14  ;;  %6606 = vmatprep.subr.bf16.mxu1 %v9496_v17  ;;  %v9534_v35 = vpack.c.bf16 %v777_v31, %v773_v30  ;;  %v776_v36 = vld [vmem:[#allocation2 + $0xa0] sm:$0xff]  ;;  %v766_v38 = vld [vmem:[#allocation2 + $0x50] sm:$0xff]  ;;  %v775_v41 = vld [vmem:[#allocation2 + $0x98] sm:$0xff] }
  0x41   :  { %6578 = vmatprep.subr.bf16.mxu0 %v9514_v22  ;;  %v770_v39 = vld [vmem:[#allocation2 + $0x70] sm:$0xff]  ;;  %v9540_v40 = vpack.c.bf16 %v776_v36, %v772_v32  ;;  %v779_v42 = vld [vmem:[#allocation2 + $0xb8] sm:$0xff]  ;;  %v781_v43 = vld [vmem:[#allocation2 + $0xc8] sm:$0xff] }
  0x42   :  { %6258 = vmatmul.mubr.msk.f32.gmra.mrb[4].mxu0 %vm132_vm1, %v9505_v18  ;;  %6287 = vmatmul.mubr.msk.f32.gmra.mrb[4].mxu1 %vm132_vm1, %v9512_v21  ;;  %v785_v44 = vld [vmem:[#allocation2 + $0xe8] sm:$0xff]  ;;  %v780_v45 = vld [vmem:[#allocation2 + $0xc0] sm:$0xff]  ;;  %v9555_v48 = vpack.c.bf16 %v770_v39, %v766_v38  ;;  %v774_v49 = vld [vmem:[#allocation2 + $0x90] sm:$0xff]  ;;  %v9560_v51 = vpack.c.bf16 %v779_v42, %v775_v41 }
  0x43   :  { %324 = vmatprep.mubr.f32.mxu0 %v11362_v0  ;;  %563 = vmatprep.mubr.f32.mxu1 %v11362_v0  ;;  %v9551_v46 = vld [vmem:[%s11348_s0 + $0x20] sm:$0xff]  ;;  %v9557_v50 = vpack.c.bf16 %v785_v44, %v781_v43  ;;  %v778_v52 = vld [vmem:[#allocation2 + $0xb0] sm:$0xff]  ;;  %v783_v54 = vld [vmem:[#allocation2 + $0xd8] sm:$0xff] }
  0x44   :  { %6580 = vmatpush1.bf16.msra.mxu0 %v9518_v27  ;;  %v784_v47 = vld [vmem:[#allocation2 + $0xe0] sm:$0xff]  ;;  %v789_v55 = vld [vmem:[#allocation2 + $0x108] sm:$0xff]  ;;  %v787_v56 = vld [vmem:[#allocation2 + $0xf8] sm:$0xff]  ;;  %v9576_v61 = vpack.c.bf16 %v778_v52, %v774_v49 }
  0x45   :  { %6582 = vmatprep.subr.bf16.mxu0 %v9534_v35  ;;  %v9562_v53 = vpack.c.bf16 %v784_v47, %v780_v45  ;;  %v793_v57 = vld [vmem:[#allocation2 + $0x128] sm:$0xff]  ;;  %v788_v58 = vld [vmem:[#allocation2 + $0x100] sm:$0xff]  ;;  %v782_v62 = vld [vmem:[#allocation2 + $0xd0] sm:$0xff]  ;;  %v9583_v2 = vpack.c.bf16 %v787_v56, %v783_v54 }
  0x46   :  { %6259 = vmatmul.mubr.msk.f32.gmra.mrb[6].mxu0 %vm132_vm1, %v9530_v33  ;;  %6290 = vmatmul.mubr.msk.f32.vlgmr.msra.gmra.mrb[6].mxu1 %vm132_vm1, %v9456_v3  ;;  %v9573_v59 = vld [vmem:[%s11348_s0 + $0x28] sm:$0xff]  ;;  %v792_v60 = vld [vmem:[#allocation2 + $0x120] sm:$0xff]  ;;  %v786_v63 = vld [vmem:[#allocation2 + $0xf0] sm:$0xff]  ;;  %v9579_v1 = vpack.c.bf16 %v793_v57, %v789_v55 }
  0x47   :  { %6608 = vmatpush1.bf16.msra.mxu1 %v9532_v34  ;;  %330 = vmatprep.mubr.f32.mxu0 %v11362_v0  ;;  %v9585_v3 = vpack.c.bf16 %v792_v60, %v788_v58  ;;  %v791_v5 = vld [vmem:[#allocation2 + $0x118] sm:$0xff]  ;;  %v801_v8 = vld [vmem:[#allocation2 + $0x168] sm:$0xff]  ;;  %v796_v9 = vld [vmem:[#allocation2 + $0x140] sm:$0xff]  ;;  %v9599_v15 = vpack.c.bf16 %v786_v63, %v782_v62 }
  0x48   :  { %569 = vmatprep.mubr.f32.mxu1 %v11362_v0  ;;  %6610 = vmatprep.subr.bf16.mxu1 %v9537_v37  ;;  %v795_v6 = vld [vmem:[#allocation2 + $0x138] sm:$0xff]  ;;  %v800_v12 = vld [vmem:[#allocation2 + $0x160] sm:$0xff]  ;;  %v9596_v13 = vld [vmem:[%s11348_s0 + $0x30] sm:$0xff] }
  0x49   :  { %6584 = vmatpush1.bf16.msra.mxu0 %v9540_v40  ;;  %v790_v16 = vld [vmem:[#allocation2 + $0x110] sm:$0xff]  ;;  %v9606_v20 = vpack.c.bf16 %v795_v6, %v791_v5  ;;  %v9608_v23 = vpack.c.bf16 %v800_v12, %v796_v9  ;;  %v799_v24 = vld [vmem:[#allocation2 + $0x158] sm:$0xff]  ;;  %v805_v26 = vld [vmem:[#allocation2 + $0x188] sm:$0xff] }
  0x4a   :  { %6260 = vmatmul.mubr.msk.f32.gmra.mrb[8].mxu0 %vm132_vm1, %v9551_v46  ;;  %6291 = vmatmul.mubr.msk.f32.gmra.mrb[8].mxu1 %vm132_vm1, %v9480_v7  ;;  %v797_v7 = vld [vmem:[#allocation2 + $0x148] sm:$0xff]  ;;  %v803_v25 = vld [vmem:[#allocation2 + $0x178] sm:$0xff]  ;;  %v804_v29 = vld [vmem:[#allocation2 + $0x180] sm:$0xff] }
  0x4b   :  { %336 = vmatprep.mubr.f32.mxu0 %v11362_v0  ;;  %575 = vmatprep.mubr.f32.mxu1 %v11362_v0  ;;  %v9602_v19 = vpack.c.bf16 %v801_v8, %v797_v7  ;;  %v809_v28 = vld [vmem:[#allocation2 + $0x1a8] sm:$0xff]  ;;  %v808_v30 = vld [vmem:[#allocation2 + $0x1a0] sm:$0xff]  ;;  %v81_v31 = vld [vmem:[%s11348_s0 + $0x38] sm:$0xff]  ;;  %v9627_v39 = vpack.c.bf16 %v803_v25, %v799_v24 }
  0x4c   :  { %6612 = vmatpush1.bf16.msra.mxu1 %v9555_v48  ;;  %6586 = vmatprep.subr.bf16.mxu0 %v9557_v50  ;;  %v798_v36 = vld [vmem:[#allocation2 + $0x150] sm:$0xff]  ;;  %v9629_v41 = vpack.c.bf16 %v808_v30, %v804_v29  ;;  %v807_v42 = vld [vmem:[#allocation2 + $0x198] sm:$0xff]  ;;  %v813_v43 = vld [vmem:[#allocation2 + $0x1c8] sm:$0xff] }
  0x4d   :  { %6614 = vmatprep.subr.bf16.mxu1 %v9560_v51  ;;  %6588 = vmatpush1.bf16.msra.mxu0 %v9562_v53  ;;  %v802_v38 = vld [vmem:[#allocation2 + $0x170] sm:$0xff]  ;;  %v817_v44 = vld [vmem:[#allocation2 + $0x1e8] sm:$0xff]  ;;  %v811_v45 = vld [vmem:[#allocation2 + $0x1b8] sm:$0xff] }
  0x4e   :  { %6261 = vmatmul.mubr.msk.f32.gmra.mrb[10].mxu0 %vm132_vm1, %v9573_v59  ;;  %6292 = vmatmul.mubr.msk.f32.gmra.mrb[10].mxu1 %vm132_vm1, %v9505_v18  ;;  %v794_v18 = vld [vmem:[#allocation2 + $0x130] sm:$0xff]  ;;  %v812_v47 = vld [vmem:[#allocation2 + $0x1c0] sm:$0xff]  ;;  %v9640_v54 = vpack.c.bf16 %v802_v38, %v798_v36  ;;  %v9643_v55 = vpack.c.bf16 %v817_v44, %v813_v43  ;;  %v815_v60 = vld [vmem:[#allocation2 + $0x1d8] sm:$0xff] }
  0x4f   :  { %342 = vmatprep.mubr.f32.mxu0 %v11362_v0  ;;  %581 = vmatprep.mubr.f32.mxu1 %v11362_v0  ;;  %v9620_v32 = vpack.c.bf16 %v794_v18, %v790_v16  ;;  %v816_v49 = vld [vmem:[#allocation2 + $0x1e0] sm:$0xff]  ;;  %v806_v56 = vld [vmem:[#allocation2 + $0x190] sm:$0xff]  ;;  %v819_v62 = vld [vmem:[#allocation2 + $0x1f8] sm:$0xff] }
  0x50   :  { %6616 = vmatpush1.bf16.msra.mxu1 %v9576_v61  ;;  %6590 = vmatprep.subr.bf16.mxu0 %v9579_v1  ;;  %v82_v52 = vld [vmem:[%s11348_s0 + $0x40] sm:$0xff]  ;;  %v810_v57 = vld [vmem:[#allocation2 + $0x1b0] sm:$0xff]  ;;  %v9649_v58 = vpack.c.bf16 %v816_v49, %v812_v47  ;;  %v83_v63 = vld [vmem:[%s11348_s0 + $0x48] sm:$0xff] }
  0x51   :  { %6618 = vmatprep.subr.bf16.mxu1 %v9583_v2  ;;  %6592 = vmatpush1.bf16.msra.mxu0 %v9585_v3  ;;  %v9660_v5 = vpack.c.bf16 %v810_v57, %v806_v56  ;;  %v814_v6 = vld [vmem:[#allocation2 + $0x1d0] sm:$0xff]  ;;  %v85_v12 = vld [vmem:[%s11348_s0 + $0x58] sm:$0xff]  ;;  %v87_v16 = vld [vmem:[%s11348_s0 + $0x68] sm:$0xff]  ;;  %v112_v57 = vlaneseq }
  0x52   :  { %6262 = vmatmul.mubr.msk.f32.gmra.mrb[12].mxu0 %vm132_vm1, %v9596_v13  ;;  %6293 = vmatmul.mubr.msk.f32.gmra.mrb[12].mxu1 %vm132_vm1, %v9530_v33  ;;  %v9623_v33 = vpack.c.bf16 %v809_v28, %v805_v26  ;;  %v818_v7 = vld [vmem:[#allocation2 + $0x1f0] sm:$0xff]  ;;  %v89_v24 = vld [vmem:[%s11348_s0 + $0x78] sm:$0xff]  ;;  %v90_v25 = vld [vmem:[%s11348_s0 + $0x80] sm:$0xff] }
  0x53   :  { %348 = vmatprep.mubr.f32.mxu0 %v11362_v0  ;;  %587 = vmatprep.mubr.f32.mxu1 %v11362_v0  ;;  %v84_v8 = vld [vmem:[%s11348_s0 + $0x50] sm:$0xff]  ;;  %v9676_v9 = vpack.c.bf16 %v818_v7, %v814_v6  ;;  %v91_v26 = vld [vmem:[%s11348_s0 + $0x88] sm:$0xff]  ;;  %v93_v29 = vld [vmem:[%s11348_s0 + $0x98] sm:$0xff] }
  0x54   :  { %6620 = vmatpush1.bf16.msra.mxu1 %v9599_v15  ;;  %6594 = vmatprep.subr.bf16.mxu0 %v9602_v19  ;;  %v88_v18 = vld [vmem:[%s11348_s0 + $0x70] sm:$0xff]  ;;  %v94_v30 = vld [vmem:[%s11348_s0 + $0xa0] sm:$0xff]  ;;  %v97_v38 = vld [vmem:[%s11348_s0 + $0xb8] sm:$0xff] }
  0x55   :  { %6622 = vmatprep.subr.bf16.mxu1 %v9606_v20  ;;  %6596 = vmatpush1.bf16.msra.mxu0 %v9608_v23  ;;  %v92_v28 = vld [vmem:[%s11348_s0 + $0x90] sm:$0xff]  ;;  %v99_v43 = vld [vmem:[%s11348_s0 + $0xc8] sm:$0xff]  ;;  %v102_v47 = vld [vmem:[%s11348_s0 + $0xe0] sm:$0xff] }
  0x56   :  { %6263 = vmatmul.mubr.msk.f32.gmra.mrb[14].mxu0 %vm132_vm1, %v81_v31  ;;  %6294 = vmatmul.mubr.msk.f32.gmra.mrb[14].mxu1 %vm132_vm1, %v9551_v46  ;;  %v9647_v46 = vpack.c.bf16 %v811_v45, %v807_v42  ;;  %v96_v36 = vld [vmem:[%s11348_s0 + $0xb0] sm:$0xff]  ;;  %v98_v42 = vld [vmem:[%s11348_s0 + $0xc0] sm:$0xff]  ;;  %v101_v45 = vld [vmem:[%s11348_s0 + $0xd8] sm:$0xff] }
  0x57   :  { %354 = vmatprep.mubr.f32.mxu0 %v11362_v0  ;;  %593 = vmatprep.mubr.f32.mxu1 %v11362_v0  ;;  %v100_v44 = vld [vmem:[%s11348_s0 + $0xd0] sm:$0xff] }
  0x58   :  { %6624 = vmatpush1.bf16.msra.mxu1 %v9620_v32  ;;  %6598 = vmatprep.subr.bf16.mxu0 %v9623_v33 }
  0x59   :  { %6626 = vmatprep.subr.bf16.mxu1 %v9627_v39  ;;  %6600 = vmatpush1.bf16.msra.mxu0 %v9629_v41 }
  0x5a   :  { %6264 = vmatmul.mubr.msk.f32.gmra.mrb[16].mxu0 %vm132_vm1, %v82_v52  ;;  %6295 = vmatmul.mubr.msk.f32.gmra.mrb[16].mxu1 %vm132_vm1, %v9573_v59  ;;  %v9665_v59 = vpack.c.bf16 %v819_v62, %v815_v60  ;;  %v9887_v60 = vshrl.u32 %v112_v57, 7 }
  0x5b   :  { %360 = vmatprep.mubr.f32.mxu0 %v11362_v0  ;;  %599 = vmatprep.mubr.f32.mxu1 %v11362_v0 }
  0x5c   :  { %6628 = vmatpush1.bf16.msra.mxu1 %v9640_v54  ;;  %6602 = vmatprep.subr.bf16.mxu0 %v9643_v55  ;;  %11408 = vst [vmem:[#allocation18_spill] sm:$0xff] %v9887_v60  ;;  %v11361_v62 = vsub.s32 0, %v9887_v60  ;;  %v11360_v6 = vsub.s32 1, %v9887_v60 }
  0x5d   :  { %6630 = vmatprep.subr.bf16.mxu1 %v9647_v46  ;;  %6604 = vmatpush1.bf16.msra.mxu0 %v9649_v58 }
  0x5e   :  { %6265 = vmatmul.mubr.msk.f32.gmra.mrb[18].mxu0 %vm132_vm1, %v83_v63  ;;  %6296 = vmatmul.mubr.msk.f32.gmra.mrb[18].mxu1 %vm132_vm1, %v9596_v13  ;;  %v86_v13 = vld [vmem:[%s11348_s0 + $0x60] sm:$0xff] }
  0x5f   :  { %366 = vmatprep.mubr.f32.mxu0 %v11362_v0  ;;  %605 = vmatprep.mubr.f32.mxu1 %v11362_v0 }
  0x60   :  { %6632 = vmatpush1.bf16.msra.mxu1 %v9660_v5  ;;  %6638 = vmatprep.subr.bf16.mxu0 %v9489_v11 }
  0x61   :  { %6634 = vmatprep.subr.bf16.mxu1 %v9665_v59 }
  0x62   :  { %6266 = vmatmul.mubr.msk.f32.gmra.mrb[20].mxu0 %vm132_vm1, %v84_v8  ;;  %6297 = vmatmul.mubr.msk.f32.gmra.mrb[20].mxu1 %vm132_vm1, %v81_v31  ;;  %v95_v31 = vld [vmem:[%s11348_s0 + $0xa8] sm:$0xff] }
  0x63   :  { %372 = vmatprep.mubr.f32.mxu0 %v11362_v0  ;;  %611 = vmatprep.mubr.f32.mxu1 %v11362_v0 }
  0x64   :  { %6636 = vmatpush1.bf16.msra.mxu1 %v9676_v9 }
  0x65   :  { %6670 = vmatprep.subr.bf16.mxu1 %v9496_v17 }
  0x66   :  { %6267 = vmatmul.mubr.msk.f32.gmra.mrb[22].mxu0 %vm132_vm1, %v85_v12  ;;  %6298 = vmatmul.mubr.msk.f32.gmra.mrb[22].mxu1 %vm132_vm1, %v82_v52 }
  0x67   :  { %378 = vmatprep.mubr.f32.mxu0 %v11362_v0  ;;  %617 = vmatprep.mubr.f32.mxu1 %v11362_v0 }
  0x6a   :  { %6268 = vmatmul.mubr.msk.f32.gmra.mrb[24].mxu0 %vm132_vm1, %v86_v13  ;;  %6299 = vmatmul.mubr.msk.f32.gmra.mrb[24].mxu1 %vm132_vm1, %v83_v63  ;;  %v110_v63 = vld [vmem:[%s11351_s3] sm:$0xf] }
  0x6b   :  { %384 = vmatprep.mubr.f32.mxu0 %v11362_v0  ;;  %623 = vmatprep.mubr.f32.mxu1 %v11362_v0  ;;  %v9896_v7 = vrot.slane %v110_v63, %v11361_v62 }
  0x6e   :  { %6269 = vmatmul.mubr.msk.f32.gmra.mrb[26].mxu0 %vm132_vm1, %v87_v16  ;;  %6300 = vmatmul.mubr.msk.f32.gmra.mrb[26].mxu1 %vm132_vm1, %v84_v8  ;;  %v9900_v8 = vrot.slane %v110_v63, %v11360_v6 }
  0x6f   :  { %390 = vmatprep.mubr.f32.mxu0 %v11362_v0  ;;  %629 = vmatprep.mubr.f32.mxu1 %v11362_v0 }
  0x72   :  { %6270 = vmatmul.mubr.msk.f32.gmra.mrb[28].mxu0 %vm132_vm1, %v88_v18  ;;  %6301 = vmatmul.mubr.msk.f32.gmra.mrb[28].mxu1 %vm132_vm1, %v85_v12 }
  0x73   :  { %396 = vmatprep.mubr.f32.mxu0 %v11362_v0  ;;  %635 = vmatprep.mubr.f32.mxu1 %v11362_v0 }
  0x76   :  { %6271 = vmatmul.mubr.msk.f32.gmra.mrb[30].mxu0 %vm132_vm1, %v89_v24  ;;  %6302 = vmatmul.mubr.msk.f32.gmra.mrb[30].mxu1 %vm132_vm1, %v86_v13 }
  0x77   :  { %402 = vmatprep.mubr.f32.mxu0 %v11362_v0  ;;  %641 = vmatprep.mubr.f32.mxu1 %v11362_v0 }
  0x7a   :  { %6272 = vmatmul.mubr.msk.f32.gmra.mrb[32].mxu0 %vm132_vm1, %v90_v25  ;;  %6303 = vmatmul.mubr.msk.f32.gmra.mrb[32].mxu1 %vm132_vm1, %v87_v16 }
  0x7b   :  { %408 = vmatprep.mubr.f32.mxu0 %v11362_v0  ;;  %647 = vmatprep.mubr.f32.mxu1 %v11362_v0 }
  0x7e   :  { %6273 = vmatmul.mubr.msk.f32.gmra.mrb[34].mxu0 %vm132_vm1, %v91_v26  ;;  %6304 = vmatmul.mubr.msk.f32.gmra.mrb[34].mxu1 %vm132_vm1, %v88_v18 }
  0x7f   :  { %414 = vmatprep.mubr.f32.mxu0 %v11362_v0  ;;  %653 = vmatprep.mubr.f32.mxu1 %v11362_v0 }
  0x82   :  { %6274 = vmatmul.mubr.msk.f32.gmra.mrb[36].mxu0 %vm132_vm1, %v92_v28  ;;  %6305 = vmatmul.mubr.msk.f32.gmra.mrb[36].mxu1 %vm132_vm1, %v89_v24 }
  0x83   :  { %420 = vmatprep.mubr.f32.mxu0 %v11362_v0  ;;  %659 = vmatprep.mubr.f32.mxu1 %v11362_v0 }
  0x86   :  { %6275 = vmatmul.mubr.msk.f32.gmra.mrb[38].mxu0 %vm132_vm1, %v93_v29  ;;  %6306 = vmatmul.mubr.msk.f32.gmra.mrb[38].mxu1 %vm132_vm1, %v90_v25 }
  0x87   :  { %426 = vmatprep.mubr.f32.mxu0 %v11362_v0  ;;  %665 = vmatprep.mubr.f32.mxu1 %v11362_v0 }
  0x8a   :  { %6276 = vmatmul.mubr.msk.f32.gmra.mrb[40].mxu0 %vm132_vm1, %v94_v30  ;;  %6307 = vmatmul.mubr.msk.f32.gmra.mrb[40].mxu1 %vm132_vm1, %v91_v26 }
  0x8b   :  { %432 = vmatprep.mubr.f32.mxu0 %v11362_v0  ;;  %671 = vmatprep.mubr.f32.mxu1 %v11362_v0 }
  0x8e   :  { %6277 = vmatmul.mubr.msk.f32.gmra.mrb[42].mxu0 %vm132_vm1, %v95_v31  ;;  %6308 = vmatmul.mubr.msk.f32.gmra.mrb[42].mxu1 %vm132_vm1, %v92_v28 }
  0x8f   :  { %438 = vmatprep.mubr.f32.mxu0 %v11362_v0  ;;  %677 = vmatprep.mubr.f32.mxu1 %v11362_v0 }
  0x92   :  { %6278 = vmatmul.mubr.msk.f32.gmra.mrb[44].mxu0 %vm132_vm1, %v96_v36  ;;  %6309 = vmatmul.mubr.msk.f32.gmra.mrb[44].mxu1 %vm132_vm1, %v93_v29 }
  0x93   :  { %444 = vmatprep.mubr.f32.mxu0 %v11362_v0  ;;  %683 = vmatprep.mubr.f32.mxu1 %v11362_v0 }
  0x96   :  { %6279 = vmatmul.mubr.msk.f32.gmra.mrb[46].mxu0 %vm132_vm1, %v97_v38  ;;  %6310 = vmatmul.mubr.msk.f32.gmra.mrb[46].mxu1 %vm132_vm1, %v94_v30 }
  0x97   :  { %450 = vmatprep.mubr.f32.mxu0 %v11362_v0  ;;  %689 = vmatprep.mubr.f32.mxu1 %v11362_v0 }
  0x9a   :  { %6280 = vmatmul.mubr.msk.f32.gmra.mrb[48].mxu0 %vm132_vm1, %v98_v42  ;;  %6311 = vmatmul.mubr.msk.f32.gmra.mrb[48].mxu1 %vm132_vm1, %v95_v31 }
  0x9b   :  { %456 = vmatprep.mubr.f32.mxu0 %v11362_v0  ;;  %695 = vmatprep.mubr.f32.mxu1 %v11362_v0 }
  0x9e   :  { %6281 = vmatmul.mubr.msk.f32.gmra.mrb[50].mxu0 %vm132_vm1, %v99_v43  ;;  %6312 = vmatmul.mubr.msk.f32.gmra.mrb[50].mxu1 %vm132_vm1, %v96_v36 }
  0x9f   :  { %462 = vmatprep.mubr.f32.mxu0 %v11362_v0  ;;  %701 = vmatprep.mubr.f32.mxu1 %v11362_v0 }
  0xa2   :  { %6282 = vmatmul.mubr.msk.f32.gmra.mrb[52].mxu0 %vm132_vm1, %v100_v44  ;;  %6313 = vmatmul.mubr.msk.f32.gmra.mrb[52].mxu1 %vm132_vm1, %v97_v38 }
  0xa3   :  { %468 = vmatprep.mubr.f32.mxu0 %v11362_v0  ;;  %707 = vmatprep.mubr.f32.mxu1 %v11362_v0 }
  0xa6   :  { %6283 = vmatmul.mubr.msk.f32.gmra.mrb[54].mxu0 %vm132_vm1, %v101_v45  ;;  %6314 = vmatmul.mubr.msk.f32.gmra.mrb[54].mxu1 %vm132_vm1, %v98_v42 }
  0xa7   :  { %474 = vmatprep.mubr.f32.mxu0 %v11362_v0  ;;  %713 = vmatprep.mubr.f32.mxu1 %v11362_v0 }
  0xaa   :  { %6284 = vmatmul.mubr.msk.f32.gmra.mrb[56].mxu0 %vm132_vm1, %v102_v47  ;;  %6315 = vmatmul.mubr.msk.f32.gmra.mrb[56].mxu1 %vm132_vm1, %v99_v43 }
  0xab   :  { %719 = vmatprep.mubr.f32.mxu1 %v11362_v0  ;;  %884 = vmatprep.mubr.f32.mxu0 %v11362_v0 }
  0xae   :  { %6316 = vmatmul.mubr.msk.f32.gmra.mrb[58].mxu1 %vm132_vm1, %v100_v44  ;;  %885 = vmatmul.mubr.f32.vlgmr.msra.gmra.mrb[0].mxu0 %v11362_v0 }
  0xaf   :  { %725 = vmatprep.mubr.f32.mxu1 %v11362_v0  ;;  %890 = vmatprep.mubr.f32.mxu0 %v11362_v0 }
  0xb0   :  { %6640 = vmatpush1.bf16.msra.mxu0 %v9493_v14 }
  0xb1   :  { %6642 = vmatprep.subr.bf16.mxu0 %v9514_v22 }
  0xb2   :  { %6317 = vmatmul.mubr.msk.f32.gmra.mrb[60].mxu1 %vm132_vm1, %v101_v45  ;;  %891 = vmatmul.mubr.f32.gmra.mrb[2].mxu0 %v11362_v0 }
  0xb3   :  { %731 = vmatprep.mubr.f32.mxu1 %v11362_v0  ;;  %896 = vmatprep.mubr.f32.mxu0 %v11362_v0 }
  0xb4   :  { %6644 = vmatpush1.bf16.msra.mxu0 %v9518_v27 }
  0xb5   :  { %6646 = vmatprep.subr.bf16.mxu0 %v9534_v35 }
  0xb6   :  { %6318 = vmatmul.mubr.msk.f32.gmra.mrb[62].mxu1 %vm132_vm1, %v102_v47  ;;  %897 = vmatmul.mubr.f32.gmra.mrb[4].mxu0 %v11362_v0 }
  0xb7   :  { %737 = vmatprep.mubr.f32.mxu1 %v11362_v0  ;;  %902 = vmatprep.mubr.f32.mxu0 %v11362_v0 }
  0xb8   :  { %6648 = vmatpush1.bf16.msra.mxu0 %v9540_v40 }
  0xb9   :  { %6650 = vmatprep.subr.bf16.mxu0 %v9557_v50 }
  0xba   :  { %6319 = vmatmul.mubr.msk.f32.gmra.mrb[64].mxu1 %vm132_vm1, %v9463_v4  ;;  %903 = vmatmul.mubr.f32.gmra.mrb[6].mxu0 %v11362_v0 }
  0xbb   :  { %743 = vmatprep.mubr.f32.mxu1 %v11362_v0  ;;  %1174 = vmatprep.mubr.f32.mxu0 %v11362_v0 }
  0xbc   :  { %6652 = vmatpush1.bf16.msra.mxu0 %v9562_v53 }
  0xbd   :  { %6654 = vmatprep.subr.bf16.mxu0 %v9579_v1 }
  0xbe   :  { %6320 = vmatmul.mubr.msk.f32.gmra.mrb[66].mxu1 %vm132_vm1, %v9487_v10 }
  0xbf   :  { %749 = vmatprep.mubr.f32.mxu1 %v11362_v0 }
  0xc0   :  { %6656 = vmatpush1.bf16.msra.mxu0 %v9585_v3 }
  0xc1   :  { %6658 = vmatprep.subr.bf16.mxu0 %v9602_v19 }
  0xc2   :  { %6321 = vmatmul.mubr.msk.f32.gmra.mrb[68].mxu1 %vm132_vm1, %v9512_v21 }
  0xc3   :  { %973 = vmatprep.mubr.f32.mxu1 %v11362_v0 }
  0xc4   :  { %6660 = vmatpush1.bf16.msra.mxu0 %v9608_v23 }
  0xc5   :  { %6662 = vmatprep.subr.bf16.mxu0 %v9623_v33 }
  0xc6   :  { %974 = vmatmul.mubr.f32.vlgmr.msra.gmra.mrb[6].mxu1 %v11362_v0 }
  0xc7   :  { %979 = vmatprep.mubr.f32.mxu1 %v11362_v0  ;;  %6672 = vmatpush1.bf16.msra.mxu1 %v9532_v34 }
  0xc8   :  { %6674 = vmatprep.subr.bf16.mxu1 %v9537_v37  ;;  %6664 = vmatpush1.bf16.msra.mxu0 %v9629_v41 }
  0xc9   :  { %6666 = vmatprep.subr.bf16.mxu0 %v9643_v55 }
  0xca   :  { %980 = vmatmul.mubr.f32.gmra.mrb[8].mxu1 %v11362_v0 }
  0xcb   :  { %985 = vmatprep.mubr.f32.mxu1 %v11362_v0  ;;  %6676 = vmatpush1.bf16.msra.mxu1 %v9555_v48 }
  0xcc   :  { %6678 = vmatprep.subr.bf16.mxu1 %v9560_v51  ;;  %6668 = vmatpush1.bf16.msra.mxu0 %v9649_v58 }
  0xcd   :  { %6702 = vmatprep.subr.bf16.mxu0 %v9489_v11 }
  0xce   :  { %986 = vmatmul.mubr.f32.gmra.mrb[10].mxu1 %v11362_v0 }
  0xcf   :  { %991 = vmatprep.mubr.f32.mxu1 %v11362_v0  ;;  %6680 = vmatpush1.bf16.msra.mxu1 %v9576_v61 }
  0xd0   :  { %6682 = vmatprep.subr.bf16.mxu1 %v9583_v2 }
  0xd2   :  { %992 = vmatmul.mubr.f32.gmra.mrb[12].mxu1 %v11362_v0 }
  0xd3   :  { %6684 = vmatpush1.bf16.msra.mxu1 %v9599_v15  ;;  %1263 = vmatprep.mubr.f32.mxu1 %v11362_v0 }
  0xd4   :  { %6686 = vmatprep.subr.bf16.mxu1 %v9606_v20 }
  0xd7   :  { %6688 = vmatpush1.bf16.msra.mxu1 %v9620_v32 }
  0xd8   :  { %6690 = vmatprep.subr.bf16.mxu1 %v9627_v39 }
  0xdb   :  { %6692 = vmatpush1.bf16.msra.mxu1 %v9640_v54 }
  0xdc   :  { %6694 = vmatprep.subr.bf16.mxu1 %v9647_v46 }
  0xdf   :  { %6696 = vmatpush1.bf16.msra.mxu1 %v9660_v5 }
  0xe0   :  { %6698 = vmatprep.subr.bf16.mxu1 %v9665_v59 }
  0xe3   :  { %6700 = vmatpush1.bf16.msra.mxu1 %v9676_v9 }
  0xe4   :  { %6734 = vmatprep.subr.bf16.mxu1 %v9496_v17 }
 0x10d   :  { %v9875_v4 = vpop.f32.mrb[0].mxu1 }
 0x10e   :  { %11402 = vst [vmem:[#allocation12_spill] sm:$0xff] %v9875_v4  ;;  %v9877_v10 = vpop.f32.mrb[1].mxu1 }
 0x10f   :  { %11403 = vst [vmem:[#allocation13_spill] sm:$0xff] %v9877_v10 }
 0x111   :  { %v9879_v21 = vpop.f32.mrb[2].mxu1 }
 0x112   :  { %11404 = vst [vmem:[#allocation14_spill] sm:$0xff] %v9879_v21  ;;  %v9881_v49 = vpop.f32.mrb[3].mxu1 }
 0x113   :  { %11405 = vst [vmem:[#allocation15_spill] sm:$0xff] %v9881_v49 }
 0x115   :  { %v9883_v52 = vpop.f32.mrb[4].mxu1 }
 0x116   :  { %11406 = vst [vmem:[#allocation16_spill] sm:$0xff] %v9883_v52  ;;  %v9885_v56 = vpop.f32.mrb[5].mxu1 }
 0x117   :  { %11407 = vst [vmem:[#allocation17_spill] sm:$0xff] %v9885_v56 }
 0x181   :  { %v886_v12 = vpop.f32.mrb[0].mxu0 }
 0x182   :  { %v7695_v13 = vadd.f32 %v886_v12, %v9896_v7  ;;  %v888_v16 = vpop.f32.mrb[1].mxu0 }
 0x183   :  { %v7696_v18 = vadd.f32 %v888_v16, %v9900_v8 }
 0x184   :  { %v6322_v24 = vmul.f32 -1.442695, %v7695_v13 }
 0x185   :  { %v892_v25 = vpop.f32.mrb[2].mxu0  ;;  %v6326_v26 = vmul.f32 -1.442695, %v7696_v18 }
 0x186   :  { %v7697_v28 = vadd.f32 %v892_v25, %v9896_v7  ;;  %v894_v29 = vpop.f32.mrb[3].mxu0  ;;  %8216 = vpow2.f32 %v6322_v24  ;;  %v11358_v25 = vsub.s32 2, %v9887_v60 }
 0x187   :  { %v7698_v30 = vadd.f32 %v894_v29, %v9900_v8  ;;  %8218 = vpow2.f32 %v6326_v26 }
 0x188   :  { %v6323_v31 = vmul.f32 -1.442695, %v7697_v28  ;;  %v11359_v28 = vsub.s32 3, %v9887_v60 }
 0x189   :  { %v6327_v36 = vmul.f32 -1.442695, %v7698_v30  ;;  %v898_v38 = vpop.f32.mrb[4].mxu0 }
 0x18a   :  { %v7699_v42 = vadd.f32 %v898_v38, %v9896_v7  ;;  %v900_v43 = vpop.f32.mrb[5].mxu0  ;;  %8220 = vpow2.f32 %v6323_v31 }
 0x18b   :  { %v7700_v44 = vadd.f32 %v900_v43, %v9900_v8  ;;  %8222 = vpow2.f32 %v6327_v36  ;;  %v9914_v36 = vrot.slane %v110_v63, %v11358_v25  ;;  %v9918_v43 = vrot.slane %v110_v63, %v11359_v28 }
 0x18c   :  { %v6324_v45 = vmul.f32 -1.442695, %v7699_v42 }
 0x18d   :  { %v6328_v47 = vmul.f32 -1.442695, %v7700_v44  ;;  %v904_v57 = vpop.f32.mrb[6].mxu0 }
 0x18e   :  { %8224 = vpow2.f32 %v6324_v45  ;;  %v7701_v12 = vadd.f32 %v904_v57, %v9896_v7  ;;  %v906_v13 = vpop.f32.mrb[7].mxu0 }
 0x18f   :  { %v7702_v16 = vadd.f32 %v906_v13, %v9900_v8  ;;  %8226 = vpow2.f32 %v6328_v47 }
 0x190   :  { %v6325_v18 = vmul.f32 -1.442695, %v7701_v12  ;;  %v8217_v26 = vpop.eup %8216 }
 0x191   :  { %v6329_v24 = vmul.f32 -1.442695, %v7702_v16  ;;  %v8219_v29 = vpop.eup %8218  ;;  %v1026_v31 = vadd.f32 1.0, %v8217_v26 }
 0x192   :  { %8228 = vpow2.f32 %v6325_v18  ;;  %v1050_v42 = vadd.f32 1.0, %v8219_v29 }
 0x193   :  { %8230 = vpow2.f32 %v6329_v24 }
 0x194   :  { %v8221_v30 = vpop.eup %8220  ;;  %8232 = vrcp.f32 %v1026_v31 }
 0x195   :  { %v8223_v38 = vpop.eup %8222  ;;  %v1027_v45 = vadd.f32 1.0, %v8221_v30  ;;  %8234 = vrcp.f32 %v1050_v42 }
 0x196   :  { %v1051_v57 = vadd.f32 1.0, %v8223_v38 }
 0x197   :  { %8236 = vrcp.f32 %v1027_v45 }
 0x198   :  { %v8225_v44 = vpop.eup %8224 }
 0x199   :  { %v975_v47 = vpop.f32.mrb[6].mxu1  ;;  %v8227_v16 = vpop.eup %8226  ;;  %v1028_v18 = vadd.f32 1.0, %v8225_v44 }
 0x19a   :  { %v7765_v12 = vadd.f32 %v975_v47, %v9914_v36  ;;  %v977_v13 = vpop.f32.mrb[7].mxu1  ;;  %v1052_v63 = vadd.f32 1.0, %v8227_v16 }
 0x19b   :  { %v7766_v24 = vadd.f32 %v977_v13, %v9918_v43 }
 0x19c   :  { %8238 = vtanh.f32 %v7765_v12  ;;  %v8229_v25 = vpop.eup %8228 }
 0x19d   :  { %v6330_v26 = vmul.f32 -1.442695, %v7766_v24  ;;  %v981_v29 = vpop.f32.mrb[8].mxu1  ;;  %8240 = vrcp.f32 %v1051_v57  ;;  %v8231_v31 = vpop.eup %8230  ;;  %v1029_v47 = vadd.f32 1.0, %v8229_v25 }
 0x19e   :  { %v7767_v30 = vadd.f32 %v981_v29, %v9914_v36  ;;  %v983_v28 = vpop.f32.mrb[9].mxu1  ;;  %8242 = vrcp.f32 %v1028_v18  ;;  %v1053_v45 = vadd.f32 1.0, %v8231_v31  ;;  %v8233_v16 = vpop.eup %8232 }
 0x19f   :  { %v7768_v38 = vadd.f32 %v983_v28, %v9918_v43  ;;  %8244 = vpow2.f32 %v6330_v26  ;;  %v8235_v24 = vpop.eup %8234 }
 0x1a0   :  { %8246 = vtanh.f32 %v7767_v30 }
 0x1a1   :  { %v6331_v42 = vmul.f32 -1.442695, %v7768_v38  ;;  %v987_v44 = vpop.f32.mrb[10].mxu1  ;;  %8248 = vrcp.f32 %v1052_v63  ;;  %v8237_v28 = vpop.eup %8236  ;;  %v1090_v38 = vmul.f32 0.0, %v8235_v24 }
 0x1a2   :  { %v7769_v12 = vadd.f32 %v987_v44, %v9914_v36  ;;  %v989_v13 = vpop.f32.mrb[11].mxu1 }
 0x1a3   :  { %8250 = vpow2.f32 %v6331_v42  ;;  %v7770_v57 = vadd.f32 %v989_v13, %v9918_v43 }
 0x1a4   :  { %8252 = vtanh.f32 %v7769_v12 }
 0x1a5   :  { %8254 = vrcp.f32 %v1029_v47  ;;  %v6332_v18 = vmul.f32 -1.442695, %v7770_v57  ;;  %v993_v29 = vpop.f32.mrb[12].mxu1 }
 0x1a6   :  { %8256 = vrcp.f32 %v1053_v45  ;;  %v7771_v25 = vadd.f32 %v993_v29, %v9914_v36  ;;  %v995_v26 = vpop.f32.mrb[13].mxu1  ;;  %v8239_v30 = vpop.eup %8238 }
 0x1a7   :  { %8258 = vpow2.f32 %v6332_v18  ;;  %v7772_v63 = vadd.f32 %v995_v26, %v9918_v43  ;;  %v8241_v31 = vpop.eup %8240  ;;  %v1094_v42 = vmul.f32 %v8239_v30, %v8233_v16 }
 0x1a8   :  { %8260 = vtanh.f32 %v7771_v25  ;;  %v8243_v44 = vpop.eup %8242  ;;  %v1091_v62 = vmul.f32 0.0, %v8241_v31 }
 0x1a9   :  { %v6333_v13 = vmul.f32 -1.442695, %v7772_v63  ;;  %v8245_v12 = vpop.eup %8244  ;;  %v9928_v6 = vadd.f32 %v1094_v42, %v1090_v38 }
 0x1aa   :  { %v8247_v47 = vpop.eup %8246  ;;  %v1078_v57 = vadd.f32 1.0, %v8245_v12 }
 0x1ab   :  { %8262 = vpow2.f32 %v6333_v13  ;;  %v8249_v45 = vpop.eup %8248  ;;  %v1095_v29 = vmul.f32 %v8247_v47, %v8237_v28 }
 0x1ac   :  { %8264 = vtanh.f32 %v9928_v6  ;;  %v1092_v25 = vmul.f32 0.0, %v8249_v45 }
 0x1ad   :  { %v8251_v18 = vpop.eup %8250  ;;  %8266 = vrcp.f32 %v1078_v57  ;;  %v9931_v0 = vadd.f32 %v1095_v29, %v1091_v62 }
 0x1ae   :  { %v8253_v26 = vpop.eup %8252  ;;  %v1079_v16 = vadd.f32 1.0, %v8251_v18 }
 0x1af   :  { %v8255_v24 = vpop.eup %8254  ;;  %v1096_v30 = vmul.f32 %v8253_v26, %v8243_v44  ;;  %8268 = vtanh.f32 %v9931_v0 }
 0x1b0   :  { %v8257_v63 = vpop.eup %8256  ;;  %8270 = vrcp.f32 %v1079_v16  ;;  %v11409_v16 = vmov 0.0  }
 0x1b1   :  { %v8259_v38 = vpop.eup %8258  ;;  %v9934_v42 = vadd.f32 %v1096_v30, %v1092_v25  ;;  %v1093_v12 = vmul.f32 0.0, %v8257_v63 }
 0x1b2   :  { %v8261_v31 = vpop.eup %8260  ;;  %v1080_v13 = vadd.f32 1.0, %v8259_v38 }
 0x1b3   :  { %8272 = vtanh.f32 %v9934_v42  ;;  %v1097_v28 = vmul.f32 %v8261_v31, %v8255_v24 }
 0x1b4   :  { %8274 = vrcp.f32 %v1080_v13 }
 0x1b5   :  { %v8263_v62 = vpop.eup %8262  ;;  %v9937_v47 = vadd.f32 %v1097_v28, %v1093_v12 }
 0x1b6   :  { %v8265_v57 = vpop.eup %8264  ;;  %v1081_v45 = vadd.f32 1.0, %v8263_v62 }
 0x1b7   :  { %v8267_v44 = vpop.eup %8266  ;;  %8276 = vtanh.f32 %v9937_v47 }
 0x1b8   :  { %8278 = vrcp.f32 %v1081_v45  ;;  %v9940_v29 = vmul.f32 %v8267_v44, %v8265_v57 }
 0x1b9   :  { %v8269_v18 = vpop.eup %8268 }
 0x1ba   :  { %1175 = vmatmul.mubr.f32.vlgmr.msra.gmra.mrb[8].mxu0 %v9940_v29  ;;  %1264 = vmatmul.mubr.f32.vlgmr.msra.gmra.mrb[14].mxu1 %v9940_v29  ;;  %v8271_v26 = vpop.eup %8270 }
 0x1bb   :  { %1180 = vmatprep.mubr.f32.mxu0 %v11409_v16  ;;  %1269 = vmatprep.mubr.f32.mxu1 %v11409_v16  ;;  %v9946_v24 = vmul.f32 %v8271_v26, %v8269_v18 }
 0x1bc   :  { %6704 = vmatpush1.bf16.msra.mxu0 %v9493_v14  ;;  %6736 = vmatpush1.bf16.msra.mxu1 %v9532_v34 }
 0x1bd   :  { %11410 = vst [vmem:[#allocation19_spill] sm:$0xff] %v9946_v24  ;;  %v8273_v25 = vpop.eup %8272  ;;  %6706 = vmatprep.subr.bf16.mxu0 %v9514_v22  ;;  %6738 = vmatprep.subr.bf16.mxu1 %v9537_v37 }
 0x1be   :  { %v8275_v30 = vpop.eup %8274  ;;  %1181 = vmatmul.mubr.f32.gmra.mrb[10].mxu0 %v9946_v24  ;;  %1270 = vmatmul.mubr.f32.gmra.mrb[16].mxu1 %v9946_v24 }
 0x1bf   :  { %1186 = vmatprep.mubr.f32.mxu0 %v11409_v16  ;;  %1275 = vmatprep.mubr.f32.mxu1 %v11409_v16  ;;  %v9956_v63 = vmul.f32 %v8275_v30, %v8273_v25 }
 0x1c0   :  { %6708 = vmatpush1.bf16.msra.mxu0 %v9518_v27  ;;  %6740 = vmatpush1.bf16.msra.mxu1 %v9555_v48 }
 0x1c1   :  { %11411 = vst [vmem:[#allocation20_spill] sm:$0xff] %v9956_v63  ;;  %v8277_v38 = vpop.eup %8276  ;;  %6710 = vmatprep.subr.bf16.mxu0 %v9534_v35  ;;  %6742 = vmatprep.subr.bf16.mxu1 %v9560_v51 }
 0x1c2   :  { %v8279_v31 = vpop.eup %8278  ;;  %1187 = vmatmul.mubr.f32.gmra.mrb[12].mxu0 %v9956_v63  ;;  %1276 = vmatmul.mubr.f32.gmra.mrb[18].mxu1 %v9956_v63 }
 0x1c3   :  { %1192 = vmatprep.mubr.f32.mxu0 %v11409_v16  ;;  %1281 = vmatprep.mubr.f32.mxu1 %v11409_v16  ;;  %v9966_v13 = vmul.f32 %v8279_v31, %v8277_v38 }
 0x1c4   :  { %6712 = vmatpush1.bf16.msra.mxu0 %v9540_v40  ;;  %6744 = vmatpush1.bf16.msra.mxu1 %v9576_v61 }
 0x1c5   :  { %11412 = vst [vmem:[#allocation21_spill] sm:$0xff] %v9966_v13  ;;  %6714 = vmatprep.subr.bf16.mxu0 %v9557_v50  ;;  %6746 = vmatprep.subr.bf16.mxu1 %v9583_v2 }
 0x1c6   :  { %1193 = vmatmul.mubr.f32.gmra.mrb[14].mxu0 %v9966_v13  ;;  %1282 = vmatmul.mubr.f32.gmra.mrb[20].mxu1 %v9966_v13 }
 0x1c7   :  { %1464 = vmatprep.mubr.f32.mxu0 %v11409_v16  ;;  %1553 = vmatprep.mubr.f32.mxu1 %v11409_v16 }
 0x1c8   :  { %6716 = vmatpush1.bf16.msra.mxu0 %v9562_v53  ;;  %6748 = vmatpush1.bf16.msra.mxu1 %v9599_v15 }
 0x1c9   :  { %6718 = vmatprep.subr.bf16.mxu0 %v9579_v1  ;;  %6750 = vmatprep.subr.bf16.mxu1 %v9606_v20 }
 0x1cc   :  { %6720 = vmatpush1.bf16.msra.mxu0 %v9585_v3  ;;  %6752 = vmatpush1.bf16.msra.mxu1 %v9620_v32 }
 0x1cd   :  { %6722 = vmatprep.subr.bf16.mxu0 %v9602_v19  ;;  %6754 = vmatprep.subr.bf16.mxu1 %v9627_v39 }
 0x1d0   :  { %6724 = vmatpush1.bf16.msra.mxu0 %v9608_v23  ;;  %6756 = vmatpush1.bf16.msra.mxu1 %v9640_v54 }
 0x1d1   :  { %6726 = vmatprep.subr.bf16.mxu0 %v9623_v33  ;;  %6758 = vmatprep.subr.bf16.mxu1 %v9647_v46 }
 0x1d4   :  { %6728 = vmatpush1.bf16.msra.mxu0 %v9629_v41  ;;  %6760 = vmatpush1.bf16.msra.mxu1 %v9660_v5 }
 0x1d5   :  { %6730 = vmatprep.subr.bf16.mxu0 %v9643_v55  ;;  %6762 = vmatprep.subr.bf16.mxu1 %v9665_v59 }
 0x1d8   :  { %6732 = vmatpush1.bf16.msra.mxu0 %v9649_v58  ;;  %6764 = vmatpush1.bf16.msra.mxu1 %v9676_v9 }
 0x1d9   :  { %6766 = vmatprep.subr.bf16.mxu0 %v9489_v11  ;;  %6798 = vmatprep.subr.bf16.mxu1 %v9496_v17 }
 0x28d   :  { %v1176_v12 = vpop.f32.mrb[8].mxu0  ;;  %v1265_v28 = vpop.f32.mrb[14].mxu1 }
 0x28e   :  { %v7703_v62 = vadd.f32 %v1176_v12, %v9896_v7  ;;  %v1178_v57 = vpop.f32.mrb[9].mxu0  ;;  %v1267_v45 = vpop.f32.mrb[15].mxu1  ;;  %v7773_v12 = vadd.f32 %v1265_v28, %v9914_v36 }
 0x28f   :  { %v7704_v44 = vadd.f32 %v1178_v57, %v9900_v8  ;;  %v7774_v52 = vadd.f32 %v1267_v45, %v9918_v43 }
 0x290   :  { %v6334_v18 = vmul.f32 -1.442695, %v7703_v62 }
 0x291   :  { %v6338_v26 = vmul.f32 -1.442695, %v7704_v44  ;;  %v1182_v25 = vpop.f32.mrb[10].mxu0  ;;  %v1271_v30 = vpop.f32.mrb[16].mxu1  ;;  %v6342_v4 = vmul.f32 -1.442695, %v7774_v52 }
 0x292   :  { %8280 = vpow2.f32 %v6334_v18  ;;  %v7705_v38 = vadd.f32 %v1182_v25, %v9896_v7  ;;  %v1184_v31 = vpop.f32.mrb[11].mxu0  ;;  %v1273_v60 = vpop.f32.mrb[17].mxu1 }
 0x293   :  { %8282 = vpow2.f32 %v6338_v26  ;;  %v7706_v56 = vadd.f32 %v1184_v31, %v9900_v8  ;;  %v7775_v31 = vadd.f32 %v1271_v30, %v9914_v36  ;;  %v7776_v45 = vadd.f32 %v1273_v60, %v9918_v43 }
 0x294   :  { %v6335_v49 = vmul.f32 -1.442695, %v7705_v38 }
 0x295   :  { %v6339_v21 = vmul.f32 -1.442695, %v7706_v56  ;;  %v1188_v10 = vpop.f32.mrb[12].mxu0  ;;  %v1277_v57 = vpop.f32.mrb[18].mxu1  ;;  %v6343_v30 = vmul.f32 -1.442695, %v7776_v45 }
 0x296   :  { %8284 = vpow2.f32 %v6335_v49  ;;  %v7707_v62 = vadd.f32 %v1188_v10, %v9896_v7  ;;  %v1190_v44 = vpop.f32.mrb[13].mxu0  ;;  %v1279_v18 = vpop.f32.mrb[19].mxu1 }
 0x297   :  { %8286 = vpow2.f32 %v6339_v21  ;;  %v7708_v25 = vadd.f32 %v1190_v44, %v9900_v8  ;;  %v7778_v60 = vadd.f32 %v1279_v18, %v9918_v43 }
 0x298   :  { %v6336_v26 = vmul.f32 -1.442695, %v7707_v62  ;;  %8288 = vtanh.f32 %v7773_v12 }
 0x299   :  { %v6340_v38 = vmul.f32 -1.442695, %v7708_v25  ;;  %v1194_v28 = vpop.f32.mrb[14].mxu0  ;;  %v1283_v56 = vpop.f32.mrb[20].mxu1 }
 0x29a   :  { %8290 = vpow2.f32 %v6336_v26  ;;  %v7709_v49 = vadd.f32 %v1194_v28, %v9896_v7  ;;  %v1196_v13 = vpop.f32.mrb[15].mxu0  ;;  %v1285_v10 = vpop.f32.mrb[21].mxu1 }
 0x29b   :  { %8292 = vpow2.f32 %v6340_v38  ;;  %v7710_v21 = vadd.f32 %v1196_v13, %v9900_v8  ;;  %v6344_v38 = vmul.f32 -1.442695, %v7778_v60  ;;  %v7780_v45 = vadd.f32 %v1285_v10, %v9918_v43 }
 0x29c   :  { %v8281_v63 = vpop.eup %8280  ;;  %8294 = vpow2.f32 %v6342_v4  ;;  %v6337_v52 = vmul.f32 -1.442695, %v7709_v49  ;;  %v7777_v4 = vadd.f32 %v1277_v57, %v9914_v36 }
 0x29d   :  { %v8283_v62 = vpop.eup %8282  ;;  %v1316_v12 = vadd.f32 1.0, %v8281_v63  ;;  %8296 = vtanh.f32 %v7775_v31  ;;  %v6341_v25 = vmul.f32 -1.442695, %v7710_v21 }
 0x29e   :  { %v1340_v44 = vadd.f32 1.0, %v8283_v62  ;;  %8298 = vpow2.f32 %v6337_v52  ;;  %v7779_v62 = vadd.f32 %v1283_v56, %v9914_v36 }
 0x29f   :  { %8300 = vrcp.f32 %v1316_v12 }
 0x2a0   :  { %v8285_v26 = vpop.eup %8284  ;;  %8302 = vrcp.f32 %v1340_v44  ;;  %v6345_v44 = vmul.f32 -1.442695, %v7780_v45 }
 0x2a1   :  { %v8287_v28 = vpop.eup %8286  ;;  %v1317_v24 = vadd.f32 1.0, %v8285_v26  ;;  %8304 = vpow2.f32 %v6343_v30 }
 0x2a2   :  { %v1341_v13 = vadd.f32 1.0, %v8287_v28  ;;  %8306 = vpow2.f32 %v6341_v25  ;;  %v8289_v49 = vpop.eup %8288 }
 0x2a3   :  { %8308 = vrcp.f32 %v1317_v24 }
 0x2a4   :  { %v8291_v63 = vpop.eup %8290  ;;  %8310 = vrcp.f32 %v1341_v13 }
 0x2a5   :  { %v8293_v31 = vpop.eup %8292  ;;  %v1318_v18 = vadd.f32 1.0, %v8291_v63  ;;  %8312 = vpow2.f32 %v6344_v38 }
 0x2a6   :  { %v8295_v21 = vpop.eup %8294  ;;  %8314 = vtanh.f32 %v7777_v4  ;;  %v1342_v52 = vadd.f32 1.0, %v8293_v31 }
 0x2a7   :  { %v8297_v12 = vpop.eup %8296  ;;  %8316 = vrcp.f32 %v1318_v18  ;;  %v1368_v26 = vadd.f32 1.0, %v8295_v21 }
 0x2a8   :  { %v8299_v30 = vpop.eup %8298  ;;  %8318 = vrcp.f32 %v1342_v52 }
 0x2a9   :  { %v8301_v57 = vpop.eup %8300  ;;  %v1319_v60 = vadd.f32 1.0, %v8299_v30  ;;  %8320 = vtanh.f32 %v7779_v62 }
 0x2aa   :  { %v8303_v24 = vpop.eup %8302  ;;  %v1384_v25 = vmul.f32 %v8301_v57, %v8289_v49 }
 0x2ab   :  { %v8305_v28 = vpop.eup %8304  ;;  %v1380_v38 = vmul.f32 %v8303_v24, %v9928_v6  ;;  %8322 = vrcp.f32 %v1319_v60 }
 0x2ac   :  { %v8307_v10 = vpop.eup %8306  ;;  %8324 = vpow2.f32 %v6345_v44  ;;  %v1369_v45 = vadd.f32 1.0, %v8305_v28 }
 0x2ad   :  { %v8309_v13 = vpop.eup %8308  ;;  %v10013_v4 = vadd.f32 %v1384_v25, %v1380_v38  ;;  %v1343_v56 = vadd.f32 1.0, %v8307_v10  ;;  %8326 = vrcp.f32 %v1368_v26 }
 0x2ae   :  { %v8311_v63 = vpop.eup %8310  ;;  %v1385_v31 = vmul.f32 %v8309_v13, %v8297_v12 }
 0x2af   :  { %v8313_v18 = vpop.eup %8312  ;;  %8328 = vtanh.f32 %v10013_v4  ;;  %v1381_v49 = vmul.f32 %v8311_v63, %v9931_v0 }
 0x2b0   :  { %v8315_v21 = vpop.eup %8314  ;;  %8330 = vrcp.f32 %v1343_v56  ;;  %v1370_v57 = vadd.f32 1.0, %v8313_v18 }
 0x2b1   :  { %v8317_v52 = vpop.eup %8316  ;;  %v10017_v6 = vadd.f32 %v1385_v31, %v1381_v49  ;;  %8332 = vrcp.f32 %v1369_v45 }
 0x2b2   :  { %v8319_v62 = vpop.eup %8318  ;;  %v1386_v30 = vmul.f32 %v8317_v52, %v8315_v21 }
 0x2b3   :  { %v1382_v60 = vmul.f32 %v8319_v62, %v9934_v42  ;;  %v8321_v44 = vpop.eup %8320  ;;  %8334 = vtanh.f32 %v10017_v6 }
 0x2b4   :  { %8336 = vrcp.f32 %v1370_v57 }
 0x2b5   :  { %v8323_v12 = vpop.eup %8322  ;;  %v10021_v24 = vadd.f32 %v1386_v30, %v1382_v60 }
 0x2b6   :  { %v1387_v0 = vmul.f32 %v8323_v12, %v8321_v44  ;;  %v8325_v25 = vpop.eup %8324 }
 0x2b7   :  { %8338 = vtanh.f32 %v10021_v24  ;;  %v8327_v26 = vpop.eup %8326  ;;  %v1371_v10 = vadd.f32 1.0, %v8325_v25 }
 0x2b9   :  { %v8329_v28 = vpop.eup %8328  ;;  %8340 = vrcp.f32 %v1371_v10 }
 0x2ba   :  { %v8331_v38 = vpop.eup %8330  ;;  %v10024_v13 = vmul.f32 %v8329_v28, %v8327_v26 }
 0x2bb   :  { %v1383_v56 = vmul.f32 %v8331_v38, %v9937_v47  ;;  %v8333_v42 = vpop.eup %8332 }
 0x2bc   :  { %11413 = vst [vmem:[#allocation22_spill] sm:$0xff] %v10024_v13  ;;  %1465 = vmatmul.mubr.f32.vlgmr.msra.gmra.mrb[16].mxu0 %v10024_v13  ;;  %1554 = vmatmul.mubr.f32.vlgmr.msra.gmra.mrb[22].mxu1 %v10024_v13 }
 0x2bd   :  { %v10029_v63 = vadd.f32 %v1387_v0, %v1383_v56  ;;  %1470 = vmatprep.mubr.f32.mxu0 %v11409_v16  ;;  %1559 = vmatprep.mubr.f32.mxu1 %v11409_v16  ;;  %v8335_v31 = vpop.eup %8334 }
 0x2be   :  { %6768 = vmatpush1.bf16.msra.mxu0 %v9493_v14  ;;  %6800 = vmatpush1.bf16.msra.mxu1 %v9532_v34  ;;  %v10035_v18 = vmul.f32 %v8335_v31, %v8333_v42  ;;  %v8337_v47 = vpop.eup %8336 }
 0x2bf   :  { %8342 = vtanh.f32 %v10029_v63  ;;  %6770 = vmatprep.subr.bf16.mxu0 %v9514_v22  ;;  %6802 = vmatprep.subr.bf16.mxu1 %v9537_v37 }
 0x2c0   :  { %11414 = vst [vmem:[#allocation23_spill] sm:$0xff] %v10035_v18  ;;  %1471 = vmatmul.mubr.f32.gmra.mrb[18].mxu0 %v10035_v18  ;;  %1560 = vmatmul.mubr.f32.gmra.mrb[24].mxu1 %v10035_v18 }
 0x2c1   :  { %v8339_v49 = vpop.eup %8338  ;;  %1476 = vmatprep.mubr.f32.mxu0 %v11409_v16  ;;  %1565 = vmatprep.mubr.f32.mxu1 %v11409_v16 }
 0x2c2   :  { %v10044_v45 = vmul.f32 %v8339_v49, %v8337_v47  ;;  %6772 = vmatpush1.bf16.msra.mxu0 %v9518_v27  ;;  %6804 = vmatpush1.bf16.msra.mxu1 %v9555_v48 }
 0x2c3   :  { %6774 = vmatprep.subr.bf16.mxu0 %v9534_v35  ;;  %6806 = vmatprep.subr.bf16.mxu1 %v9560_v51  ;;  %v8341_v21 = vpop.eup %8340 }
 0x2c4   :  { %11415 = vst [vmem:[#allocation24_spill] sm:$0xff] %v10044_v45  ;;  %1477 = vmatmul.mubr.f32.gmra.mrb[20].mxu0 %v10044_v45  ;;  %1566 = vmatmul.mubr.f32.gmra.mrb[26].mxu1 %v10044_v45 }
 0x2c5   :  { %1482 = vmatprep.mubr.f32.mxu0 %v11409_v16  ;;  %1571 = vmatprep.mubr.f32.mxu1 %v11409_v16 }
 0x2c6   :  { %6776 = vmatpush1.bf16.msra.mxu0 %v9540_v40  ;;  %6808 = vmatpush1.bf16.msra.mxu1 %v9576_v61 }
 0x2c7   :  { %6778 = vmatprep.subr.bf16.mxu0 %v9557_v50  ;;  %6810 = vmatprep.subr.bf16.mxu1 %v9583_v2 }
 0x2c9   :  { %v8343_v52 = vpop.eup %8342 }
 0x2ca   :  { %v10058_v62 = vmul.f32 %v8343_v52, %v8341_v21  ;;  %6780 = vmatpush1.bf16.msra.mxu0 %v9562_v53  ;;  %6812 = vmatpush1.bf16.msra.mxu1 %v9599_v15 }
 0x2cb   :  { %6782 = vmatprep.subr.bf16.mxu0 %v9579_v1  ;;  %6814 = vmatprep.subr.bf16.mxu1 %v9606_v20 }
 0x2cc   :  { %11416 = vst [vmem:[#allocation25_spill] sm:$0xff] %v10058_v62  ;;  %1483 = vmatmul.mubr.f32.gmra.mrb[22].mxu0 %v10058_v62  ;;  %1572 = vmatmul.mubr.f32.gmra.mrb[28].mxu1 %v10058_v62 }
 0x2cd   :  { %1754 = vmatprep.mubr.f32.mxu0 %v11409_v16  ;;  %1843 = vmatprep.mubr.f32.mxu1 %v11409_v16 }
 0x2ce   :  { %6784 = vmatpush1.bf16.msra.mxu0 %v9585_v3  ;;  %6816 = vmatpush1.bf16.msra.mxu1 %v9620_v32 }
 0x2cf   :  { %6786 = vmatprep.subr.bf16.mxu0 %v9602_v19  ;;  %6818 = vmatprep.subr.bf16.mxu1 %v9627_v39 }
 0x2d2   :  { %6788 = vmatpush1.bf16.msra.mxu0 %v9608_v23  ;;  %6820 = vmatpush1.bf16.msra.mxu1 %v9640_v54 }
 0x2d3   :  { %6790 = vmatprep.subr.bf16.mxu0 %v9623_v33  ;;  %6822 = vmatprep.subr.bf16.mxu1 %v9647_v46 }
 0x2d6   :  { %6792 = vmatpush1.bf16.msra.mxu0 %v9629_v41  ;;  %6824 = vmatpush1.bf16.msra.mxu1 %v9660_v5 }
 0x2d7   :  { %6794 = vmatprep.subr.bf16.mxu0 %v9643_v55  ;;  %6826 = vmatprep.subr.bf16.mxu1 %v9665_v59 }
 0x2da   :  { %6796 = vmatpush1.bf16.msra.mxu0 %v9649_v58  ;;  %6828 = vmatpush1.bf16.msra.mxu1 %v9676_v9 }
 0x2db   :  { %6830 = vmatprep.subr.bf16.mxu0 %v9489_v11  ;;  %6862 = vmatprep.subr.bf16.mxu1 %v9496_v17 }
 0x38f   :  { %v1466_v30 = vpop.f32.mrb[16].mxu0  ;;  %v1555_v57 = vpop.f32.mrb[22].mxu1 }
 0x390   :  { %v7711_v60 = vadd.f32 %v1466_v30, %v9896_v7  ;;  %v1468_v44 = vpop.f32.mrb[17].mxu0  ;;  %v1557_v12 = vpop.f32.mrb[23].mxu1 }
 0x391   :  { %v7712_v0 = vadd.f32 %v1468_v44, %v9900_v8  ;;  %v7782_v28 = vadd.f32 %v1557_v12, %v9918_v43 }
 0x392   :  { %v6346_v25 = vmul.f32 -1.442695, %v7711_v60 }
 0x393   :  { %v6350_v26 = vmul.f32 -1.442695, %v7712_v0  ;;  %v1472_v38 = vpop.f32.mrb[18].mxu0  ;;  %v1561_v10 = vpop.f32.mrb[24].mxu1  ;;  %v6354_v21 = vmul.f32 -1.442695, %v7782_v28 }
 0x394   :  { %8344 = vpow2.f32 %v6346_v25  ;;  %v7713_v56 = vadd.f32 %v1472_v38, %v9896_v7  ;;  %v1474_v42 = vpop.f32.mrb[19].mxu0  ;;  %v1563_v31 = vpop.f32.mrb[25].mxu1  ;;  %v7781_v25 = vadd.f32 %v1555_v57, %v9914_v36 }
 0x395   :  { %8346 = vpow2.f32 %v6350_v26  ;;  %v7714_v47 = vadd.f32 %v1474_v42, %v9900_v8  ;;  %v7784_v26 = vadd.f32 %v1563_v31, %v9918_v43 }
 0x396   :  { %v6347_v49 = vmul.f32 -1.442695, %v7713_v56  ;;  %v7783_v56 = vadd.f32 %v1561_v10, %v9914_v36 }
 0x397   :  { %v6351_v52 = vmul.f32 -1.442695, %v7714_v47  ;;  %v1478_v30 = vpop.f32.mrb[20].mxu0  ;;  %v1567_v62 = vpop.f32.mrb[26].mxu1 }
 0x398   :  { %8348 = vpow2.f32 %v6347_v49  ;;  %v7715_v60 = vadd.f32 %v1478_v30, %v9896_v7  ;;  %v1480_v44 = vpop.f32.mrb[21].mxu0  ;;  %v1569_v0 = vpop.f32.mrb[27].mxu1  ;;  %v6355_v30 = vmul.f32 -1.442695, %v7784_v26  ;;  %v7785_v10 = vadd.f32 %v1567_v62, %v9914_v36 }
 0x399   :  { %8350 = vpow2.f32 %v6351_v52  ;;  %v7716_v12 = vadd.f32 %v1480_v44, %v9900_v8  ;;  %v7786_v57 = vadd.f32 %v1569_v0, %v9918_v43 }
 0x39a   :  { %v6348_v38 = vmul.f32 -1.442695, %v7715_v60  ;;  %8352 = vpow2.f32 %v6354_v21 }
 0x39b   :  { %v6352_v28 = vmul.f32 -1.442695, %v7716_v12 }
 0x39c   :  { %8354 = vpow2.f32 %v6348_v38 }
 0x39d   :  { %8356 = vpow2.f32 %v6352_v28  ;;  %v6356_v28 = vmul.f32 -1.442695, %v7786_v57 }
 0x39e   :  { %v8345_v42 = vpop.eup %8344  ;;  %8358 = vtanh.f32 %v7781_v25 }
 0x39f   :  { %v8347_v47 = vpop.eup %8346  ;;  %v1606_v49 = vadd.f32 1.0, %v8345_v42  ;;  %v1484_v45 = vpop.f32.mrb[22].mxu0  ;;  %8360 = vtanh.f32 %v7783_v56 }
 0x3a0   :  { %v1573_v52 = vpop.f32.mrb[28].mxu1  ;;  %v1630_v18 = vadd.f32 1.0, %v8347_v47  ;;  %v7717_v31 = vadd.f32 %v1484_v45, %v9896_v7  ;;  %v1486_v60 = vpop.f32.mrb[23].mxu0 }
 0x3a1   :  { %v1575_v21 = vpop.f32.mrb[29].mxu1  ;;  %8362 = vrcp.f32 %v1606_v49  ;;  %v7718_v44 = vadd.f32 %v1486_v60, %v9900_v8 }
 0x3a2   :  { %8364 = vrcp.f32 %v1630_v18  ;;  %v6349_v12 = vmul.f32 -1.442695, %v7717_v31  ;;  %v8349_v38 = vpop.eup %8348  ;;  %v7788_v57 = vadd.f32 %v1575_v21, %v9918_v43 }
 0x3a3   :  { %8366 = vpow2.f32 %v6355_v30  ;;  %v8351_v25 = vpop.eup %8350  ;;  %v1607_v26 = vadd.f32 1.0, %v8349_v38  ;;  %v6353_v0 = vmul.f32 -1.442695, %v7718_v44  ;;  %v7787_v44 = vadd.f32 %v1573_v52, %v9914_v36 }
 0x3a4   :  { %8368 = vpow2.f32 %v6349_v12  ;;  %v1631_v56 = vadd.f32 1.0, %v8351_v25  ;;  %v8353_v42 = vpop.eup %8352 }
 0x3a5   :  { %8370 = vtanh.f32 %v7785_v10  ;;  %v1658_v31 = vadd.f32 1.0, %v8353_v42 }
 0x3a6   :  { %8372 = vrcp.f32 %v1607_v26  ;;  %v8355_v45 = vpop.eup %8354 }
 0x3a7   :  { %8374 = vrcp.f32 %v1631_v56  ;;  %v8357_v47 = vpop.eup %8356  ;;  %v1608_v49 = vadd.f32 1.0, %v8355_v45  ;;  %v6357_v45 = vmul.f32 -1.442695, %v7788_v57 }
 0x3a8   :  { %8376 = vpow2.f32 %v6356_v28  ;;  %v8359_v62 = vpop.eup %8358  ;;  %v1632_v60 = vadd.f32 1.0, %v8357_v47 }
 0x3a9   :  { %8378 = vpow2.f32 %v6353_v0  ;;  %v8361_v18 = vpop.eup %8360 }
 0x3aa   :  { %8380 = vrcp.f32 %v1608_v49 }
 0x3ab   :  { %v8363_v30 = vpop.eup %8362  ;;  %8382 = vrcp.f32 %v1632_v60 }
 0x3ac   :  { %v8365_v12 = vpop.eup %8364  ;;  %v1674_v10 = vmul.f32 %v8363_v30, %v8359_v62  ;;  %8384 = vrcp.f32 %v1658_v31 }
 0x3ad   :  { %v8367_v38 = vpop.eup %8366  ;;  %v1670_v25 = vmul.f32 %v8365_v12, %v10013_v4  ;;  %8386 = vtanh.f32 %v7787_v44 }
 0x3ae   :  { %v8369_v26 = vpop.eup %8368  ;;  %v1659_v49 = vadd.f32 1.0, %v8367_v38 }
 0x3af   :  { %v8371_v56 = vpop.eup %8370  ;;  %v10101_v28 = vadd.f32 %v1674_v10, %v1670_v25  ;;  %v1609_v0 = vadd.f32 1.0, %v8369_v26 }
 0x3b0   :  { %v8373_v47 = vpop.eup %8372 }
 0x3b1   :  { %v8375_v42 = vpop.eup %8374  ;;  %8388 = vtanh.f32 %v10101_v28  ;;  %v1675_v21 = vmul.f32 %v8373_v47, %v8361_v18 }
 0x3b2   :  { %v8377_v62 = vpop.eup %8376  ;;  %v1671_v52 = vmul.f32 %v8375_v42, %v10017_v6  ;;  %8390 = vrcp.f32 %v1609_v0 }
 0x3b3   :  { %v8379_v60 = vpop.eup %8378  ;;  %8392 = vpow2.f32 %v6357_v45  ;;  %v1660_v44 = vadd.f32 1.0, %v8377_v62 }
 0x3b4   :  { %v8381_v4 = vpop.eup %8380  ;;  %v10105_v30 = vadd.f32 %v1675_v21, %v1671_v52  ;;  %v1633_v12 = vadd.f32 1.0, %v8379_v60  ;;  %8394 = vrcp.f32 %v1659_v49 }
 0x3b5   :  { %v8383_v31 = vpop.eup %8382  ;;  %v1676_v57 = vmul.f32 %v8381_v4, %v8371_v56 }
 0x3b6   :  { %v1672_v10 = vmul.f32 %v8383_v31, %v10021_v24  ;;  %8396 = vrcp.f32 %v1633_v12  ;;  %v8385_v38 = vpop.eup %8384 }
 0x3b7   :  { %8398 = vtanh.f32 %v10105_v30  ;;  %v8387_v6 = vpop.eup %8386 }
 0x3b8   :  { %v10109_v18 = vadd.f32 %v1676_v57, %v1672_v10  ;;  %8400 = vrcp.f32 %v1660_v44 }
 0x3ba   :  { %8402 = vtanh.f32 %v10109_v18 }
 0x3bb   :  { %v8389_v25 = vpop.eup %8388 }
 0x3bc   :  { %v8391_v26 = vpop.eup %8390  ;;  %v10112_v0 = vmul.f32 %v8389_v25, %v8385_v38 }
 0x3bd   :  { %v8393_v45 = vpop.eup %8392  ;;  %v1677_v47 = vmul.f32 %v8391_v26, %v8387_v6 }
 0x3be   :  { %11417 = vst [vmem:[#allocation26_spill] sm:$0xff] %v10112_v0  ;;  %1755 = vmatmul.mubr.f32.vlgmr.msra.gmra.mrb[24].mxu0 %v10112_v0  ;;  %1844 = vmatmul.mubr.f32.vlgmr.msra.gmra.mrb[30].mxu1 %v10112_v0  ;;  %v8395_v24 = vpop.eup %8394  ;;  %v1661_v42 = vadd.f32 1.0, %v8393_v45 }
 0x3bf   :  { %1760 = vmatprep.mubr.f32.mxu0 %v11409_v16  ;;  %1849 = vmatprep.mubr.f32.mxu1 %v11409_v16 }
 0x3c0   :  { %v8397_v56 = vpop.eup %8396  ;;  %6832 = vmatpush1.bf16.msra.mxu0 %v9493_v14  ;;  %6864 = vmatpush1.bf16.msra.mxu1 %v9532_v34  ;;  %8404 = vrcp.f32 %v1661_v42 }
 0x3c1   :  { %v8399_v21 = vpop.eup %8398  ;;  %v1673_v49 = vmul.f32 %v8397_v56, %v10029_v63  ;;  %6834 = vmatprep.subr.bf16.mxu0 %v9514_v22  ;;  %6866 = vmatprep.subr.bf16.mxu1 %v9537_v37 }
 0x3c2   :  { %v10123_v62 = vmul.f32 %v8399_v21, %v8395_v24  ;;  %v8401_v60 = vpop.eup %8400 }
 0x3c3   :  { %v10125_v52 = vadd.f32 %v1677_v47, %v1673_v49 }
 0x3c4   :  { %11418 = vst [vmem:[#allocation27_spill] sm:$0xff] %v10123_v62  ;;  %1761 = vmatmul.mubr.f32.gmra.mrb[26].mxu0 %v10123_v62  ;;  %1850 = vmatmul.mubr.f32.gmra.mrb[32].mxu1 %v10123_v62  ;;  %v8403_v4 = vpop.eup %8402 }
 0x3c5   :  { %1766 = vmatprep.mubr.f32.mxu0 %v11409_v16  ;;  %1855 = vmatprep.mubr.f32.mxu1 %v11409_v16  ;;  %8406 = vtanh.f32 %v10125_v52  ;;  %v10132_v63 = vmul.f32 %v8403_v4, %v8401_v60 }
 0x3c6   :  { %6836 = vmatpush1.bf16.msra.mxu0 %v9518_v27  ;;  %6868 = vmatpush1.bf16.msra.mxu1 %v9555_v48 }
 0x3c7   :  { %11419 = vst [vmem:[#allocation28_spill] sm:$0xff] %v10132_v63  ;;  %6838 = vmatprep.subr.bf16.mxu0 %v9534_v35  ;;  %6870 = vmatprep.subr.bf16.mxu1 %v9560_v51 }
 0x3c8   :  { %1767 = vmatmul.mubr.f32.gmra.mrb[28].mxu0 %v10132_v63  ;;  %1856 = vmatmul.mubr.f32.gmra.mrb[34].mxu1 %v10132_v63 }
 0x3c9   :  { %1772 = vmatprep.mubr.f32.mxu0 %v11409_v16  ;;  %1861 = vmatprep.mubr.f32.mxu1 %v11409_v16 }
 0x3ca   :  { %6840 = vmatpush1.bf16.msra.mxu0 %v9540_v40  ;;  %6872 = vmatpush1.bf16.msra.mxu1 %v9576_v61  ;;  %v8405_v12 = vpop.eup %8404 }
 0x3cb   :  { %6842 = vmatprep.subr.bf16.mxu0 %v9557_v50  ;;  %6874 = vmatprep.subr.bf16.mxu1 %v9583_v2 }
 0x3ce   :  { %6844 = vmatpush1.bf16.msra.mxu0 %v9562_v53  ;;  %6876 = vmatpush1.bf16.msra.mxu1 %v9599_v15 }
 0x3cf   :  { %v8407_v31 = vpop.eup %8406  ;;  %6846 = vmatprep.subr.bf16.mxu0 %v9579_v1  ;;  %6878 = vmatprep.subr.bf16.mxu1 %v9606_v20 }
 0x3d0   :  { %v10150_v57 = vmul.f32 %v8407_v31, %v8405_v12 }
 0x3d2   :  { %11420 = vst [vmem:[#allocation29_spill] sm:$0xff] %v10150_v57  ;;  %1773 = vmatmul.mubr.f32.gmra.mrb[30].mxu0 %v10150_v57  ;;  %1862 = vmatmul.mubr.f32.gmra.mrb[36].mxu1 %v10150_v57 }
 0x3d3   :  { %6848 = vmatpush1.bf16.msra.mxu0 %v9585_v3  ;;  %6880 = vmatpush1.bf16.msra.mxu1 %v9620_v32 }
 0x3d4   :  { %6850 = vmatprep.subr.bf16.mxu0 %v9602_v19  ;;  %6882 = vmatprep.subr.bf16.mxu1 %v9627_v39 }
 0x3d5   :  { %2044 = vmatprep.mubr.f32.mxu0 %v11409_v16  ;;  %2133 = vmatprep.mubr.f32.mxu1 %v11409_v16 }
 0x3d7   :  { %6852 = vmatpush1.bf16.msra.mxu0 %v9608_v23  ;;  %6884 = vmatpush1.bf16.msra.mxu1 %v9640_v54 }
 0x3d8   :  { %6854 = vmatprep.subr.bf16.mxu0 %v9623_v33  ;;  %6886 = vmatprep.subr.bf16.mxu1 %v9647_v46 }
 0x3db   :  { %6856 = vmatpush1.bf16.msra.mxu0 %v9629_v41  ;;  %6888 = vmatpush1.bf16.msra.mxu1 %v9660_v5 }
 0x3dc   :  { %6858 = vmatprep.subr.bf16.mxu0 %v9643_v55  ;;  %6890 = vmatprep.subr.bf16.mxu1 %v9665_v59 }
 0x3df   :  { %6860 = vmatpush1.bf16.msra.mxu0 %v9649_v58  ;;  %6892 = vmatpush1.bf16.msra.mxu1 %v9676_v9 }
 0x3e0   :  { %6894 = vmatprep.subr.bf16.mxu0 %v9489_v11  ;;  %6926 = vmatprep.subr.bf16.mxu1 %v9496_v17 }
 0x491   :  { %v1756_v10 = vpop.f32.mrb[24].mxu0  ;;  %v1845_v44 = vpop.f32.mrb[30].mxu1 }
 0x492   :  { %v7719_v38 = vadd.f32 %v1756_v10, %v9896_v7  ;;  %v1758_v6 = vpop.f32.mrb[25].mxu0  ;;  %v1847_v25 = vpop.f32.mrb[31].mxu1 }
 0x493   :  { %v7720_v26 = vadd.f32 %v1758_v6, %v9900_v8  ;;  %v7790_v24 = vadd.f32 %v1847_v25, %v9918_v43 }
 0x494   :  { %v6358_v45 = vmul.f32 -1.442695, %v7719_v38 }
 0x495   :  { %v6362_v47 = vmul.f32 -1.442695, %v7720_v26  ;;  %v6366_v31 = vmul.f32 -1.442695, %v7790_v24 }
 0x496   :  { %8408 = vpow2.f32 %v6358_v45  ;;  %v7789_v45 = vadd.f32 %v1845_v44, %v9914_v36 }
 0x497   :  { %8410 = vpow2.f32 %v6362_v47  ;;  %v1762_v56 = vpop.f32.mrb[26].mxu0  ;;  %v1851_v42 = vpop.f32.mrb[32].mxu1 }
 0x498   :  { %v7721_v21 = vadd.f32 %v1762_v56, %v9896_v7  ;;  %v1764_v49 = vpop.f32.mrb[27].mxu0  ;;  %v1853_v60 = vpop.f32.mrb[33].mxu1 }
 0x499   :  { %v7722_v4 = vadd.f32 %v1764_v49, %v9900_v8  ;;  %v7792_v47 = vadd.f32 %v1853_v60, %v9918_v43 }
 0x49a   :  { %v6359_v12 = vmul.f32 -1.442695, %v7721_v21 }
 0x49b   :  { %v6363_v10 = vmul.f32 -1.442695, %v7722_v4  ;;  %v1768_v57 = vpop.f32.mrb[28].mxu0  ;;  %v1857_v63 = vpop.f32.mrb[34].mxu1 }
 0x49c   :  { %8412 = vpow2.f32 %v6359_v12  ;;  %v7723_v38 = vadd.f32 %v1768_v57, %v9896_v7  ;;  %v1770_v6 = vpop.f32.mrb[29].mxu0  ;;  %v1859_v26 = vpop.f32.mrb[35].mxu1  ;;  %v6367_v57 = vmul.f32 -1.442695, %v7792_v47  ;;  %v7793_v44 = vadd.f32 %v1857_v63, %v9914_v36 }
 0x49d   :  { %8414 = vpow2.f32 %v6363_v10  ;;  %v7724_v25 = vadd.f32 %v1770_v6, %v9900_v8  ;;  %v7791_v10 = vadd.f32 %v1851_v42, %v9914_v36  ;;  %v7794_v6 = vadd.f32 %v1859_v26, %v9918_v43 }
 0x49e   :  { %v6360_v56 = vmul.f32 -1.442695, %v7723_v38  ;;  %8416 = vpow2.f32 %v6366_v31 }
 0x49f   :  { %v6364_v49 = vmul.f32 -1.442695, %v7724_v25  ;;  %v6368_v47 = vmul.f32 -1.442695, %v7794_v6 }
 0x4a0   :  { %v8409_v21 = vpop.eup %8408  ;;  %8418 = vpow2.f32 %v6360_v56 }
 0x4a1   :  { %v8411_v24 = vpop.eup %8410  ;;  %v1896_v4 = vadd.f32 1.0, %v8409_v21  ;;  %8420 = vpow2.f32 %v6364_v49 }
 0x4a2   :  { %8422 = vtanh.f32 %v7789_v45  ;;  %v1920_v12 = vadd.f32 1.0, %v8411_v24 }
 0x4a3   :  { %8424 = vrcp.f32 %v1896_v4 }
 0x4a4   :  { %8426 = vrcp.f32 %v1920_v12 }
 0x4a5   :  { %v1774_v60 = vpop.f32.mrb[30].mxu0  ;;  %v1863_v38 = vpop.f32.mrb[36].mxu1  ;;  %8428 = vpow2.f32 %v6367_v57 }
 0x4a6   :  { %v8413_v31 = vpop.eup %8412  ;;  %v7725_v25 = vadd.f32 %v1774_v60, %v9896_v7  ;;  %v1776_v56 = vpop.f32.mrb[31].mxu0  ;;  %8430 = vtanh.f32 %v7791_v10 }
 0x4a7   :  { %v1865_v21 = vpop.f32.mrb[37].mxu1  ;;  %v8415_v49 = vpop.eup %8414  ;;  %v1897_v45 = vadd.f32 1.0, %v8413_v31  ;;  %8432 = vtanh.f32 %v7793_v44  ;;  %v7726_v26 = vadd.f32 %v1776_v56, %v9900_v8 }
 0x4a8   :  { %v1921_v24 = vadd.f32 1.0, %v8415_v49  ;;  %v6361_v42 = vmul.f32 -1.442695, %v7725_v25  ;;  %v8417_v4 = vpop.eup %8416  ;;  %v7796_v56 = vadd.f32 %v1865_v21, %v9918_v43 }
 0x4a9   :  { %8434 = vrcp.f32 %v1897_v45  ;;  %v6365_v0 = vmul.f32 -1.442695, %v7726_v26  ;;  %v1948_v31 = vadd.f32 1.0, %v8417_v4 }
 0x4aa   :  { %v8419_v63 = vpop.eup %8418  ;;  %8436 = vrcp.f32 %v1921_v24  ;;  %v7795_v24 = vadd.f32 %v1863_v38, %v9914_v36  ;;  %v6369_v4 = vmul.f32 -1.442695, %v7796_v56 }
 0x4ab   :  { %v8421_v12 = vpop.eup %8420  ;;  %v1898_v62 = vadd.f32 1.0, %v8419_v63  ;;  %8438 = vpow2.f32 %v6368_v47 }
 0x4ac   :  { %v8423_v57 = vpop.eup %8422  ;;  %v1922_v60 = vadd.f32 1.0, %v8421_v12  ;;  %8440 = vpow2.f32 %v6361_v42 }
 0x4ad   :  { %v8425_v13 = vpop.eup %8424  ;;  %8442 = vrcp.f32 %v1898_v62 }
 0x4ae   :  { %v8427_v10 = vpop.eup %8426  ;;  %v1964_v6 = vmul.f32 %v8425_v13, %v8423_v57  ;;  %8444 = vrcp.f32 %v1922_v60 }
 0x4af   :  { %v1960_v44 = vmul.f32 %v8427_v10, %v10101_v28  ;;  %v8429_v25 = vpop.eup %8428  ;;  %8446 = vpow2.f32 %v6365_v0 }
 0x4b0   :  { %v8431_v49 = vpop.eup %8430  ;;  %8448 = vrcp.f32 %v1948_v31  ;;  %v1949_v62 = vadd.f32 1.0, %v8429_v25 }
 0x4b1   :  { %v10188_v45 = vadd.f32 %v1964_v6, %v1960_v44  ;;  %v8433_v47 = vpop.eup %8432 }
 0x4b3   :  { %v8435_v42 = vpop.eup %8434  ;;  %8450 = vtanh.f32 %v10188_v45 }
 0x4b4   :  { %v8437_v13 = vpop.eup %8436  ;;  %v1965_v26 = vmul.f32 %v8435_v42, %v8431_v49  ;;  %8452 = vtanh.f32 %v7795_v24 }
 0x4b5   :  { %v8439_v63 = vpop.eup %8438  ;;  %v1961_v28 = vmul.f32 %v8437_v13, %v10105_v30  ;;  %8454 = vrcp.f32 %v1949_v62 }
 0x4b6   :  { %v8441_v0 = vpop.eup %8440  ;;  %8456 = vpow2.f32 %v6369_v4  ;;  %v1950_v31 = vadd.f32 1.0, %v8439_v63 }
 0x4b7   :  { %v8443_v21 = vpop.eup %8442  ;;  %v10193_v12 = vadd.f32 %v1965_v26, %v1961_v28  ;;  %v1899_v57 = vadd.f32 1.0, %v8441_v0 }
 0x4b8   :  { %v8445_v60 = vpop.eup %8444  ;;  %v1966_v10 = vmul.f32 %v8443_v21, %v8433_v47 }
 0x4b9   :  { %v1962_v38 = vmul.f32 %v8445_v60, %v10109_v18  ;;  %8458 = vrcp.f32 %v1899_v57  ;;  %v8447_v6 = vpop.eup %8446 }
 0x4ba   :  { %8460 = vtanh.f32 %v10193_v12  ;;  %v1923_v30 = vadd.f32 1.0, %v8447_v6  ;;  %v8449_v25 = vpop.eup %8448 }
 0x4bb   :  { %v10197_v44 = vadd.f32 %v1966_v10, %v1962_v38 }
 0x4bc   :  { %8462 = vrcp.f32 %v1923_v30 }
 0x4bd   :  { %v8451_v56 = vpop.eup %8450  ;;  %8464 = vrcp.f32 %v1950_v31 }
 0x4be   :  { %v10199_v49 = vmul.f32 %v8451_v56, %v8449_v25  ;;  %8466 = vtanh.f32 %v10197_v44  ;;  %v8453_v47 = vpop.eup %8452 }
 0x4bf   :  { %v8455_v18 = vpop.eup %8454 }
 0x4c0   :  { %11421 = vst [vmem:[#allocation30_spill] sm:$0xff] %v10199_v49  ;;  %2045 = vmatmul.mubr.f32.vlgmr.msra.gmra.mrb[32].mxu0 %v10199_v49  ;;  %2134 = vmatmul.mubr.f32.vlgmr.msra.gmra.mrb[38].mxu1 %v10199_v49  ;;  %v8457_v24 = vpop.eup %8456 }
 0x4c1   :  { %2050 = vmatprep.mubr.f32.mxu0 %v11409_v16  ;;  %2139 = vmatprep.mubr.f32.mxu1 %v11409_v16  ;;  %v1951_v63 = vadd.f32 1.0, %v8457_v24 }
 0x4c2   :  { %6896 = vmatpush1.bf16.msra.mxu0 %v9493_v14  ;;  %6928 = vmatpush1.bf16.msra.mxu1 %v9532_v34 }
 0x4c3   :  { %v8459_v42 = vpop.eup %8458  ;;  %6898 = vmatprep.subr.bf16.mxu0 %v9514_v22  ;;  %6930 = vmatprep.subr.bf16.mxu1 %v9537_v37  ;;  %8468 = vrcp.f32 %v1951_v63 }
 0x4c4   :  { %v8461_v62 = vpop.eup %8460  ;;  %v1967_v13 = vmul.f32 %v8459_v42, %v8453_v47 }
 0x4c5   :  { %v10210_v26 = vmul.f32 %v8461_v62, %v8455_v18 }
 0x4c6   :  { %6900 = vmatpush1.bf16.msra.mxu0 %v9518_v27  ;;  %6932 = vmatpush1.bf16.msra.mxu1 %v9555_v48  ;;  %v8463_v4 = vpop.eup %8462 }
 0x4c7   :  { %11422 = vst [vmem:[#allocation31_spill] sm:$0xff] %v10210_v26  ;;  %2051 = vmatmul.mubr.f32.gmra.mrb[34].mxu0 %v10210_v26  ;;  %2140 = vmatmul.mubr.f32.gmra.mrb[40].mxu1 %v10210_v26  ;;  %v8465_v28 = vpop.eup %8464  ;;  %v1963_v0 = vmul.f32 %v8463_v4, %v10125_v52 }
 0x4c8   :  { %2056 = vmatprep.mubr.f32.mxu0 %v11409_v16  ;;  %2145 = vmatprep.mubr.f32.mxu1 %v11409_v16  ;;  %v8467_v21 = vpop.eup %8466 }
 0x4c9   :  { %6902 = vmatprep.subr.bf16.mxu0 %v9534_v35  ;;  %6934 = vmatprep.subr.bf16.mxu1 %v9560_v51  ;;  %v10221_v57 = vadd.f32 %v1967_v13, %v1963_v0  ;;  %v10223_v60 = vmul.f32 %v8467_v21, %v8465_v28 }
 0x4ca   :  { %6904 = vmatpush1.bf16.msra.mxu0 %v9540_v40  ;;  %6936 = vmatpush1.bf16.msra.mxu1 %v9576_v61 }
 0x4cb   :  { %11423 = vst [vmem:[#allocation32_spill] sm:$0xff] %v10223_v60  ;;  %6906 = vmatprep.subr.bf16.mxu0 %v9557_v50  ;;  %6938 = vmatprep.subr.bf16.mxu1 %v9583_v2  ;;  %8470 = vtanh.f32 %v10221_v57 }
 0x4cc   :  { %2057 = vmatmul.mubr.f32.gmra.mrb[36].mxu0 %v10223_v60  ;;  %2146 = vmatmul.mubr.f32.gmra.mrb[42].mxu1 %v10223_v60 }
 0x4cd   :  { %2062 = vmatprep.mubr.f32.mxu0 %v11409_v16  ;;  %2151 = vmatprep.mubr.f32.mxu1 %v11409_v16  ;;  %v8469_v52 = vpop.eup %8468 }
 0x4ce   :  { %6908 = vmatpush1.bf16.msra.mxu0 %v9562_v53  ;;  %6940 = vmatpush1.bf16.msra.mxu1 %v9599_v15 }
 0x4cf   :  { %6910 = vmatprep.subr.bf16.mxu0 %v9579_v1  ;;  %6942 = vmatprep.subr.bf16.mxu1 %v9606_v20 }
 0x4d2   :  { %6912 = vmatpush1.bf16.msra.mxu0 %v9585_v3  ;;  %6944 = vmatpush1.bf16.msra.mxu1 %v9620_v32 }
 0x4d3   :  { %6914 = vmatprep.subr.bf16.mxu0 %v9602_v19  ;;  %6946 = vmatprep.subr.bf16.mxu1 %v9627_v39 }
 0x4d5   :  { %v8471_v10 = vpop.eup %8470 }
 0x4d6   :  { %6916 = vmatpush1.bf16.msra.mxu0 %v9608_v23  ;;  %6948 = vmatpush1.bf16.msra.mxu1 %v9640_v54  ;;  %v10244_v38 = vmul.f32 %v8471_v10, %v8469_v52 }
 0x4d7   :  { %6918 = vmatprep.subr.bf16.mxu0 %v9623_v33  ;;  %6950 = vmatprep.subr.bf16.mxu1 %v9647_v46 }
 0x4d8   :  { %11424 = vst [vmem:[#allocation33_spill] sm:$0xff] %v10244_v38  ;;  %2063 = vmatmul.mubr.f32.gmra.mrb[38].mxu0 %v10244_v38  ;;  %2152 = vmatmul.mubr.f32.gmra.mrb[44].mxu1 %v10244_v38 }
 0x4d9   :  { %2334 = vmatprep.mubr.f32.mxu0 %v11409_v16  ;;  %2423 = vmatprep.mubr.f32.mxu1 %v11409_v16 }
 0x4da   :  { %6920 = vmatpush1.bf16.msra.mxu0 %v9629_v41  ;;  %6952 = vmatpush1.bf16.msra.mxu1 %v9660_v5 }
 0x4db   :  { %6922 = vmatprep.subr.bf16.mxu0 %v9643_v55  ;;  %6954 = vmatprep.subr.bf16.mxu1 %v9665_v59 }
 0x4de   :  { %6924 = vmatpush1.bf16.msra.mxu0 %v9649_v58  ;;  %6956 = vmatpush1.bf16.msra.mxu1 %v9676_v9 }
 0x4df   :  { %6958 = vmatprep.subr.bf16.mxu0 %v9489_v11  ;;  %6990 = vmatprep.subr.bf16.mxu1 %v9496_v17 }
 0x593   :  { %v2046_v6 = vpop.f32.mrb[32].mxu0  ;;  %v2135_v31 = vpop.f32.mrb[38].mxu1 }
 0x594   :  { %v7727_v30 = vadd.f32 %v2046_v6, %v9896_v7  ;;  %v2048_v25 = vpop.f32.mrb[33].mxu0  ;;  %v2137_v56 = vpop.f32.mrb[39].mxu1  ;;  %v7797_v52 = vadd.f32 %v2135_v31, %v9914_v36 }
 0x595   :  { %v7728_v47 = vadd.f32 %v2048_v25, %v9900_v8  ;;  %v7798_v13 = vadd.f32 %v2137_v56, %v9918_v43 }
 0x596   :  { %v6370_v18 = vmul.f32 -1.442695, %v7727_v30 }
 0x597   :  { %v6374_v24 = vmul.f32 -1.442695, %v7728_v47  ;;  %v6378_v6 = vmul.f32 -1.442695, %v7798_v13 }
 0x598   :  { %8472 = vpow2.f32 %v6370_v18 }
 0x599   :  { %8474 = vpow2.f32 %v6374_v24 }
 0x59a   :  { %v2052_v42 = vpop.f32.mrb[34].mxu0  ;;  %v2141_v62 = vpop.f32.mrb[40].mxu1 }
 0x59b   :  { %v7729_v4 = vadd.f32 %v2052_v42, %v9896_v7  ;;  %v2054_v63 = vpop.f32.mrb[35].mxu0  ;;  %v2143_v28 = vpop.f32.mrb[41].mxu1 }
 0x59c   :  { %v7730_v0 = vadd.f32 %v2054_v63, %v9900_v8  ;;  %v7800_v38 = vadd.f32 %v2143_v28, %v9918_v43 }
 0x59d   :  { %v6371_v21 = vmul.f32 -1.442695, %v7729_v4 }
 0x59e   :  { %v6375_v10 = vmul.f32 -1.442695, %v7730_v0  ;;  %v6379_v0 = vmul.f32 -1.442695, %v7800_v38 }
 0x59f   :  { %8476 = vpow2.f32 %v6371_v21  ;;  %v2058_v30 = vpop.f32.mrb[36].mxu0  ;;  %v2147_v25 = vpop.f32.mrb[42].mxu1  ;;  %v7799_v21 = vadd.f32 %v2141_v62, %v9914_v36 }
 0x5a0   :  { %8478 = vpow2.f32 %v6375_v10  ;;  %v7731_v47 = vadd.f32 %v2058_v30, %v9896_v7  ;;  %v2060_v18 = vpop.f32.mrb[37].mxu0  ;;  %v2149_v24 = vpop.f32.mrb[43].mxu1 }
 0x5a1   :  { %v7732_v56 = vadd.f32 %v2060_v18, %v9900_v8  ;;  %8480 = vtanh.f32 %v7797_v52  ;;  %v7802_v10 = vadd.f32 %v2149_v24, %v9918_v43 }
 0x5a2   :  { %v8473_v42 = vpop.eup %8472  ;;  %v6372_v63 = vmul.f32 -1.442695, %v7731_v47  ;;  %8482 = vpow2.f32 %v6378_v6  ;;  %v7801_v47 = vadd.f32 %v2147_v25, %v9914_v36 }
 0x5a3   :  { %v8475_v4 = vpop.eup %8474  ;;  %v2186_v60 = vadd.f32 1.0, %v8473_v42  ;;  %v6376_v13 = vmul.f32 -1.442695, %v7732_v56  ;;  %v6380_v42 = vmul.f32 -1.442695, %v7802_v10 }
 0x5a4   :  { %v2210_v31 = vadd.f32 1.0, %v8475_v4  ;;  %8484 = vpow2.f32 %v6372_v63 }
 0x5a5   :  { %8486 = vrcp.f32 %v2186_v60 }
 0x5a6   :  { %8488 = vrcp.f32 %v2210_v31 }
 0x5a7   :  { %8490 = vpow2.f32 %v6376_v13 }
 0x5a8   :  { %8492 = vpow2.f32 %v6379_v0 }
 0x5a9   :  { %v8477_v30 = vpop.eup %8476  ;;  %8494 = vtanh.f32 %v7799_v21 }
 0x5aa   :  { %v8479_v18 = vpop.eup %8478  ;;  %v2187_v52 = vadd.f32 1.0, %v8477_v30 }
 0x5ab   :  { %v2211_v28 = vadd.f32 1.0, %v8479_v18  ;;  %v8481_v6 = vpop.eup %8480  ;;  %v2064_v56 = vpop.f32.mrb[38].mxu0 }
 0x5ac   :  { %8496 = vrcp.f32 %v2187_v52  ;;  %v2153_v60 = vpop.f32.mrb[44].mxu1  ;;  %v8483_v63 = vpop.eup %8482  ;;  %v7733_v38 = vadd.f32 %v2064_v56, %v9896_v7 }
 0x5ad   :  { %8498 = vrcp.f32 %v2211_v28  ;;  %v2066_v62 = vpop.f32.mrb[39].mxu0  ;;  %v2155_v4 = vpop.f32.mrb[45].mxu1  ;;  %v2238_v18 = vadd.f32 1.0, %v8483_v63 }
 0x5ae   :  { %v8485_v24 = vpop.eup %8484  ;;  %v7734_v31 = vadd.f32 %v2066_v62, %v9900_v8  ;;  %8500 = vtanh.f32 %v7801_v47  ;;  %v6373_v21 = vmul.f32 -1.442695, %v7733_v38  ;;  %v7804_v47 = vadd.f32 %v2155_v4, %v9918_v43 }
 0x5af   :  { %v8487_v13 = vpop.eup %8486  ;;  %v2188_v0 = vadd.f32 1.0, %v8485_v24  ;;  %8502 = vpow2.f32 %v6380_v42 }
 0x5b0   :  { %v8489_v30 = vpop.eup %8488  ;;  %v2254_v25 = vmul.f32 %v8487_v13, %v8481_v6  ;;  %v6377_v10 = vmul.f32 -1.442695, %v7734_v31  ;;  %v6381_v31 = vmul.f32 -1.442695, %v7804_v47 }
 0x5b1   :  { %v2250_v52 = vmul.f32 %v8489_v30, %v10188_v45  ;;  %8504 = vrcp.f32 %v2188_v0  ;;  %v8491_v28 = vpop.eup %8490 }
 0x5b2   :  { %8506 = vpow2.f32 %v6373_v21  ;;  %v2212_v26 = vadd.f32 1.0, %v8491_v28  ;;  %v8493_v49 = vpop.eup %8492  ;;  %v7803_v21 = vadd.f32 %v2153_v60, %v9914_v36 }
 0x5b3   :  { %v10275_v56 = vadd.f32 %v2254_v25, %v2250_v52  ;;  %8508 = vpow2.f32 %v6377_v10  ;;  %v8495_v62 = vpop.eup %8494  ;;  %v2239_v38 = vadd.f32 1.0, %v8493_v49 }
 0x5b4   :  { %8510 = vrcp.f32 %v2238_v18 }
 0x5b5   :  { %8512 = vtanh.f32 %v10275_v56 }
 0x5b6   :  { %v8497_v6 = vpop.eup %8496  ;;  %8514 = vrcp.f32 %v2212_v26 }
 0x5b7   :  { %v8499_v42 = vpop.eup %8498  ;;  %v2255_v63 = vmul.f32 %v8497_v6, %v8495_v62  ;;  %8516 = vrcp.f32 %v2239_v38 }
 0x5b8   :  { %v2251_v45 = vmul.f32 %v8499_v42, %v10193_v12  ;;  %v8501_v24 = vpop.eup %8500 }
 0x5b9   :  { %v8503_v13 = vpop.eup %8502 }
 0x5ba   :  { %v10280_v0 = vadd.f32 %v2255_v63, %v2251_v45  ;;  %v2240_v28 = vadd.f32 1.0, %v8503_v13 }
 0x5bb   :  { %v8505_v30 = vpop.eup %8504 }
 0x5bc   :  { %v8507_v25 = vpop.eup %8506  ;;  %v2256_v18 = vmul.f32 %v8505_v30, %v8501_v24  ;;  %8518 = vtanh.f32 %v10280_v0 }
 0x5bd   :  { %v8509_v4 = vpop.eup %8508  ;;  %v2189_v26 = vadd.f32 1.0, %v8507_v25  ;;  %8520 = vpow2.f32 %v6381_v31 }
 0x5be   :  { %v8511_v10 = vpop.eup %8510  ;;  %8522 = vtanh.f32 %v7803_v21  ;;  %v2213_v49 = vadd.f32 1.0, %v8509_v4 }
 0x5bf   :  { %v8513_v12 = vpop.eup %8512  ;;  %8524 = vrcp.f32 %v2189_v26 }
 0x5c0   :  { %v8515_v52 = vpop.eup %8514  ;;  %8526 = vrcp.f32 %v2213_v49  ;;  %v10284_v62 = vmul.f32 %v8513_v12, %v8511_v10 }
 0x5c1   :  { %v2252_v60 = vmul.f32 %v8515_v52, %v10197_v44  ;;  %8528 = vrcp.f32 %v2240_v28  ;;  %v8517_v6 = vpop.eup %8516 }
 0x5c2   :  { %2335 = vmatmul.mubr.f32.vlgmr.msra.gmra.mrb[40].mxu0 %v10284_v62  ;;  %2424 = vmatmul.mubr.f32.vlgmr.msra.gmra.mrb[46].mxu1 %v10284_v62 }
 0x5c3   :  { %v10289_v47 = vadd.f32 %v2256_v18, %v2252_v60  ;;  %2340 = vmatprep.mubr.f32.mxu0 %v11409_v16  ;;  %2429 = vmatprep.mubr.f32.mxu1 %v11409_v16 }
 0x5c4   :  { %6960 = vmatpush1.bf16.msra.mxu0 %v9493_v14  ;;  %6992 = vmatpush1.bf16.msra.mxu1 %v9532_v34 }
 0x5c5   :  { %8530 = vtanh.f32 %v10289_v47  ;;  %6962 = vmatprep.subr.bf16.mxu0 %v9514_v22  ;;  %6994 = vmatprep.subr.bf16.mxu1 %v9537_v37 }
 0x5c6   :  { %v8519_v44 = vpop.eup %8518 }
 0x5c7   :  { %v8521_v42 = vpop.eup %8520  ;;  %v10298_v63 = vmul.f32 %v8519_v44, %v8517_v6 }
 0x5c8   :  { %v8523_v38 = vpop.eup %8522  ;;  %6964 = vmatpush1.bf16.msra.mxu0 %v9518_v27  ;;  %6996 = vmatpush1.bf16.msra.mxu1 %v9555_v48  ;;  %v2241_v13 = vadd.f32 1.0, %v8521_v42 }
 0x5c9   :  { %v8525_v45 = vpop.eup %8524  ;;  %2341 = vmatmul.mubr.f32.gmra.mrb[42].mxu0 %v10298_v63  ;;  %2430 = vmatmul.mubr.f32.gmra.mrb[48].mxu1 %v10298_v63 }
 0x5ca   :  { %v8527_v24 = vpop.eup %8526  ;;  %v2257_v31 = vmul.f32 %v8525_v45, %v8523_v38  ;;  %2346 = vmatprep.mubr.f32.mxu0 %v11409_v16  ;;  %2435 = vmatprep.mubr.f32.mxu1 %v11409_v16  ;;  %8532 = vrcp.f32 %v2241_v13 }
 0x5cb   :  { %v2253_v21 = vmul.f32 %v8527_v24, %v10221_v57  ;;  %6966 = vmatprep.subr.bf16.mxu0 %v9534_v35  ;;  %6998 = vmatprep.subr.bf16.mxu1 %v9560_v51  ;;  %v8529_v25 = vpop.eup %8528 }
 0x5cc   :  { %6968 = vmatpush1.bf16.msra.mxu0 %v9540_v40  ;;  %7000 = vmatpush1.bf16.msra.mxu1 %v9576_v61 }
 0x5cd   :  { %v10311_v30 = vadd.f32 %v2257_v31, %v2253_v21  ;;  %6970 = vmatprep.subr.bf16.mxu0 %v9557_v50  ;;  %7002 = vmatprep.subr.bf16.mxu1 %v9583_v2 }
 0x5cf   :  { %v8531_v18 = vpop.eup %8530  ;;  %8534 = vtanh.f32 %v10311_v30 }
 0x5d0   :  { %v10316_v57 = vmul.f32 %v8531_v18, %v8529_v25  ;;  %6972 = vmatpush1.bf16.msra.mxu0 %v9562_v53  ;;  %7004 = vmatpush1.bf16.msra.mxu1 %v9599_v15 }
 0x5d1   :  { %6974 = vmatprep.subr.bf16.mxu0 %v9579_v1  ;;  %7006 = vmatprep.subr.bf16.mxu1 %v9606_v20 }
 0x5d2   :  { %11425 = vst [vmem:[#allocation34_spill] sm:$0xff] %v10316_v57  ;;  %2347 = vmatmul.mubr.f32.gmra.mrb[44].mxu0 %v10316_v57  ;;  %2436 = vmatmul.mubr.f32.gmra.mrb[50].mxu1 %v10316_v57 }
 0x5d3   :  { %2352 = vmatprep.mubr.f32.mxu0 %v11409_v16  ;;  %2441 = vmatprep.mubr.f32.mxu1 %v11409_v16 }
 0x5d4   :  { %6976 = vmatpush1.bf16.msra.mxu0 %v9585_v3  ;;  %7008 = vmatpush1.bf16.msra.mxu1 %v9620_v32  ;;  %v8533_v4 = vpop.eup %8532 }
 0x5d5   :  { %6978 = vmatprep.subr.bf16.mxu0 %v9602_v19  ;;  %7010 = vmatprep.subr.bf16.mxu1 %v9627_v39 }
 0x5d8   :  { %6980 = vmatpush1.bf16.msra.mxu0 %v9608_v23  ;;  %7012 = vmatpush1.bf16.msra.mxu1 %v9640_v54 }
 0x5d9   :  { %v8535_v26 = vpop.eup %8534  ;;  %6982 = vmatprep.subr.bf16.mxu0 %v9623_v33  ;;  %7014 = vmatprep.subr.bf16.mxu1 %v9647_v46 }
 0x5da   :  { %v10334_v10 = vmul.f32 %v8535_v26, %v8533_v4 }
 0x5dc   :  { %11426 = vst [vmem:[#allocation35_spill] sm:$0xff] %v10334_v10  ;;  %2353 = vmatmul.mubr.f32.gmra.mrb[46].mxu0 %v10334_v10  ;;  %2442 = vmatmul.mubr.f32.gmra.mrb[52].mxu1 %v10334_v10 }
 0x5dd   :  { %6984 = vmatpush1.bf16.msra.mxu0 %v9629_v41  ;;  %7016 = vmatpush1.bf16.msra.mxu1 %v9660_v5 }
 0x5de   :  { %6986 = vmatprep.subr.bf16.mxu0 %v9643_v55  ;;  %7018 = vmatprep.subr.bf16.mxu1 %v9665_v59 }
 0x5df   :  { %2624 = vmatprep.mubr.f32.mxu0 %v11409_v16  ;;  %2713 = vmatprep.mubr.f32.mxu1 %v11409_v16 }
 0x5e1   :  { %6988 = vmatpush1.bf16.msra.mxu0 %v9649_v58  ;;  %7020 = vmatpush1.bf16.msra.mxu1 %v9676_v9 }
 0x5e2   :  { %7022 = vmatprep.subr.bf16.mxu0 %v9489_v11  ;;  %7054 = vmatprep.subr.bf16.mxu1 %v9496_v17 }
 0x695   :  { %v2336_v49 = vpop.f32.mrb[40].mxu0  ;;  %v2425_v12 = vpop.f32.mrb[46].mxu1 }
 0x696   :  { %v7735_v52 = vadd.f32 %v2336_v49, %v9896_v7  ;;  %v2338_v28 = vpop.f32.mrb[41].mxu0  ;;  %v2427_v60 = vpop.f32.mrb[47].mxu1  ;;  %v7805_v4 = vadd.f32 %v2425_v12, %v9914_v36 }
 0x697   :  { %v7736_v6 = vadd.f32 %v2338_v28, %v9900_v8  ;;  %v7806_v42 = vadd.f32 %v2427_v60, %v9918_v43 }
 0x698   :  { %v6382_v44 = vmul.f32 -1.442695, %v7735_v52 }
 0x699   :  { %v6386_v38 = vmul.f32 -1.442695, %v7736_v6  ;;  %v6390_v45 = vmul.f32 -1.442695, %v7806_v42 }
 0x69a   :  { %8536 = vpow2.f32 %v6382_v44 }
 0x69b   :  { %8538 = vpow2.f32 %v6386_v38 }
 0x69c   :  { %v2342_v24 = vpop.f32.mrb[42].mxu0  ;;  %v2431_v31 = vpop.f32.mrb[48].mxu1  ;;  %8540 = vpow2.f32 %v6390_v45 }
 0x69d   :  { %v7737_v11 = vadd.f32 %v2342_v24, %v9896_v7  ;;  %v2344_v17 = vpop.f32.mrb[43].mxu0  ;;  %v2433_v13 = vpop.f32.mrb[49].mxu1 }
 0x69e   :  { %v7738_v21 = vadd.f32 %v2344_v17, %v9900_v8  ;;  %v7808_v26 = vadd.f32 %v2433_v13, %v9918_v43  ;;  %v7807_v17 = vadd.f32 %v2431_v31, %v9914_v36 }
 0x69f   :  { %v6383_v25 = vmul.f32 -1.442695, %v7737_v11 }
 0x6a0   :  { %v6387_v18 = vmul.f32 -1.442695, %v7738_v21  ;;  %v6391_v45 = vmul.f32 -1.442695, %v7808_v26 }
 0x6a1   :  { %8542 = vpow2.f32 %v6383_v25 }
 0x6a2   :  { %8544 = vpow2.f32 %v6387_v18 }
 0x6a3   :  { %8546 = vtanh.f32 %v7805_v4 }
 0x6a4   :  { %v8537_v49 = vpop.eup %8536 }
 0x6a5   :  { %v8539_v52 = vpop.eup %8538  ;;  %v2476_v28 = vadd.f32 1.0, %v8537_v49  ;;  %v2348_v60 = vpop.f32.mrb[44].mxu0 }
 0x6a6   :  { %v2437_v6 = vpop.f32.mrb[50].mxu1  ;;  %v2500_v44 = vadd.f32 1.0, %v8539_v52  ;;  %v7739_v42 = vadd.f32 %v2348_v60, %v9896_v7  ;;  %v2350_v38 = vpop.f32.mrb[45].mxu0 }
 0x6a7   :  { %v2439_v24 = vpop.f32.mrb[51].mxu1  ;;  %8548 = vrcp.f32 %v2476_v28  ;;  %v7740_v11 = vadd.f32 %v2350_v38, %v9900_v8  ;;  %v8541_v21 = vpop.eup %8540  ;;  %v7809_v28 = vadd.f32 %v2437_v6, %v9914_v36 }
 0x6a8   :  { %8550 = vrcp.f32 %v2500_v44  ;;  %v6384_v12 = vmul.f32 -1.442695, %v7739_v42  ;;  %v2528_v52 = vadd.f32 1.0, %v8541_v21  ;;  %v7810_v26 = vadd.f32 %v2439_v24, %v9918_v43 }
 0x6a9   :  { %v6388_v13 = vmul.f32 -1.442695, %v7740_v11 }
 0x6aa   :  { %8552 = vpow2.f32 %v6384_v12  ;;  %v6392_v21 = vmul.f32 -1.442695, %v7810_v26 }
 0x6ab   :  { %v8543_v25 = vpop.eup %8542  ;;  %8554 = vpow2.f32 %v6391_v45 }
 0x6ac   :  { %v8545_v18 = vpop.eup %8544  ;;  %v2477_v4 = vadd.f32 1.0, %v8543_v25  ;;  %8556 = vpow2.f32 %v6388_v13 }
 0x6ad   :  { %8558 = vtanh.f32 %v7807_v17  ;;  %v2501_v49 = vadd.f32 1.0, %v8545_v18  ;;  %v8547_v31 = vpop.eup %8546 }
 0x6ae   :  { %8560 = vrcp.f32 %v2477_v4 }
 0x6af   :  { %8562 = vrcp.f32 %v2501_v49  ;;  %v2354_v60 = vpop.f32.mrb[46].mxu0  ;;  %v2443_v44 = vpop.f32.mrb[52].mxu1 }
 0x6b0   :  { %v7741_v42 = vadd.f32 %v2354_v60, %v9896_v7  ;;  %v2356_v38 = vpop.f32.mrb[47].mxu0  ;;  %v2445_v11 = vpop.f32.mrb[53].mxu1  ;;  %8564 = vrcp.f32 %v2528_v52 }
 0x6b1   :  { %v8549_v45 = vpop.eup %8548  ;;  %v7742_v12 = vadd.f32 %v2356_v38, %v9900_v8  ;;  %8566 = vtanh.f32 %v7809_v28  ;;  %v7812_v52 = vadd.f32 %v2445_v11, %v9918_v43 }
 0x6b2   :  { %v8551_v13 = vpop.eup %8550  ;;  %v2544_v17 = vmul.f32 %v8549_v45, %v8547_v31  ;;  %v6385_v25 = vmul.f32 -1.442695, %v7741_v42 }
 0x6b3   :  { %v2540_v24 = vmul.f32 %v8551_v13, %v10275_v56  ;;  %v6389_v18 = vmul.f32 -1.442695, %v7742_v12  ;;  %v6393_v45 = vmul.f32 -1.442695, %v7812_v52 }
 0x6b4   :  { %v8553_v6 = vpop.eup %8552  ;;  %8568 = vpow2.f32 %v6385_v25 }
 0x6b5   :  { %v8555_v4 = vpop.eup %8554  ;;  %v10363_v49 = vadd.f32 %v2544_v17, %v2540_v24  ;;  %v2478_v60 = vadd.f32 1.0, %v8553_v6  ;;  %8570 = vpow2.f32 %v6389_v18  ;;  %v7811_v17 = vadd.f32 %v2443_v44, %v9914_v36 }
 0x6b6   :  { %v8557_v10 = vpop.eup %8556  ;;  %8572 = vpow2.f32 %v6392_v21  ;;  %v2529_v42 = vadd.f32 1.0, %v8555_v4 }
 0x6b7   :  { %v8559_v57 = vpop.eup %8558  ;;  %8574 = vtanh.f32 %v10363_v49  ;;  %v2502_v31 = vadd.f32 1.0, %v8557_v10 }
 0x6b8   :  { %v8561_v26 = vpop.eup %8560  ;;  %8576 = vrcp.f32 %v2478_v60 }
 0x6b9   :  { %v8563_v56 = vpop.eup %8562  ;;  %v2545_v28 = vmul.f32 %v8561_v26, %v8559_v57  ;;  %8578 = vrcp.f32 %v2502_v31 }
 0x6ba   :  { %v2541_v38 = vmul.f32 %v8563_v56, %v10280_v0  ;;  %v8565_v12 = vpop.eup %8564  ;;  %8580 = vrcp.f32 %v2529_v42 }
 0x6bb   :  { %v8567_v21 = vpop.eup %8566 }
 0x6bc   :  { %v10368_v13 = vadd.f32 %v2545_v28, %v2541_v38 }
 0x6be   :  { %v8569_v25 = vpop.eup %8568  ;;  %8582 = vtanh.f32 %v10368_v13 }
 0x6bf   :  { %v8571_v10 = vpop.eup %8570  ;;  %v2479_v11 = vadd.f32 1.0, %v8569_v25  ;;  %8584 = vpow2.f32 %v6393_v45 }
 0x6c0   :  { %v8573_v24 = vpop.eup %8572  ;;  %8586 = vtanh.f32 %v7811_v17  ;;  %v2503_v57 = vadd.f32 1.0, %v8571_v10 }
 0x6c1   :  { %v8575_v18 = vpop.eup %8574  ;;  %8588 = vrcp.f32 %v2479_v11  ;;  %v2530_v44 = vadd.f32 1.0, %v8573_v24 }
 0x6c2   :  { %v8577_v0 = vpop.eup %8576  ;;  %8590 = vrcp.f32 %v2503_v57  ;;  %v10372_v6 = vmul.f32 %v8575_v18, %v8565_v12 }
 0x6c3   :  { %v8579_v4 = vpop.eup %8578  ;;  %v2546_v60 = vmul.f32 %v8577_v0, %v8567_v21  ;;  %8592 = vrcp.f32 %v2530_v44 }
 0x6c4   :  { %v2542_v31 = vmul.f32 %v8579_v4, %v10289_v47  ;;  %2625 = vmatmul.mubr.f32.vlgmr.msra.gmra.mrb[48].mxu0 %v10372_v6  ;;  %2714 = vmatmul.mubr.f32.vlgmr.msra.gmra.mrb[54].mxu1 %v10372_v6  ;;  %v8581_v26 = vpop.eup %8580 }
 0x6c5   :  { %2630 = vmatprep.mubr.f32.mxu0 %v11409_v16  ;;  %2719 = vmatprep.mubr.f32.mxu1 %v11409_v16 }
 0x6c6   :  { %v10379_v52 = vadd.f32 %v2546_v60, %v2542_v31  ;;  %7024 = vmatpush1.bf16.msra.mxu0 %v9493_v14  ;;  %7056 = vmatpush1.bf16.msra.mxu1 %v9532_v34 }
 0x6c7   :  { %7026 = vmatprep.subr.bf16.mxu0 %v9514_v22  ;;  %7058 = vmatprep.subr.bf16.mxu1 %v9537_v37 }
 0x6c8   :  { %v8583_v47 = vpop.eup %8582  ;;  %8594 = vtanh.f32 %v10379_v52 }
 0x6c9   :  { %v8585_v56 = vpop.eup %8584  ;;  %v10386_v28 = vmul.f32 %v8583_v47, %v8581_v26 }
 0x6ca   :  { %v8587_v42 = vpop.eup %8586  ;;  %7028 = vmatpush1.bf16.msra.mxu0 %v9518_v27  ;;  %7060 = vmatpush1.bf16.msra.mxu1 %v9555_v48  ;;  %v2531_v38 = vadd.f32 1.0, %v8585_v56 }
 0x6cb   :  { %v8589_v14 = vpop.eup %8588  ;;  %2631 = vmatmul.mubr.f32.gmra.mrb[50].mxu0 %v10386_v28  ;;  %2720 = vmatmul.mubr.f32.gmra.mrb[56].mxu1 %v10386_v28 }
 0x6cc   :  { %v8591_v34 = vpop.eup %8590  ;;  %v2547_v22 = vmul.f32 %v8589_v14, %v8587_v42  ;;  %2636 = vmatprep.mubr.f32.mxu0 %v11409_v16  ;;  %2725 = vmatprep.mubr.f32.mxu1 %v11409_v16  ;;  %8596 = vrcp.f32 %v2531_v38 }
 0x6cd   :  { %v2543_v37 = vmul.f32 %v8591_v34, %v10311_v30  ;;  %7030 = vmatprep.subr.bf16.mxu0 %v9534_v35  ;;  %7062 = vmatprep.subr.bf16.mxu1 %v9560_v51  ;;  %v8593_v48 = vpop.eup %8592 }
 0x6ce   :  { %7032 = vmatpush1.bf16.msra.mxu0 %v9540_v40  ;;  %7064 = vmatpush1.bf16.msra.mxu1 %v9576_v61  ;;  %v3145_v61 = vld [vmem:[#allocation5 + $0x28] sm:$0xff] }
 0x6cf   :  { %v10399_v27 = vadd.f32 %v2547_v22, %v2543_v37  ;;  %7034 = vmatprep.subr.bf16.mxu0 %v9557_v50  ;;  %7066 = vmatprep.subr.bf16.mxu1 %v9583_v2 }
 0x6d1   :  { %8598 = vtanh.f32 %v10399_v27 }
 0x6d2   :  { %v8595_v45 = vpop.eup %8594  ;;  %7036 = vmatpush1.bf16.msra.mxu0 %v9562_v53  ;;  %7068 = vmatpush1.bf16.msra.mxu1 %v9599_v15  ;;  %v3141_v53 = vld [vmem:[#allocation5 + $0x8] sm:$0xff] }
 0x6d3   :  { %v10406_v35 = vmul.f32 %v8595_v45, %v8593_v48  ;;  %7038 = vmatprep.subr.bf16.mxu0 %v9579_v1  ;;  %7070 = vmatprep.subr.bf16.mxu1 %v9606_v20  ;;  %v3143_v1 = vld [vmem:[#allocation5 + $0x18] sm:$0xff]  ;;  %v7085_v2 = vpack.c.bf16 %v3145_v61, %v3141_v53 }
 0x6d5   :  { %2637 = vmatmul.mubr.f32.gmra.mrb[52].mxu0 %v10406_v35  ;;  %2726 = vmatmul.mubr.f32.gmra.mrb[58].mxu1 %v10406_v35 }
 0x6d6   :  { %2642 = vmatprep.mubr.f32.mxu0 %v11409_v16  ;;  %2731 = vmatprep.mubr.f32.mxu1 %v11409_v16  ;;  %v8597_v40 = vpop.eup %8596 }
 0x6d7   :  { %7040 = vmatpush1.bf16.msra.mxu0 %v9585_v3  ;;  %7072 = vmatpush1.bf16.msra.mxu1 %v9620_v32  ;;  %v3147_v3 = vld [vmem:[#allocation5 + $0x38] sm:$0xff] }
 0x6d8   :  { %7042 = vmatprep.subr.bf16.mxu0 %v9602_v19  ;;  %7074 = vmatprep.subr.bf16.mxu1 %v9627_v39  ;;  %v7117_v15 = vpack.c.bf16 %v3147_v3, %v3143_v1 }
 0x6db   :  { %v8599_v50 = vpop.eup %8598  ;;  %7044 = vmatpush1.bf16.msra.mxu0 %v9608_v23  ;;  %7076 = vmatpush1.bf16.msra.mxu1 %v9640_v54 }
 0x6dc   :  { %v10420_v51 = vmul.f32 %v8599_v50, %v8597_v40  ;;  %7046 = vmatprep.subr.bf16.mxu0 %v9623_v33  ;;  %7078 = vmatprep.subr.bf16.mxu1 %v9647_v46 }
 0x6de   :  { %2643 = vmatmul.mubr.f32.gmra.mrb[54].mxu0 %v10420_v51  ;;  %2732 = vmatmul.mubr.f32.gmra.mrb[60].mxu1 %v10420_v51 }
 0x6df   :  { %7048 = vmatpush1.bf16.msra.mxu0 %v9629_v41  ;;  %7080 = vmatpush1.bf16.msra.mxu1 %v9660_v5 }
 0x6e0   :  { %7050 = vmatprep.subr.bf16.mxu0 %v9643_v55  ;;  %7082 = vmatprep.subr.bf16.mxu1 %v9665_v59 }
 0x6e1   :  { %2914 = vmatprep.mubr.f32.mxu0 %v11409_v16  ;;  %3003 = vmatprep.mubr.f32.mxu1 %v11409_v16 }
 0x6e3   :  { %7052 = vmatpush1.bf16.msra.mxu0 %v9649_v58  ;;  %7084 = vmatpush1.bf16.msra.mxu1 %v9676_v9 }
 0x6e4   :  { %7086 = vmatprep.subr.bf16.mxu0 %v7085_v2  ;;  %7118 = vmatprep.subr.bf16.mxu1 %v7117_v15 }
 0x797   :  { %v2626_v19 = vpop.f32.mrb[48].mxu0  ;;  %v2715_v20 = vpop.f32.mrb[54].mxu1 }
 0x798   :  { %v7743_v23 = vadd.f32 %v2626_v19, %v9896_v7  ;;  %v2628_v32 = vpop.f32.mrb[49].mxu0  ;;  %v2717_v33 = vpop.f32.mrb[55].mxu1  ;;  %v7813_v25 = vadd.f32 %v2715_v20, %v9914_v36 }
 0x799   :  { %v7744_v39 = vadd.f32 %v2628_v32, %v9900_v8  ;;  %v7814_v54 = vadd.f32 %v2717_v33, %v9918_v43 }
 0x79a   :  { %v6394_v41 = vmul.f32 -1.442695, %v7743_v23 }
 0x79b   :  { %v6398_v55 = vmul.f32 -1.442695, %v7744_v39  ;;  %v6402_v46 = vmul.f32 -1.442695, %v7814_v54 }
 0x79c   :  { %8600 = vpow2.f32 %v6394_v41 }
 0x79d   :  { %8602 = vpow2.f32 %v6398_v55 }
 0x79e   :  { %v2632_v58 = vpop.f32.mrb[50].mxu0  ;;  %v2721_v5 = vpop.f32.mrb[56].mxu1  ;;  %8604 = vpow2.f32 %v6402_v46 }
 0x79f   :  { %v7745_v59 = vadd.f32 %v2632_v58, %v9896_v7  ;;  %v2634_v9 = vpop.f32.mrb[51].mxu0  ;;  %v2723_v30 = vpop.f32.mrb[57].mxu1  ;;  %v7815_v56 = vadd.f32 %v2721_v5, %v9914_v36 }
 0x7a0   :  { %v7746_v12 = vadd.f32 %v2634_v9, %v9900_v8  ;;  %v7816_v10 = vadd.f32 %v2723_v30, %v9918_v43 }
 0x7a1   :  { %v6395_v17 = vmul.f32 -1.442695, %v7745_v59 }
 0x7a2   :  { %v6399_v21 = vmul.f32 -1.442695, %v7746_v12  ;;  %v6403_v0 = vmul.f32 -1.442695, %v7816_v10 }
 0x7a3   :  { %8606 = vpow2.f32 %v6395_v17 }
 0x7a4   :  { %8608 = vpow2.f32 %v6399_v21 }
 0x7a5   :  { %8610 = vtanh.f32 %v7813_v25 }
 0x7a6   :  { %v8601_v11 = vpop.eup %8600 }
 0x7a7   :  { %v8603_v24 = vpop.eup %8602  ;;  %v2766_v57 = vadd.f32 1.0, %v8601_v11 }
 0x7a8   :  { %v2790_v18 = vadd.f32 1.0, %v8603_v24  ;;  %v2638_v4 = vpop.f32.mrb[52].mxu0  ;;  %v2727_v60 = vpop.f32.mrb[58].mxu1 }
 0x7a9   :  { %8612 = vrcp.f32 %v2766_v57  ;;  %v7747_v44 = vadd.f32 %v2638_v4, %v9896_v7  ;;  %v2640_v31 = vpop.f32.mrb[53].mxu0  ;;  %v2729_v26 = vpop.f32.mrb[59].mxu1  ;;  %v7817_v50 = vadd.f32 %v2727_v60, %v9914_v36  ;;  %v3140_v4 = vld [vmem:[#allocation5] sm:$0xff] }
 0x7aa   :  { %8614 = vrcp.f32 %v2790_v18  ;;  %v7748_v47 = vadd.f32 %v2640_v31, %v9900_v8  ;;  %v8605_v14 = vpop.eup %8604  ;;  %v7818_v40 = vadd.f32 %v2729_v26, %v9918_v43  ;;  %v3142_v31 = vld [vmem:[#allocation5 + $0x10] sm:$0xff] }
 0x7ab   :  { %v6396_v42 = vmul.f32 -1.442695, %v7747_v44  ;;  %8616 = vpow2.f32 %v6403_v0  ;;  %v2818_v45 = vadd.f32 1.0, %v8605_v14  ;;  %v3144_v44 = vld [vmem:[#allocation5 + $0x20] sm:$0xff]  ;;  %v3146_v26 = vld [vmem:[#allocation5 + $0x30] sm:$0xff] }
 0x7ac   :  { %v6400_v34 = vmul.f32 -1.442695, %v7748_v47  ;;  %v6404_v33 = vmul.f32 -1.442695, %v7818_v40  ;;  %v3148_v40 = vld [vmem:[#allocation5 + $0x40] sm:$0xff] }
 0x7ad   :  { %v8607_v22 = vpop.eup %8606  ;;  %8618 = vpow2.f32 %v6396_v42  ;;  %v3149_v42 = vld [vmem:[#allocation5 + $0x48] sm:$0xff] }
 0x7ae   :  { %v8609_v38 = vpop.eup %8608  ;;  %v2767_v37 = vadd.f32 1.0, %v8607_v22  ;;  %8620 = vpow2.f32 %v6400_v34  ;;  %v3153_v34 = vld [vmem:[#allocation5 + $0x68] sm:$0xff]  ;;  %v3151_v22 = vld [vmem:[#allocation5 + $0x58] sm:$0xff] }
 0x7af   :  { %8622 = vtanh.f32 %v7815_v56  ;;  %v2791_v48 = vadd.f32 1.0, %v8609_v38  ;;  %v8611_v1 = vpop.eup %8610  ;;  %v3155_v38 = vld [vmem:[#allocation5 + $0x78] sm:$0xff] }
 0x7b0   :  { %8624 = vrcp.f32 %v2767_v37 }
 0x7b1   :  { %8626 = vrcp.f32 %v2791_v48  ;;  %v2644_v53 = vpop.f32.mrb[54].mxu0  ;;  %v2733_v61 = vpop.f32.mrb[60].mxu1  ;;  %v7087_v48 = vpack.c.bf16 %v3144_v44, %v3140_v4  ;;  %v3164_v44 = vld [vmem:[#allocation5 + $0xc0] sm:$0xff] }
 0x7b2   :  { %v7749_v2 = vadd.f32 %v2644_v53, %v9896_v7  ;;  %v2646_v3 = vpop.f32.mrb[55].mxu0  ;;  %v2735_v15 = vpop.f32.mrb[61].mxu1  ;;  %8628 = vrcp.f32 %v2818_v45  ;;  %v7819_v18 = vadd.f32 %v2733_v61, %v9914_v36  ;;  %v7119_v45 = vpack.c.bf16 %v3146_v26, %v3142_v31  ;;  %v3168_v31 = vld [vmem:[#allocation5 + $0xe0] sm:$0xff] }
 0x7b3   :  { %v8613_v19 = vpop.eup %8612  ;;  %v7750_v20 = vadd.f32 %v2646_v3, %v9900_v8  ;;  %8630 = vtanh.f32 %v7817_v50  ;;  %v7820_v12 = vadd.f32 %v2735_v15, %v9918_v43  ;;  %v3152_v50 = vld [vmem:[#allocation5 + $0x60] sm:$0xff]  ;;  %v3157_v3 = vld [vmem:[#allocation5 + $0x88] sm:$0xff] }
 0x7b4   :  { %v8615_v23 = vpop.eup %8614  ;;  %v2834_v32 = vmul.f32 %v8613_v19, %v8611_v1  ;;  %v6397_v39 = vmul.f32 -1.442695, %v7749_v2  ;;  %v3150_v1 = vld [vmem:[#allocation5 + $0x50] sm:$0xff] }
 0x7b5   :  { %v2830_v41 = vmul.f32 %v8615_v23, %v10363_v49  ;;  %v6401_v54 = vmul.f32 -1.442695, %v7750_v20  ;;  %v8617_v55 = vpop.eup %8616  ;;  %v6405_v11 = vmul.f32 -1.442695, %v7820_v12  ;;  %v3154_v2 = vld [vmem:[#allocation5 + $0x70] sm:$0xff]  ;;  %v7089_v23 = vpack.c.bf16 %v3153_v34, %v3149_v42 }
 0x7b6   :  { %8632 = vpow2.f32 %v6397_v39  ;;  %v2819_v25 = vadd.f32 1.0, %v8617_v55  ;;  %v3159_v39 = vld [vmem:[#allocation5 + $0x98] sm:$0xff]  ;;  %v7091_v55 = vpack.c.bf16 %v3152_v50, %v3148_v40  ;;  %v3166_v42 = vld [vmem:[#allocation5 + $0xd0] sm:$0xff] }
 0x7b7   :  { %v8619_v46 = vpop.eup %8618  ;;  %v10449_v58 = vadd.f32 %v2834_v32, %v2830_v41  ;;  %8634 = vpow2.f32 %v6401_v54  ;;  %v7121_v32 = vpack.c.bf16 %v3155_v38, %v3151_v22  ;;  %v3163_v41 = vld [vmem:[#allocation5 + $0xb8] sm:$0xff]  ;;  %v3177_v22 = vld [vmem:[#allocation5 + $0x128] sm:$0xff] }
 0x7b8   :  { %v8621_v5 = vpop.eup %8620  ;;  %v2768_v59 = vadd.f32 1.0, %v8619_v46  ;;  %8636 = vpow2.f32 %v6404_v33  ;;  %v3161_v33 = vld [vmem:[#allocation5 + $0xa8] sm:$0xff]  ;;  %v7123_v46 = vpack.c.bf16 %v3154_v2, %v3150_v1  ;;  %v7125_v12 = vpack.c.bf16 %v3163_v41, %v3159_v39  ;;  %v3175_v38 = vld [vmem:[#allocation5 + $0x118] sm:$0xff] }
 0x7b9   :  { %v8623_v9 = vpop.eup %8622  ;;  %8638 = vtanh.f32 %v10449_v58  ;;  %v2792_v30 = vadd.f32 1.0, %v8621_v5  ;;  %v3156_v5 = vld [vmem:[#allocation5 + $0x80] sm:$0xff]  ;;  %v3183_v41 = vld [vmem:[#allocation5 + $0x158] sm:$0xff] }
 0x7ba   :  { %v8625_v17 = vpop.eup %8624  ;;  %8640 = vrcp.f32 %v2768_v59  ;;  %v3160_v59 = vld [vmem:[#allocation5 + $0xa0] sm:$0xff] }
 0x7bb   :  { %v8627_v49 = vpop.eup %8626  ;;  %v2835_v21 = vmul.f32 %v8625_v17, %v8623_v9  ;;  %8642 = vrcp.f32 %v2792_v30  ;;  %v7093_v30 = vpack.c.bf16 %v3161_v33, %v3157_v3  ;;  %v3158_v17 = vld [vmem:[#allocation5 + $0x90] sm:$0xff]  ;;  %v7095_v4 = vpack.c.bf16 %v3160_v59, %v3156_v5  ;;  %v3181_v33 = vld [vmem:[#allocation5 + $0x148] sm:$0xff] }
 0x7bc   :  { %v2831_v10 = vmul.f32 %v8627_v49, %v10368_v13  ;;  %v8629_v24 = vpop.eup %8628  ;;  %8644 = vrcp.f32 %v2819_v25  ;;  %v3165_v49 = vld [vmem:[#allocation5 + $0xc8] sm:$0xff] }
 0x7bd   :  { %v8631_v0 = vpop.eup %8630  ;;  %v3169_v25 = vld [vmem:[#allocation5 + $0xe8] sm:$0xff] }
 0x7be   :  { %v10454_v57 = vadd.f32 %v2835_v21, %v2831_v10  ;;  %v3167_v10 = vld [vmem:[#allocation5 + $0xd8] sm:$0xff] }
 0x7c0   :  { %v8633_v60 = vpop.eup %8632  ;;  %8646 = vtanh.f32 %v10454_v57 }
 0x7c1   :  { %v8635_v47 = vpop.eup %8634  ;;  %v2769_v56 = vadd.f32 1.0, %v8633_v60  ;;  %8648 = vpow2.f32 %v6405_v11  ;;  %v3171_v11 = vld [vmem:[#allocation5 + $0xf8] sm:$0xff] }
 0x7c2   :  { %v8637_v13 = vpop.eup %8636  ;;  %8650 = vtanh.f32 %v7819_v18  ;;  %v2793_v14 = vadd.f32 1.0, %v8635_v47  ;;  %v7097_v47 = vpack.c.bf16 %v3169_v25, %v3165_v49  ;;  %v3182_v49 = vld [vmem:[#allocation5 + $0x150] sm:$0xff]  ;;  %v3189_v25 = vld [vmem:[#allocation5 + $0x188] sm:$0xff] }
 0x7c3   :  { %v8639_v37 = vpop.eup %8638  ;;  %8652 = vrcp.f32 %v2769_v56  ;;  %v2820_v20 = vadd.f32 1.0, %v8637_v13  ;;  %v7129_v56 = vpack.c.bf16 %v3171_v11, %v3167_v10  ;;  %v3170_v13 = vld [vmem:[#allocation5 + $0xf0] sm:$0xff]  ;;  %v3193_v10 = vld [vmem:[#allocation5 + $0x1a8] sm:$0xff]  ;;  %v3191_v11 = vld [vmem:[#allocation5 + $0x198] sm:$0xff] }
 0x7c4   :  { %v8641_v53 = vpop.eup %8640  ;;  %8654 = vrcp.f32 %v2793_v14  ;;  %v10458_v61 = vmul.f32 %v8639_v37, %v8629_v24  ;;  %v3173_v14 = vld [vmem:[#allocation5 + $0x108] sm:$0xff]  ;;  %v3179_v37 = vld [vmem:[#allocation5 + $0x138] sm:$0xff]  ;;  %v7131_v1 = vpack.c.bf16 %v3170_v13, %v3166_v42 }
 0x7c5   :  { %v8643_v15 = vpop.eup %8642  ;;  %v2836_v19 = vmul.f32 %v8641_v53, %v8631_v0  ;;  %8656 = vrcp.f32 %v2820_v20  ;;  %v7099_v53 = vpack.c.bf16 %v3168_v31, %v3164_v44  ;;  %v7101_v2 = vpack.c.bf16 %v3177_v22, %v3173_v14  ;;  %v3176_v20 = vld [vmem:[#allocation5 + $0x120] sm:$0xff]  ;;  %v3197_v42 = vld [vmem:[#allocation5 + $0x1c8] sm:$0xff]  ;;  %v3199_v14 = vld [vmem:[#allocation5 + $0x1d8] sm:$0xff] }
 0x7c6   :  { %v2832_v54 = vmul.f32 %v8643_v15, %v10379_v52  ;;  %2915 = vmatmul.mubr.f32.vlgmr.msra.gmra.mrb[56].mxu0 %v10458_v61  ;;  %3004 = vmatmul.mubr.f32.vlgmr.msra.gmra.mrb[62].mxu1 %v10458_v61  ;;  %v3162_v52 = vld [vmem:[#allocation5 + $0xb0] sm:$0xff]  ;;  %v8645_v21 = vpop.eup %8644  ;;  %v7133_v3 = vpack.c.bf16 %v3179_v37, %v3175_v38  ;;  %v3192_v44 = vld [vmem:[#allocation5 + $0x1a0] sm:$0xff]  ;;  %v7109_v31 = vpack.c.bf16 %v3193_v10, %v3189_v25  ;;  %v3201_v13 = vld [vmem:[#allocation5 + $0x1e8] sm:$0xff] }
 0x7c7   :  { %7088 = vmatpush1.bf16.msra.mxu0 %v7087_v48  ;;  %7120 = vmatpush1.bf16.msra.mxu1 %v7119_v45  ;;  %v7127_v60 = vpack.c.bf16 %v3162_v52, %v3158_v17  ;;  %v3748_v25 = vld [vmem:[#allocation7 + $0x40] sm:$0xff] }
 0x7c8   :  { %v10463_v9 = vadd.f32 %v2836_v19, %v2832_v54  ;;  %2920 = vmatprep.mubr.f32.mxu0 %v11409_v16  ;;  %3009 = vmatprep.mubr.f32.mxu1 %v11409_v16  ;;  %v3172_v19 = vld [vmem:[#allocation5 + $0x100] sm:$0xff]  ;;  %v3187_v54 = vld [vmem:[#allocation5 + $0x178] sm:$0xff] }
 0x7c9   :  { %7090 = vmatprep.subr.bf16.mxu0 %v7089_v23  ;;  %7122 = vmatprep.subr.bf16.mxu1 %v7121_v32  ;;  %v3174_v23 = vld [vmem:[#allocation5 + $0x110] sm:$0xff]  ;;  %v7103_v5 = vpack.c.bf16 %v3176_v20, %v3172_v19  ;;  %v7137_v52 = vpack.c.bf16 %v3187_v54, %v3183_v41  ;;  %v3741_v19 = vld [vmem:[#allocation7 + $0x8] sm:$0xff]  ;;  %v3740_v41 = vld [vmem:[#allocation7] sm:$0xff] }
 0x7ca   :  { %v8647_v24 = vpop.eup %8646  ;;  %8658 = vtanh.f32 %v10463_v9  ;;  %v3178_v32 = vld [vmem:[#allocation5 + $0x130] sm:$0xff]  ;;  %v3745_v20 = vld [vmem:[#allocation7 + $0x28] sm:$0xff]  ;;  %v3744_v54 = vld [vmem:[#allocation7 + $0x20] sm:$0xff] }
 0x7cb   :  { %v8649_v18 = vpop.eup %8648  ;;  %v10468_v0 = vmul.f32 %v8647_v24, %v8645_v21  ;;  %7092 = vmatpush1.bf16.msra.mxu0 %v7091_v55  ;;  %7124 = vmatpush1.bf16.msra.mxu1 %v7123_v46  ;;  %v7135_v59 = vpack.c.bf16 %v3178_v32, %v3174_v23  ;;  %v3186_v21 = vld [vmem:[#allocation5 + $0x170] sm:$0xff]  ;;  %v3195_v24 = vld [vmem:[#allocation5 + $0x1b8] sm:$0xff]  ;;  %v3752_v10 = vld [vmem:[#allocation7 + $0x60] sm:$0xff] }
 0x7cc   :  { %v8651_v26 = vpop.eup %8650  ;;  %7094 = vmatprep.subr.bf16.mxu0 %v7093_v30  ;;  %7126 = vmatprep.subr.bf16.mxu1 %v7125_v12  ;;  %v2821_v40 = vadd.f32 1.0, %v8649_v18  ;;  %v3180_v30 = vld [vmem:[#allocation5 + $0x140] sm:$0xff]  ;;  %v3743_v23 = vld [vmem:[#allocation7 + $0x18] sm:$0xff] }
 0x7cd   :  { %v8653_v34 = vpop.eup %8652  ;;  %2921 = vmatmul.mubr.f32.gmra.mrb[58].mxu0 %v10468_v0  ;;  %3010 = vmatmul.mubr.f32.gmra.mrb[64].mxu1 %v10468_v0  ;;  %v3184_v12 = vld [vmem:[#allocation5 + $0x160] sm:$0xff]  ;;  %v3747_v32 = vld [vmem:[#allocation7 + $0x38] sm:$0xff] }
 0x7ce   :  { %v8655_v48 = vpop.eup %8654  ;;  %v2837_v45 = vmul.f32 %v8653_v34, %v8651_v26  ;;  %2926 = vmatprep.mubr.f32.mxu0 %v11409_v16  ;;  %3015 = vmatprep.mubr.f32.mxu1 %v11409_v16  ;;  %8660 = vrcp.f32 %v2821_v40  ;;  %v7107_v18 = vpack.c.bf16 %v3184_v12, %v3180_v30  ;;  %v7141_v26 = vpack.c.bf16 %v3195_v24, %v3191_v11  ;;  %v3203_v34 = vld [vmem:[#allocation5 + $0x1f8] sm:$0xff]  ;;  %v3200_v40 = vld [vmem:[#allocation5 + $0x1e0] sm:$0xff]  ;;  %v3746_v30 = vld [vmem:[#allocation7 + $0x30] sm:$0xff] }
 0x7cf   :  { %v2833_v50 = vmul.f32 %v8655_v48, %v10399_v27  ;;  %7096 = vmatpush1.bf16.msra.mxu0 %v7095_v4  ;;  %7128 = vmatpush1.bf16.msra.mxu1 %v7127_v60  ;;  %v8657_v39 = vpop.eup %8656  ;;  %v3185_v27 = vld [vmem:[#allocation5 + $0x168] sm:$0xff]  ;;  %v7139_v4 = vpack.c.bf16 %v3186_v21, %v3182_v49  ;;  %v3188_v60 = vld [vmem:[#allocation5 + $0x180] sm:$0xff]  ;;  %v10495_v49 = vpack.c.bf16 %v3744_v54, %v3740_v41 }
 0x7d0   :  { %7098 = vmatprep.subr.bf16.mxu0 %v7097_v47  ;;  %7130 = vmatprep.subr.bf16.mxu1 %v7129_v56  ;;  %v7105_v17 = vpack.c.bf16 %v3185_v27, %v3181_v33  ;;  %v3190_v47 = vld [vmem:[#allocation5 + $0x190] sm:$0xff]  ;;  %v7111_v37 = vpack.c.bf16 %v3192_v44, %v3188_v60  ;;  %v10488_v27 = vpack.c.bf16 %v3745_v20, %v3741_v19  ;;  %v3753_v12 = vld [vmem:[#allocation7 + $0x68] sm:$0xff]  ;;  %v3768_v19 = vld [vmem:[#allocation7 + $0xe0] sm:$0xff] }
 0x7d1   :  { %v10475_v15 = vadd.f32 %v2837_v45, %v2833_v50  ;;  %v3194_v56 = vld [vmem:[#allocation5 + $0x1b0] sm:$0xff]  ;;  %v3196_v45 = vld [vmem:[#allocation5 + $0x1c0] sm:$0xff]  ;;  %v3761_v44 = vld [vmem:[#allocation7 + $0xa8] sm:$0xff] }
 0x7d2   :  { %v7143_v48 = vpack.c.bf16 %v3194_v56, %v3190_v47  ;;  %v7115_v33 = vpack.c.bf16 %v3200_v40, %v3196_v45  ;;  %v3754_v60 = vld [vmem:[#allocation7 + $0x70] sm:$0xff]  ;;  %v10510_v47 = vpack.c.bf16 %v3752_v10, %v3748_v25  ;;  %v3767_v45 = vld [vmem:[#allocation7 + $0xd8] sm:$0xff]  ;;  %v3777_v41 = vld [vmem:[#allocation7 + $0x128] sm:$0xff] }
 0x7d3   :  { %8662 = vtanh.f32 %v10475_v15  ;;  %7100 = vmatpush1.bf16.msra.mxu0 %v7099_v53  ;;  %7132 = vmatpush1.bf16.msra.mxu1 %v7131_v1  ;;  %v7113_v53 = vpack.c.bf16 %v3201_v13, %v3197_v42  ;;  %v7145_v1 = vpack.c.bf16 %v3203_v34, %v3199_v14  ;;  %v3756_v42 = vld [vmem:[#allocation7 + $0x80] sm:$0xff]  ;;  %v3765_v34 = vld [vmem:[#allocation7 + $0xc8] sm:$0xff]  ;;  %v3771_v40 = vld [vmem:[#allocation7 + $0xf8] sm:$0xff] }
 0x7d4   :  { %v8659_v55 = vpop.eup %8658  ;;  %7102 = vmatprep.subr.bf16.mxu0 %v7101_v2  ;;  %7134 = vmatprep.subr.bf16.mxu1 %v7133_v3  ;;  %v3198_v2 = vld [vmem:[#allocation5 + $0x1d0] sm:$0xff]  ;;  %v3760_v13 = vld [vmem:[#allocation7 + $0xa0] sm:$0xff]  ;;  %v10534_v20 = vpack.c.bf16 %v3771_v40, %v3767_v45  ;;  %v11433_v25 = vld [vmem:[#allocation25_spill] sm:$0xff] }
 0x7d5   :  { %v10478_v46 = vmul.f32 %v8659_v55, %v8657_v39  ;;  %v3202_v3 = vld [vmem:[#allocation5 + $0x1f0] sm:$0xff]  ;;  %v10490_v55 = vpack.c.bf16 %v3747_v32, %v3743_v23  ;;  %v3780_v45 = vld [vmem:[#allocation7 + $0x140] sm:$0xff] }
 0x7d6   :  { %v7147_v39 = vpack.c.bf16 %v3202_v3, %v3198_v2  ;;  %v3764_v2 = vld [vmem:[#allocation7 + $0xc0] sm:$0xff]  ;;  %v3766_v23 = vld [vmem:[#allocation7 + $0xd0] sm:$0xff] }
 0x7d7   :  { %2927 = vmatmul.mubr.f32.gmra.mrb[60].mxu0 %v10478_v46  ;;  %3016 = vmatmul.mubr.f32.gmra.mrb[66].mxu1 %v10478_v46  ;;  %v3770_v32 = vld [vmem:[#allocation7 + $0xf0] sm:$0xff]  ;;  %v10542_v54 = vpack.c.bf16 %v3768_v19, %v3764_v2  ;;  %v3784_v40 = vld [vmem:[#allocation7 + $0x160] sm:$0xff]  ;;  %v3783_v2 = vld [vmem:[#allocation7 + $0x158] sm:$0xff] }
 0x7d8   :  { %2932 = vmatprep.mubr.f32.mxu0 %v11409_v16  ;;  %3021 = vmatprep.mubr.f32.mxu1 %v11409_v16  ;;  %v8661_v22 = vpop.eup %8660  ;;  %v11434_v10 = vld [vmem:[#allocation26_spill] sm:$0xff]  ;;  %v3787_v19 = vld [vmem:[#allocation7 + $0x178] sm:$0xff] }
 0x7d9   :  { %7104 = vmatpush1.bf16.msra.mxu0 %v7103_v5  ;;  %7136 = vmatpush1.bf16.msra.mxu1 %v7135_v59  ;;  %v3749_v5 = vld [vmem:[#allocation7 + $0x48] sm:$0xff]  ;;  %v3742_v59 = vld [vmem:[#allocation7 + $0x10] sm:$0xff] }
 0x7da   :  { %7106 = vmatprep.subr.bf16.mxu0 %v7105_v17  ;;  %7138 = vmatprep.subr.bf16.mxu1 %v7137_v52  ;;  %v3751_v17 = vld [vmem:[#allocation7 + $0x58] sm:$0xff]  ;;  %v10498_v21 = vpack.c.bf16 %v3746_v30, %v3742_v59  ;;  %v10500_v11 = vpack.c.bf16 %v3753_v12, %v3749_v5  ;;  %v10544_v5 = vpack.c.bf16 %v3770_v32, %v3766_v23  ;;  %v11429_v30 = vld [vmem:[#allocation21_spill] sm:$0xff]  ;;  %v11430_v12 = vld [vmem:[#allocation22_spill] sm:$0xff] }
 0x7db   :  { %v3755_v52 = vld [vmem:[#allocation7 + $0x78] sm:$0xff]  ;;  %v3789_v23 = vld [vmem:[#allocation7 + $0x188] sm:$0xff] }
 0x7dc   :  { %v10502_v24 = vpack.c.bf16 %v3755_v52, %v3751_v17  ;;  %v11431_v17 = vld [vmem:[#allocation23_spill] sm:$0xff]  ;;  %v11432_v52 = vld [vmem:[#allocation24_spill] sm:$0xff]  ;;  %v3793_v32 = vld [vmem:[#allocation7 + $0x1a8] sm:$0xff] }
 0x7dd   :  { %v8663_v38 = vpop.eup %8662  ;;  %7108 = vmatpush1.bf16.msra.mxu0 %v7107_v18  ;;  %7140 = vmatpush1.bf16.msra.mxu1 %v7139_v4  ;;  %v3757_v18 = vld [vmem:[#allocation7 + $0x88] sm:$0xff]  ;;  %v3750_v4 = vld [vmem:[#allocation7 + $0x50] sm:$0xff] }
 0x7de   :  { %v10484_v50 = vmul.f32 %v8663_v38, %v8661_v22  ;;  %7110 = vmatprep.subr.bf16.mxu0 %v7109_v31  ;;  %7142 = vmatprep.subr.bf16.mxu1 %v7141_v26  ;;  %v3759_v31 = vld [vmem:[#allocation7 + $0x98] sm:$0xff]  ;;  %v10512_v56 = vpack.c.bf16 %v3754_v60, %v3750_v4  ;;  %v3758_v22 = vld [vmem:[#allocation7 + $0x90] sm:$0xff]  ;;  %v11436_v4 = vld [vmem:[#allocation28_spill] sm:$0xff] }
 0x7df   :  { %v3763_v26 = vld [vmem:[#allocation7 + $0xb8] sm:$0xff]  ;;  %v3762_v38 = vld [vmem:[#allocation7 + $0xb0] sm:$0xff]  ;;  %v11437_v60 = vld [vmem:[#allocation29_spill] sm:$0xff] }
 0x7e0   :  { %2933 = vmatmul.mubr.f32.gmra.mrb[62].mxu0 %v10484_v50  ;;  %3022 = vmatmul.mubr.f32.gmra.mrb[68].mxu1 %v10484_v50  ;;  %v10518_v14 = vpack.c.bf16 %v3763_v26, %v3759_v31  ;;  %v11439_v31 = vld [vmem:[#allocation31_spill] sm:$0xff]  ;;  %v11440_v26 = vld [vmem:[#allocation32_spill] sm:$0xff] }
 0x7e1   :  { %7112 = vmatpush1.bf16.msra.mxu0 %v7111_v37  ;;  %7144 = vmatpush1.bf16.msra.mxu1 %v7143_v48  ;;  %v11427_v37 = vld [vmem:[#allocation19_spill] sm:$0xff]  ;;  %v3769_v48 = vld [vmem:[#allocation7 + $0xe8] sm:$0xff] }
 0x7e2   :  { %7114 = vmatprep.subr.bf16.mxu0 %v7113_v53  ;;  %7146 = vmatprep.subr.bf16.mxu1 %v7145_v1  ;;  %v10526_v53 = vpack.c.bf16 %v3760_v13, %v3756_v42  ;;  %v10528_v1 = vpack.c.bf16 %v3762_v38, %v3758_v22  ;;  %v10532_v3 = vpack.c.bf16 %v3769_v48, %v3765_v34  ;;  %v11441_v42 = vld [vmem:[#allocation33_spill] sm:$0xff]  ;;  %v11442_v13 = vld [vmem:[#allocation34_spill] sm:$0xff]  ;;  %v3776_v34 = vld [vmem:[#allocation7 + $0x120] sm:$0xff] }
 0x7e3   :  { %3290 = vmatprep.mubr.f32.mxu0 %v11409_v16  ;;  %3547 = vmatprep.mubr.f32.mxu1 %v11409_v16  ;;  %v3774_v38 = vld [vmem:[#allocation7 + $0x110] sm:$0xff] }
 0x7e5   :  { %7116 = vmatpush1.bf16.msra.mxu0 %v7115_v33  ;;  %7148 = vmatpush1.bf16.msra.mxu1 %v7147_v39  ;;  %v11428_v33 = vld [vmem:[#allocation20_spill] sm:$0xff]  ;;  %v3773_v39 = vld [vmem:[#allocation7 + $0x108] sm:$0xff] }
 0x7e6   :  { %7150 = vmatprep.subr.bf16.mxu0 %v10488_v27  ;;  %7182 = vmatprep.subr.bf16.mxu1 %v10490_v55  ;;  %v10548_v59 = vpack.c.bf16 %v3777_v41, %v3773_v39  ;;  %v10666_v39 = vpack.c.bf16 %v3793_v32, %v3789_v23  ;;  %v3782_v41 = vld [vmem:[#allocation7 + $0x150] sm:$0xff] }
 0x7e8   :  { %3291 = vmatmul.mubr.f32.vlgmr.msra.gmra.mrb[64].mxu0 %v9940_v29  ;;  %3548 = vmatmul.mubr.f32.vlgmr.msra.gmra.mrb[70].mxu1 %v9940_v29  ;;  %v10516_v29 = vpack.c.bf16 %v3761_v44, %v3757_v18  ;;  %v11435_v18 = vld [vmem:[#allocation27_spill] sm:$0xff]  ;;  %v11438_v44 = vld [vmem:[#allocation30_spill] sm:$0xff] }
 0x7e9   :  { %3296 = vmatprep.mubr.f32.mxu0 %v11409_v16  ;;  %3553 = vmatprep.mubr.f32.mxu1 %v11409_v16 }
 0x7ea   :  { %7152 = vmatpush1.bf16.msra.mxu0 %v10495_v49  ;;  %7184 = vmatpush1.bf16.msra.mxu1 %v10498_v21 }
 0x7eb   :  { %7154 = vmatprep.subr.bf16.mxu0 %v10500_v11  ;;  %7186 = vmatprep.subr.bf16.mxu1 %v10502_v24 }
 0x7ec   :  { %3297 = vmatmul.mubr.f32.gmra.mrb[66].mxu0 %v11427_v37  ;;  %3554 = vmatmul.mubr.f32.gmra.mrb[72].mxu1 %v11427_v37 }
 0x7ed   :  { %3302 = vmatprep.mubr.f32.mxu0 %v11409_v16  ;;  %3559 = vmatprep.mubr.f32.mxu1 %v11409_v16 }
 0x7ee   :  { %7156 = vmatpush1.bf16.msra.mxu0 %v10510_v47  ;;  %7188 = vmatpush1.bf16.msra.mxu1 %v10512_v56 }
 0x7ef   :  { %7158 = vmatprep.subr.bf16.mxu0 %v10516_v29  ;;  %7190 = vmatprep.subr.bf16.mxu1 %v10518_v14 }
 0x7f0   :  { %3303 = vmatmul.mubr.f32.gmra.mrb[68].mxu0 %v11428_v33  ;;  %3560 = vmatmul.mubr.f32.gmra.mrb[74].mxu1 %v11428_v33  ;;  %v10664_v33 = vpack.c.bf16 %v3787_v19, %v3783_v2 }
 0x7f1   :  { %3308 = vmatprep.mubr.f32.mxu0 %v11409_v16  ;;  %3565 = vmatprep.mubr.f32.mxu1 %v11409_v16 }
 0x7f2   :  { %7160 = vmatpush1.bf16.msra.mxu0 %v10526_v53  ;;  %7192 = vmatpush1.bf16.msra.mxu1 %v10528_v1 }
 0x7f3   :  { %7162 = vmatprep.subr.bf16.mxu0 %v10532_v3  ;;  %7194 = vmatprep.subr.bf16.mxu1 %v10534_v20 }
 0x7f4   :  { %3309 = vmatmul.mubr.f32.gmra.mrb[70].mxu0 %v11429_v30  ;;  %3566 = vmatmul.mubr.f32.gmra.mrb[76].mxu1 %v11429_v30  ;;  %v3786_v30 = vld [vmem:[#allocation7 + $0x170] sm:$0xff] }
 0x7f5   :  { %3314 = vmatprep.mubr.f32.mxu0 %v11409_v16  ;;  %3571 = vmatprep.mubr.f32.mxu1 %v11409_v16 }
 0x7f6   :  { %7164 = vmatpush1.bf16.msra.mxu0 %v10542_v54  ;;  %7196 = vmatpush1.bf16.msra.mxu1 %v10544_v5 }
 0x7f7   :  { %7166 = vmatprep.subr.bf16.mxu0 %v10548_v59 }
 0x7f8   :  { %3315 = vmatmul.mubr.f32.gmra.mrb[72].mxu0 %v11430_v12  ;;  %3572 = vmatmul.mubr.f32.gmra.mrb[78].mxu1 %v11430_v12  ;;  %v3788_v12 = vld [vmem:[#allocation7 + $0x180] sm:$0xff] }
 0x7f9   :  { %3320 = vmatprep.mubr.f32.mxu0 %v11409_v16  ;;  %3577 = vmatprep.mubr.f32.mxu1 %v11409_v16 }
 0x7fc   :  { %3321 = vmatmul.mubr.f32.gmra.mrb[74].mxu0 %v11431_v17  ;;  %3578 = vmatmul.mubr.f32.gmra.mrb[80].mxu1 %v11431_v17  ;;  %v3792_v17 = vld [vmem:[#allocation7 + $0x1a0] sm:$0xff] }
 0x7fd   :  { %3326 = vmatprep.mubr.f32.mxu0 %v11409_v16  ;;  %3583 = vmatprep.mubr.f32.mxu1 %v11409_v16 }
 0x800   :  { %3327 = vmatmul.mubr.f32.gmra.mrb[76].mxu0 %v11432_v52  ;;  %3584 = vmatmul.mubr.f32.gmra.mrb[82].mxu1 %v11432_v52  ;;  %v3791_v52 = vld [vmem:[#allocation7 + $0x198] sm:$0xff] }
 0x801   :  { %3332 = vmatprep.mubr.f32.mxu0 %v11409_v16  ;;  %3589 = vmatprep.mubr.f32.mxu1 %v11409_v16 }
 0x804   :  { %3333 = vmatmul.mubr.f32.gmra.mrb[78].mxu0 %v11433_v25  ;;  %3590 = vmatmul.mubr.f32.gmra.mrb[84].mxu1 %v11433_v25  ;;  %v3795_v25 = vld [vmem:[#allocation7 + $0x1b8] sm:$0xff] }
 0x805   :  { %3338 = vmatprep.mubr.f32.mxu0 %v11409_v16  ;;  %3595 = vmatprep.mubr.f32.mxu1 %v11409_v16 }
 0x808   :  { %3339 = vmatmul.mubr.f32.gmra.mrb[80].mxu0 %v11434_v10  ;;  %3596 = vmatmul.mubr.f32.gmra.mrb[86].mxu1 %v11434_v10  ;;  %v10674_v10 = vpack.c.bf16 %v3792_v17, %v3788_v12  ;;  %v11444_v12 = vld [vmem:[#allocation12_spill] sm:$0xff] }
 0x809   :  { %3344 = vmatprep.mubr.f32.mxu0 %v11409_v16  ;;  %3601 = vmatprep.mubr.f32.mxu1 %v11409_v16  ;;  %v483_v17 = vadd.f32 %v11444_v12, %v9896_v7 }
 0x80c   :  { %3345 = vmatmul.mubr.f32.gmra.mrb[82].mxu0 %v11435_v18  ;;  %3602 = vmatmul.mubr.f32.gmra.mrb[88].mxu1 %v11435_v18  ;;  %v10676_v18 = vpack.c.bf16 %v3795_v25, %v3791_v52  ;;  %v11445_v52 = vld [vmem:[#allocation13_spill] sm:$0xff] }
 0x80d   :  { %3350 = vmatprep.mubr.f32.mxu0 %v11409_v16  ;;  %3607 = vmatprep.mubr.f32.mxu1 %v11409_v16  ;;  %v485_v25 = vadd.f32 %v11445_v52, %v9900_v8 }
 0x810   :  { %3351 = vmatmul.mubr.f32.gmra.mrb[84].mxu0 %v11436_v4  ;;  %3608 = vmatmul.mubr.f32.gmra.mrb[90].mxu1 %v11436_v4  ;;  %v3797_v4 = vld [vmem:[#allocation7 + $0x1c8] sm:$0xff] }
 0x811   :  { %3356 = vmatprep.mubr.f32.mxu0 %v11409_v16  ;;  %3613 = vmatprep.mubr.f32.mxu1 %v11409_v16 }
 0x814   :  { %3357 = vmatmul.mubr.f32.gmra.mrb[86].mxu0 %v11437_v60  ;;  %3614 = vmatmul.mubr.f32.gmra.mrb[92].mxu1 %v11437_v60  ;;  %v3801_v60 = vld [vmem:[#allocation7 + $0x1e8] sm:$0xff] }
 0x815   :  { %3362 = vmatprep.mubr.f32.mxu0 %v11409_v16  ;;  %3619 = vmatprep.mubr.f32.mxu1 %v11409_v16 }
 0x818   :  { %3363 = vmatmul.mubr.f32.gmra.mrb[88].mxu0 %v11438_v44  ;;  %3620 = vmatmul.mubr.f32.gmra.mrb[94].mxu1 %v11438_v44  ;;  %v3790_v44 = vld [vmem:[#allocation7 + $0x190] sm:$0xff] }
 0x819   :  { %3368 = vmatprep.mubr.f32.mxu0 %v11409_v16  ;;  %3625 = vmatprep.mubr.f32.mxu1 %v11409_v16 }
 0x81c   :  { %3369 = vmatmul.mubr.f32.gmra.mrb[90].mxu0 %v11439_v31  ;;  %3626 = vmatmul.mubr.f32.gmra.mrb[96].mxu1 %v11439_v31  ;;  %v10680_v31 = vpack.c.bf16 %v3801_v60, %v3797_v4 }
 0x81d   :  { %3374 = vmatprep.mubr.f32.mxu0 %v11409_v16  ;;  %3631 = vmatprep.mubr.f32.mxu1 %v11409_v16 }
 0x820   :  { %3375 = vmatmul.mubr.f32.gmra.mrb[92].mxu0 %v11440_v26  ;;  %3632 = vmatmul.mubr.f32.gmra.mrb[98].mxu1 %v11440_v26  ;;  %v3794_v26 = vld [vmem:[#allocation7 + $0x1b0] sm:$0xff] }
 0x821   :  { %3380 = vmatprep.mubr.f32.mxu0 %v11409_v16  ;;  %3637 = vmatprep.mubr.f32.mxu1 %v11409_v16 }
 0x824   :  { %3381 = vmatmul.mubr.f32.gmra.mrb[94].mxu0 %v11441_v42  ;;  %3638 = vmatmul.mubr.f32.gmra.mrb[100].mxu1 %v11441_v42  ;;  %v3796_v42 = vld [vmem:[#allocation7 + $0x1c0] sm:$0xff] }
 0x825   :  { %3386 = vmatprep.mubr.f32.mxu0 %v11409_v16  ;;  %3643 = vmatprep.mubr.f32.mxu1 %v11409_v16 }
 0x828   :  { %3387 = vmatmul.mubr.f32.gmra.mrb[96].mxu0 %v10284_v62  ;;  %3644 = vmatmul.mubr.f32.gmra.mrb[102].mxu1 %v10284_v62  ;;  %v11443_v62 = vld [vmem:[#allocation35_spill] sm:$0xff] }
 0x829   :  { %3392 = vmatprep.mubr.f32.mxu0 %v11409_v16  ;;  %3649 = vmatprep.mubr.f32.mxu1 %v11409_v16 }
 0x82c   :  { %3393 = vmatmul.mubr.f32.gmra.mrb[98].mxu0 %v10298_v63  ;;  %3650 = vmatmul.mubr.f32.gmra.mrb[104].mxu1 %v10298_v63  ;;  %v3772_v63 = vld [vmem:[#allocation7 + $0x100] sm:$0xff] }
 0x82d   :  { %3398 = vmatprep.mubr.f32.mxu0 %v11409_v16  ;;  %3655 = vmatprep.mubr.f32.mxu1 %v11409_v16  ;;  %v10621_v22 = vpack.c.bf16 %v3776_v34, %v3772_v63  ;;  %v3799_v34 = vld [vmem:[#allocation7 + $0x1d8] sm:$0xff] }
 0x82f   :  { %7168 = vmatpush1.bf16.msra.mxu0 %v10621_v22 }
 0x830   :  { %3399 = vmatmul.mubr.f32.gmra.mrb[100].mxu0 %v11442_v13  ;;  %3656 = vmatmul.mubr.f32.gmra.mrb[106].mxu1 %v11442_v13  ;;  %v3800_v13 = vld [vmem:[#allocation7 + $0x1e0] sm:$0xff] }
 0x831   :  { %3404 = vmatprep.mubr.f32.mxu0 %v11409_v16  ;;  %3661 = vmatprep.mubr.f32.mxu1 %v11409_v16  ;;  %v10686_v63 = vpack.c.bf16 %v3800_v13, %v3796_v42 }
 0x834   :  { %3405 = vmatmul.mubr.f32.gmra.mrb[102].mxu0 %v11443_v62  ;;  %3662 = vmatmul.mubr.f32.gmra.mrb[108].mxu1 %v11443_v62  ;;  %v10684_v62 = vpack.c.bf16 %v3794_v26, %v3790_v44 }
 0x835   :  { %3410 = vmatprep.mubr.f32.mxu0 %v11409_v16  ;;  %3667 = vmatprep.mubr.f32.mxu1 %v11409_v16 }
 0x838   :  { %3411 = vmatmul.mubr.f32.gmra.mrb[104].mxu0 %v10372_v6  ;;  %3668 = vmatmul.mubr.f32.gmra.mrb[110].mxu1 %v10372_v6  ;;  %v3775_v6 = vld [vmem:[#allocation7 + $0x118] sm:$0xff] }
 0x839   :  { %3416 = vmatprep.mubr.f32.mxu0 %v11409_v16  ;;  %3673 = vmatprep.mubr.f32.mxu1 %v11409_v16 }
 0x83c   :  { %3417 = vmatmul.mubr.f32.gmra.mrb[106].mxu0 %v10386_v28  ;;  %3674 = vmatmul.mubr.f32.gmra.mrb[112].mxu1 %v10386_v28  ;;  %v3779_v28 = vld [vmem:[#allocation7 + $0x138] sm:$0xff] }
 0x83d   :  { %3422 = vmatprep.mubr.f32.mxu0 %v11409_v16  ;;  %3679 = vmatprep.mubr.f32.mxu1 %v11409_v16 }
 0x840   :  { %3423 = vmatmul.mubr.f32.gmra.mrb[108].mxu0 %v10406_v35  ;;  %3680 = vmatmul.mubr.f32.gmra.mrb[114].mxu1 %v10406_v35  ;;  %v3781_v35 = vld [vmem:[#allocation7 + $0x148] sm:$0xff] }
 0x841   :  { %3428 = vmatprep.mubr.f32.mxu0 %v11409_v16  ;;  %3685 = vmatprep.mubr.f32.mxu1 %v11409_v16 }
 0x844   :  { %3429 = vmatmul.mubr.f32.gmra.mrb[110].mxu0 %v10420_v51  ;;  %3686 = vmatmul.mubr.f32.gmra.mrb[116].mxu1 %v10420_v51  ;;  %v10652_v51 = vpack.c.bf16 %v3779_v28, %v3775_v6  ;;  %v3803_v6 = vld [vmem:[#allocation7 + $0x1f8] sm:$0xff] }
 0x845   :  { %3434 = vmatprep.mubr.f32.mxu0 %v11409_v16  ;;  %3691 = vmatprep.mubr.f32.mxu1 %v11409_v16  ;;  %v10693_v28 = vpack.c.bf16 %v3803_v6, %v3799_v34 }
 0x846   :  { %7198 = vmatprep.subr.bf16.mxu1 %v10652_v51 }
 0x848   :  { %3435 = vmatmul.mubr.f32.gmra.mrb[112].mxu0 %v10458_v61  ;;  %3692 = vmatmul.mubr.f32.gmra.mrb[118].mxu1 %v10458_v61  ;;  %v3785_v61 = vld [vmem:[#allocation7 + $0x168] sm:$0xff] }
 0x849   :  { %3440 = vmatprep.mubr.f32.mxu0 %v11409_v16  ;;  %3697 = vmatprep.mubr.f32.mxu1 %v11409_v16  ;;  %v10654_v37 = vpack.c.bf16 %v3785_v61, %v3781_v35  ;;  %v3798_v35 = vld [vmem:[#allocation7 + $0x1d0] sm:$0xff] }
 0x84a   :  { %v3802_v61 = vld [vmem:[#allocation7 + $0x1f0] sm:$0xff] }
 0x84b   :  { %7170 = vmatprep.subr.bf16.mxu0 %v10654_v37 }
 0x84c   :  { %3441 = vmatmul.mubr.f32.gmra.mrb[114].mxu0 %v10468_v0  ;;  %3698 = vmatmul.mubr.f32.gmra.mrb[120].mxu1 %v10468_v0  ;;  %v3778_v0 = vld [vmem:[#allocation7 + $0x130] sm:$0xff] }
 0x84d   :  { %3446 = vmatprep.mubr.f32.mxu0 %v11409_v16  ;;  %3703 = vmatprep.mubr.f32.mxu1 %v11409_v16  ;;  %v10656_v48 = vpack.c.bf16 %v3778_v0, %v3774_v38  ;;  %v10695_v38 = vpack.c.bf16 %v3802_v61, %v3798_v35 }
 0x84f   :  { %7200 = vmatpush1.bf16.msra.mxu1 %v10656_v48 }
 0x850   :  { %3447 = vmatmul.mubr.f32.gmra.mrb[116].mxu0 %v10478_v46  ;;  %3704 = vmatmul.mubr.f32.gmra.mrb[122].mxu1 %v10478_v46  ;;  %v10660_v46 = vpack.c.bf16 %v3784_v40, %v3780_v45 }
 0x851   :  { %3452 = vmatprep.mubr.f32.mxu0 %v11409_v16  ;;  %3709 = vmatprep.mubr.f32.mxu1 %v11409_v16 }
 0x852   :  { %7172 = vmatpush1.bf16.msra.mxu0 %v10660_v46  ;;  %7202 = vmatprep.subr.bf16.mxu1 %v10664_v33 }
 0x853   :  { %7174 = vmatprep.subr.bf16.mxu0 %v10666_v39 }
 0x854   :  { %3453 = vmatmul.mubr.f32.gmra.mrb[118].mxu0 %v10484_v50  ;;  %3710 = vmatmul.mubr.f32.gmra.mrb[124].mxu1 %v10484_v50  ;;  %v10670_v50 = vpack.c.bf16 %v3786_v30, %v3782_v41 }
 0x855   :  { %3458 = vmatprep.mubr.f32.mxu0 %v11409_v16  ;;  %3715 = vmatprep.mubr.f32.mxu1 %v11409_v16 }
 0x856   :  { %7204 = vmatpush1.bf16.msra.mxu1 %v10670_v50  ;;  %7176 = vmatpush1.bf16.msra.mxu0 %v10674_v10 }
 0x857   :  { %7206 = vmatprep.subr.bf16.mxu1 %v10676_v18  ;;  %7178 = vmatprep.subr.bf16.mxu0 %v10680_v31 }
 0x85a   :  { %7208 = vmatpush1.bf16.msra.mxu1 %v10684_v62  ;;  %7180 = vmatpush1.bf16.msra.mxu0 %v10686_v63 }
 0x85b   :  { %7214 = vmatprep.subr.bf16.mxu0 %v10488_v27  ;;  %7210 = vmatprep.subr.bf16.mxu1 %v10693_v28 }
 0x85e   :  { %7212 = vmatpush1.bf16.msra.mxu1 %v10695_v38 }
 0x85f   :  { %7246 = vmatprep.subr.bf16.mxu1 %v10490_v55 }
 0x899   :  { %v2916_v0 = vpop.f32.mrb[56].mxu0  ;;  %v3005_v45 = vpop.f32.mrb[62].mxu1 }
 0x89a   :  { %v7751_v40 = vadd.f32 %v2916_v0, %v9896_v7  ;;  %v2918_v2 = vpop.f32.mrb[57].mxu0  ;;  %v3007_v19 = vpop.f32.mrb[63].mxu1  ;;  %v7821_v61 = vadd.f32 %v3005_v45, %v9914_v36 }
 0x89b   :  { %v7752_v23 = vadd.f32 %v2918_v2, %v9900_v8  ;;  %v7822_v41 = vadd.f32 %v3007_v19, %v9918_v43  ;;  %v11446_v19 = vld [vmem:[#allocation14_spill] sm:$0xff] }
 0x89c   :  { %v6406_v32 = vmul.f32 -1.442695, %v7751_v40 }
 0x89d   :  { %v6410_v30 = vmul.f32 -1.442695, %v7752_v23  ;;  %v6414_v4 = vmul.f32 -1.442695, %v7822_v41  ;;  %v489_v23 = vadd.f32 %v11446_v19, %v9896_v7  ;;  %v11447_v41 = vld [vmem:[#allocation15_spill] sm:$0xff] }
 0x89e   :  { %8664 = vpow2.f32 %v6406_v32 }
 0x89f   :  { %8666 = vpow2.f32 %v6410_v30  ;;  %v491_v30 = vadd.f32 %v11447_v41, %v9900_v8 }
 0x8a0   :  { %v2922_v60 = vpop.f32.mrb[58].mxu0  ;;  %v3011_v44 = vpop.f32.mrb[64].mxu1  ;;  %8668 = vpow2.f32 %v6414_v4 }
 0x8a1   :  { %v3032_v26 = vadd.f32 %v2922_v60, %v483_v17  ;;  %v2924_v42 = vpop.f32.mrb[59].mxu0  ;;  %v3013_v13 = vpop.f32.mrb[65].mxu1 }
 0x8a2   :  { %v3033_v34 = vadd.f32 %v2924_v42, %v485_v25  ;;  %v7824_v0 = vadd.f32 %v3013_v13, %v9918_v43  ;;  %v7823_v42 = vadd.f32 %v3011_v44, %v9914_v36  ;;  %v11449_v44 = vld [vmem:[#allocation17_spill] sm:$0xff] }
 0x8a3   :  { %v6407_v6 = vmul.f32 -1.442695, %v3032_v26  ;;  %v497_v41 = vadd.f32 %v11449_v44, %v9900_v8 }
 0x8a4   :  { %v6411_v35 = vmul.f32 -1.442695, %v3033_v34  ;;  %v6415_v17 = vmul.f32 -1.442695, %v7824_v0 }
 0x8a5   :  { %8670 = vpow2.f32 %v6407_v6 }
 0x8a6   :  { %8672 = vpow2.f32 %v6411_v35 }
 0x8a7   :  { %8674 = vtanh.f32 %v7821_v61 }
 0x8a8   :  { %v8665_v40 = vpop.eup %8664 }
 0x8a9   :  { %v8667_v2 = vpop.eup %8666  ;;  %v3056_v32 = vadd.f32 1.0, %v8665_v40 }
 0x8aa   :  { %v3080_v12 = vadd.f32 1.0, %v8667_v2  ;;  %v2928_v52 = vpop.f32.mrb[60].mxu0  ;;  %v3017_v25 = vpop.f32.mrb[66].mxu1  ;;  %v11448_v2 = vld [vmem:[#allocation16_spill] sm:$0xff] }
 0x8ab   :  { %8676 = vrcp.f32 %v3056_v32  ;;  %v3036_v4 = vadd.f32 %v2928_v52, %v489_v23  ;;  %v2930_v45 = vpop.f32.mrb[61].mxu0  ;;  %v3019_v60 = vpop.f32.mrb[67].mxu1  ;;  %v495_v19 = vadd.f32 %v11448_v2, %v9896_v7 }
 0x8ac   :  { %8678 = vrcp.f32 %v3080_v12  ;;  %v3037_v26 = vadd.f32 %v2930_v45, %v491_v30  ;;  %v8669_v34 = vpop.eup %8668  ;;  %v7826_v32 = vadd.f32 %v3019_v60, %v9918_v43  ;;  %v7825_v30 = vadd.f32 %v3017_v25, %v9914_v36 }
 0x8ad   :  { %v6408_v13 = vmul.f32 -1.442695, %v3036_v4  ;;  %8680 = vpow2.f32 %v6415_v17  ;;  %v3108_v23 = vadd.f32 1.0, %v8669_v34 }
 0x8ae   :  { %v6412_v6 = vmul.f32 -1.442695, %v3037_v26  ;;  %v6416_v34 = vmul.f32 -1.442695, %v7826_v32 }
 0x8af   :  { %v8671_v35 = vpop.eup %8670  ;;  %8682 = vpow2.f32 %v6408_v13 }
 0x8b0   :  { %v8673_v40 = vpop.eup %8672  ;;  %v3057_v61 = vadd.f32 1.0, %v8671_v35  ;;  %8684 = vpow2.f32 %v6412_v6 }
 0x8b1   :  { %8686 = vtanh.f32 %v7823_v42  ;;  %v3081_v0 = vadd.f32 1.0, %v8673_v40  ;;  %v8675_v52 = vpop.eup %8674 }
 0x8b2   :  { %8688 = vrcp.f32 %v3057_v61 }
 0x8b3   :  { %8690 = vrcp.f32 %v3081_v0  ;;  %v2934_v12 = vpop.f32.mrb[62].mxu0  ;;  %v3023_v17 = vpop.f32.mrb[68].mxu1 }
 0x8b4   :  { %v3040_v4 = vadd.f32 %v2934_v12, %v495_v19  ;;  %v2936_v45 = vpop.f32.mrb[63].mxu0  ;;  %v3025_v26 = vpop.f32.mrb[69].mxu1  ;;  %8692 = vrcp.f32 %v3108_v23 }
 0x8b5   :  { %v8677_v42 = vpop.eup %8676  ;;  %v3041_v13 = vadd.f32 %v2936_v45, %v497_v41  ;;  %8694 = vtanh.f32 %v7825_v30  ;;  %v7828_v41 = vadd.f32 %v3025_v26, %v9918_v43  ;;  %v7827_v45 = vadd.f32 %v3023_v17, %v9914_v36 }
 0x8b6   :  { %v8679_v6 = vpop.eup %8678  ;;  %v3124_v7 = vmul.f32 %v8677_v42, %v8675_v52  ;;  %v6409_v35 = vmul.f32 -1.442695, %v3040_v4 }
 0x8b7   :  { %v3120_v60 = vmul.f32 %v8679_v6, %v10449_v58  ;;  %v6413_v8 = vmul.f32 -1.442695, %v3041_v13  ;;  %v8681_v40 = vpop.eup %8680  ;;  %v6417_v52 = vmul.f32 -1.442695, %v7828_v41 }
 0x8b8   :  { %8696 = vpow2.f32 %v6409_v35  ;;  %v3109_v58 = vadd.f32 1.0, %v8681_v40 }
 0x8b9   :  { %v8683_v25 = vpop.eup %8682  ;;  %8698 = vpow2.f32 %v6413_v8  ;;  %v3128_v61 = vadd.f32 %v3124_v7, %v3120_v60 }
 0x8ba   :  { %v8685_v0 = vpop.eup %8684  ;;  %v3058_v2 = vadd.f32 1.0, %v8683_v25  ;;  %8700 = vpow2.f32 %v6416_v34 }
 0x8bb   :  { %v8687_v19 = vpop.eup %8686  ;;  %v3082_v44 = vadd.f32 1.0, %v8685_v0  ;;  %8702 = vtanh.f32 %v3128_v61 }
 0x8bc   :  { %v8689_v23 = vpop.eup %8688  ;;  %8704 = vrcp.f32 %v3058_v2 }
 0x8bd   :  { %v8691_v32 = vpop.eup %8690  ;;  %v3125_v12 = vmul.f32 %v8689_v23, %v8687_v19  ;;  %8706 = vrcp.f32 %v3082_v44 }
 0x8be   :  { %v3121_v30 = vmul.f32 %v8691_v32, %v10454_v57  ;;  %v8693_v4 = vpop.eup %8692  ;;  %8708 = vrcp.f32 %v3109_v58 }
 0x8bf   :  { %v8695_v13 = vpop.eup %8694 }
 0x8c0   :  { %v3129_v42 = vadd.f32 %v3125_v12, %v3121_v30 }
 0x8c2   :  { %v8697_v6 = vpop.eup %8696  ;;  %8710 = vtanh.f32 %v3129_v42 }
 0x8c3   :  { %v8699_v7 = vpop.eup %8698  ;;  %v3059_v43 = vadd.f32 1.0, %v8697_v6  ;;  %8712 = vpow2.f32 %v6417_v52  ;;  %v11450_v6 = vld [vmem:[#allocation18_spill] sm:$0xff] }
 0x8c4   :  { %v8701_v26 = vpop.eup %8700  ;;  %8714 = vtanh.f32 %v7827_v45  ;;  %v3083_v34 = vadd.f32 1.0, %v8699_v7  ;;  %v11451_v7 = vsub.s32 0, %v11450_v6 }
 0x8c5   :  { %v8703_v35 = vpop.eup %8702  ;;  %8716 = vrcp.f32 %v3059_v43  ;;  %v3110_v25 = vadd.f32 1.0, %v8701_v26  ;;  %v11453_v26 = vsub.s32 1, %v11450_v6 }
 0x8c6   :  { %v8705_v60 = vpop.eup %8704  ;;  %8718 = vrcp.f32 %v3083_v34  ;;  %v3136_v57 = vmul.f32 %v8703_v35, %v8693_v4 }
 0x8c7   :  { %v8707_v8 = vpop.eup %8706  ;;  %v3126_v40 = vmul.f32 %v8705_v60, %v8695_v13  ;;  %8720 = vrcp.f32 %v3110_v25 }
 0x8c8   :  { %v3122_v36 = vmul.f32 %v8707_v8, %v10463_v9  ;;  %3459 = vmatmul.mubr.f32.gmra.mrb[120].mxu0 %v3136_v57  ;;  %3716 = vmatmul.mubr.f32.gmra.mrb[126].mxu1 %v3136_v57  ;;  %v8709_v61 = vpop.eup %8708 }
 0x8c9   :  { %3464 = vmatprep.mubr.f32.mxu0 %v11409_v16  ;;  %3721 = vmatprep.mubr.f32.mxu1 %v11409_v16 }
 0x8ca   :  { %v3130_v17 = vadd.f32 %v3126_v40, %v3122_v36 }
 0x8cc   :  { %v8711_v0 = vpop.eup %8710  ;;  %8722 = vtanh.f32 %v3130_v17  ;;  %v11454_v17 = vsub.s32 3, %v11450_v6 }
 0x8cd   :  { %v8713_v2 = vpop.eup %8712  ;;  %v3137_v19 = vmul.f32 %v8711_v0, %v8709_v61  ;;  %v11455_v0 = vsub.s32 2, %v11450_v6 }
 0x8ce   :  { %v8715_v44 = vpop.eup %8714  ;;  %v3111_v9 = vadd.f32 1.0, %v8713_v2 }
 0x8cf   :  { %v8717_v41 = vpop.eup %8716  ;;  %3465 = vmatmul.mubr.f32.gmra.mrb[122].mxu0 %v3137_v19  ;;  %3722 = vmatmul.mubr.f32.gmra.mrb[128].mxu1 %v3137_v19 }
 0x8d0   :  { %v8719_v23 = vpop.eup %8718  ;;  %v3127_v32 = vmul.f32 %v8717_v41, %v8715_v44  ;;  %3470 = vmatprep.mubr.f32.mxu0 %v11409_v16  ;;  %3727 = vmatprep.mubr.f32.mxu1 %v11409_v16  ;;  %8724 = vrcp.f32 %v3111_v9 }
 0x8d1   :  { %v3123_v12 = vmul.f32 %v8719_v23, %v10475_v15  ;;  %v8721_v30 = vpop.eup %8720  ;;  %v3204_v15 = vld [vmem:[%s11354_s6] sm:$0xf] }
 0x8d2   :  { %v10787_v43 = vrot.slane %v3204_v15, %v11451_v7  ;;  %v10791_v34 = vrot.slane %v3204_v15, %v11453_v26  ;;  %v10797_v61 = vrot.slane %v3204_v15, %v11454_v17  ;;  %v10801_v2 = vrot.slane %v3204_v15, %v11455_v0 }
 0x8d3   :  { %v3131_v58 = vadd.f32 %v3127_v32, %v3123_v12 }
 0x8d4   :  { %11452 = vst [vmem:[#allocation19_spill] sm:$0xff] %v10787_v43 }
 0x8d5   :  { %8726 = vtanh.f32 %v3131_v58 }
 0x8d6   :  { %v8723_v52 = vpop.eup %8722 }
 0x8d7   :  { %v3138_v4 = vmul.f32 %v8723_v52, %v8721_v30 }
 0x8d9   :  { %3471 = vmatmul.mubr.f32.gmra.mrb[124].mxu0 %v3138_v4  ;;  %3728 = vmatmul.mubr.f32.gmra.mrb[130].mxu1 %v3138_v4 }
 0x8da   :  { %3476 = vmatprep.mubr.f32.mxu0 %v11409_v16  ;;  %3733 = vmatprep.mubr.f32.mxu1 %v11409_v16  ;;  %v8725_v45 = vpop.eup %8724 }
 0x8df   :  { %v8727_v42 = vpop.eup %8726 }
 0x8e0   :  { %v3139_v13 = vmul.f32 %v8727_v42, %v8725_v45 }
 0x8e2   :  { %3477 = vmatmul.mubr.f32.gmra.mrb[126].mxu0 %v3139_v13  ;;  %3734 = vmatmul.mubr.f32.gmra.mrb[132].mxu1 %v3139_v13 }
 0x8e3   :  { %3868 = vmatprep.mubr.f32.mxu0 %v11409_v16  ;;  %3957 = vmatprep.mubr.f32.mxu1 %v11409_v16 }
 0x8e6   :  { %3869 = vmatmul.mubr.f32.vlgmr.msra.gmra.mrb[64].mxu0 %v11409_v16  ;;  %3958 = vmatmul.mubr.f32.vlgmr.msra.gmra.mrb[70].mxu1 %v11409_v16 }
 0x8e7   :  { %3874 = vmatprep.mubr.f32.mxu0 %v11409_v16  ;;  %3963 = vmatprep.mubr.f32.mxu1 %v11409_v16 }
 0x8e8   :  { %7216 = vmatpush1.bf16.msra.mxu0 %v10495_v49  ;;  %7248 = vmatpush1.bf16.msra.mxu1 %v10498_v21 }
 0x8e9   :  { %7218 = vmatprep.subr.bf16.mxu0 %v10500_v11  ;;  %7250 = vmatprep.subr.bf16.mxu1 %v10502_v24 }
 0x8ea   :  { %3875 = vmatmul.mubr.f32.gmra.mrb[66].mxu0 %v11409_v16  ;;  %3964 = vmatmul.mubr.f32.gmra.mrb[72].mxu1 %v11409_v16 }
 0x8eb   :  { %3880 = vmatprep.mubr.f32.mxu0 %v11409_v16  ;;  %3969 = vmatprep.mubr.f32.mxu1 %v11409_v16 }
 0x8ec   :  { %7220 = vmatpush1.bf16.msra.mxu0 %v10510_v47  ;;  %7252 = vmatpush1.bf16.msra.mxu1 %v10512_v56 }
 0x8ed   :  { %7222 = vmatprep.subr.bf16.mxu0 %v10516_v29  ;;  %7254 = vmatprep.subr.bf16.mxu1 %v10518_v14 }
 0x8ee   :  { %3881 = vmatmul.mubr.f32.gmra.mrb[68].mxu0 %v11409_v16  ;;  %3970 = vmatmul.mubr.f32.gmra.mrb[74].mxu1 %v11409_v16 }
 0x8ef   :  { %3886 = vmatprep.mubr.f32.mxu0 %v11409_v16  ;;  %3975 = vmatprep.mubr.f32.mxu1 %v11409_v16 }
 0x8f0   :  { %7224 = vmatpush1.bf16.msra.mxu0 %v10526_v53  ;;  %7256 = vmatpush1.bf16.msra.mxu1 %v10528_v1 }
 0x8f1   :  { %7226 = vmatprep.subr.bf16.mxu0 %v10532_v3  ;;  %7258 = vmatprep.subr.bf16.mxu1 %v10534_v20 }
 0x8f2   :  { %3887 = vmatmul.mubr.f32.gmra.mrb[70].mxu0 %v11409_v16  ;;  %3976 = vmatmul.mubr.f32.gmra.mrb[76].mxu1 %v11409_v16 }
 0x8f3   :  { %4158 = vmatprep.mubr.f32.mxu0 %v11409_v16  ;;  %4247 = vmatprep.mubr.f32.mxu1 %v11409_v16 }
 0x8f4   :  { %7228 = vmatpush1.bf16.msra.mxu0 %v10542_v54  ;;  %7260 = vmatpush1.bf16.msra.mxu1 %v10544_v5 }
 0x8f5   :  { %7230 = vmatprep.subr.bf16.mxu0 %v10548_v59  ;;  %7262 = vmatprep.subr.bf16.mxu1 %v10652_v51 }
 0x8f8   :  { %7232 = vmatpush1.bf16.msra.mxu0 %v10621_v22  ;;  %7264 = vmatpush1.bf16.msra.mxu1 %v10656_v48 }
 0x8f9   :  { %7234 = vmatprep.subr.bf16.mxu0 %v10654_v37  ;;  %7266 = vmatprep.subr.bf16.mxu1 %v10664_v33 }
 0x8fc   :  { %7236 = vmatpush1.bf16.msra.mxu0 %v10660_v46  ;;  %7268 = vmatpush1.bf16.msra.mxu1 %v10670_v50 }
 0x8fd   :  { %7238 = vmatprep.subr.bf16.mxu0 %v10666_v39  ;;  %7270 = vmatprep.subr.bf16.mxu1 %v10676_v18 }
 0x900   :  { %7240 = vmatpush1.bf16.msra.mxu0 %v10674_v10  ;;  %7272 = vmatpush1.bf16.msra.mxu1 %v10684_v62 }
 0x901   :  { %7242 = vmatprep.subr.bf16.mxu0 %v10680_v31  ;;  %7274 = vmatprep.subr.bf16.mxu1 %v10693_v28 }
 0x904   :  { %7244 = vmatpush1.bf16.msra.mxu0 %v10686_v63  ;;  %7276 = vmatpush1.bf16.msra.mxu1 %v10695_v38 }
 0x905   :  { %7278 = vmatprep.subr.bf16.mxu0 %v10488_v27  ;;  %7310 = vmatprep.subr.bf16.mxu1 %v10490_v55 }
 0x9b9   :  { %v3870_v35 = vpop.f32.mrb[64].mxu0  ;;  %v3959_v60 = vpop.f32.mrb[70].mxu1 }
 0x9ba   :  { %v7829_v57 = vadd.f32 %v3870_v35, %v10787_v43  ;;  %v3872_v8 = vpop.f32.mrb[65].mxu0  ;;  %v3961_v40 = vpop.f32.mrb[71].mxu1  ;;  %v7893_v52 = vadd.f32 %v3959_v60, %v10801_v2 }
 0x9bb   :  { %v7830_v25 = vadd.f32 %v3872_v8, %v10791_v34  ;;  %v7894_v58 = vadd.f32 %v3961_v40, %v10797_v61 }
 0x9bc   :  { %v6418_v36 = vmul.f32 -1.442695, %v7829_v57 }
 0x9bd   :  { %v6422_v19 = vmul.f32 -1.442695, %v7830_v25  ;;  %v3876_v44 = vpop.f32.mrb[66].mxu0  ;;  %v3965_v41 = vpop.f32.mrb[72].mxu1  ;;  %v6426_v26 = vmul.f32 -1.442695, %v7894_v58 }
 0x9be   :  { %8728 = vpow2.f32 %v6418_v36  ;;  %v7831_v23 = vadd.f32 %v3876_v44, %v10787_v43  ;;  %v3878_v32 = vpop.f32.mrb[67].mxu0  ;;  %v3967_v9 = vpop.f32.mrb[73].mxu1  ;;  %v7895_v57 = vadd.f32 %v3965_v41, %v10801_v2 }
 0x9bf   :  { %8730 = vpow2.f32 %v6422_v19  ;;  %v7832_v12 = vadd.f32 %v3878_v32, %v10791_v34  ;;  %v7896_v8 = vadd.f32 %v3967_v9, %v10797_v61 }
 0x9c0   :  { %v6419_v30 = vmul.f32 -1.442695, %v7831_v23 }
 0x9c1   :  { %v6423_v4 = vmul.f32 -1.442695, %v7832_v12  ;;  %v3882_v45 = vpop.f32.mrb[68].mxu0  ;;  %v3971_v42 = vpop.f32.mrb[74].mxu1  ;;  %v6427_v41 = vmul.f32 -1.442695, %v7896_v8 }
 0x9c2   :  { %8732 = vpow2.f32 %v6419_v30  ;;  %v7833_v13 = vadd.f32 %v3882_v45, %v10787_v43  ;;  %v3884_v15 = vpop.f32.mrb[69].mxu0  ;;  %v3973_v6 = vpop.f32.mrb[75].mxu1 }
 0x9c3   :  { %8734 = vpow2.f32 %v6423_v4  ;;  %v7834_v7 = vadd.f32 %v3884_v15, %v10791_v34  ;;  %v7898_v9 = vadd.f32 %v3973_v6, %v10797_v61 }
 0x9c4   :  { %v6420_v35 = vmul.f32 -1.442695, %v7833_v13  ;;  %8736 = vtanh.f32 %v7893_v52 }
 0x9c5   :  { %v6424_v40 = vmul.f32 -1.442695, %v7834_v7  ;;  %v3888_v60 = vpop.f32.mrb[70].mxu0  ;;  %v3977_v25 = vpop.f32.mrb[76].mxu1  ;;  %v6428_v13 = vmul.f32 -1.442695, %v7898_v9  ;;  %v7897_v7 = vadd.f32 %v3971_v42, %v10801_v2 }
 0x9c6   :  { %8738 = vpow2.f32 %v6420_v35  ;;  %v7835_v36 = vadd.f32 %v3888_v60, %v10787_v43  ;;  %v3890_v17 = vpop.f32.mrb[71].mxu0  ;;  %v3979_v0 = vpop.f32.mrb[77].mxu1 }
 0x9c7   :  { %8740 = vpow2.f32 %v6424_v40  ;;  %v7836_v19 = vadd.f32 %v3890_v17, %v10791_v34  ;;  %v7900_v8 = vadd.f32 %v3979_v0, %v10797_v61 }
 0x9c8   :  { %v8729_v44 = vpop.eup %8728  ;;  %8742 = vpow2.f32 %v6426_v26  ;;  %v6421_v23 = vmul.f32 -1.442695, %v7835_v36  ;;  %v7899_v36 = vadd.f32 %v3977_v25, %v10801_v2 }
 0x9c9   :  { %v8731_v32 = vpop.eup %8730  ;;  %v4010_v12 = vadd.f32 1.0, %v8729_v44  ;;  %8744 = vtanh.f32 %v7895_v57  ;;  %v6425_v30 = vmul.f32 -1.442695, %v7836_v19 }
 0x9ca   :  { %v4034_v58 = vadd.f32 1.0, %v8731_v32  ;;  %8746 = vpow2.f32 %v6421_v23  ;;  %v6429_v23 = vmul.f32 -1.442695, %v7900_v8 }
 0x9cb   :  { %8748 = vrcp.f32 %v4010_v12 }
 0x9cc   :  { %v8733_v52 = vpop.eup %8732  ;;  %8750 = vrcp.f32 %v4034_v58 }
 0x9cd   :  { %v8735_v4 = vpop.eup %8734  ;;  %v4011_v45 = vadd.f32 1.0, %v8733_v52  ;;  %8752 = vpow2.f32 %v6427_v41 }
 0x9ce   :  { %v4035_v15 = vadd.f32 1.0, %v8735_v4  ;;  %8754 = vpow2.f32 %v6425_v30  ;;  %v8737_v26 = vpop.eup %8736 }
 0x9cf   :  { %8756 = vrcp.f32 %v4011_v45 }
 0x9d0   :  { %v8739_v35 = vpop.eup %8738  ;;  %8758 = vrcp.f32 %v4035_v15 }
 0x9d1   :  { %v8741_v57 = vpop.eup %8740  ;;  %v4012_v6 = vadd.f32 1.0, %v8739_v35  ;;  %8760 = vpow2.f32 %v6428_v13 }
 0x9d2   :  { %v8743_v40 = vpop.eup %8742  ;;  %8762 = vtanh.f32 %v7897_v7  ;;  %v4036_v60 = vadd.f32 1.0, %v8741_v57 }
 0x9d3   :  { %v8745_v17 = vpop.eup %8744  ;;  %8764 = vrcp.f32 %v4012_v6  ;;  %v4062_v41 = vadd.f32 1.0, %v8743_v40 }
 0x9d4   :  { %v8747_v19 = vpop.eup %8746  ;;  %8766 = vrcp.f32 %v4036_v60 }
 0x9d5   :  { %v8749_v42 = vpop.eup %8748  ;;  %v4013_v44 = vadd.f32 1.0, %v8747_v19  ;;  %8768 = vtanh.f32 %v7899_v36 }
 0x9d6   :  { %v8751_v32 = vpop.eup %8750  ;;  %v4078_v12 = vmul.f32 %v8749_v42, %v8737_v26 }
 0x9d7   :  { %v8753_v9 = vpop.eup %8752  ;;  %v4074_v58 = vmul.f32 0.0, %v8751_v32  ;;  %8770 = vrcp.f32 %v4013_v44 }
 0x9d8   :  { %v8755_v0 = vpop.eup %8754  ;;  %8772 = vpow2.f32 %v6429_v23  ;;  %v4063_v13 = vadd.f32 1.0, %v8753_v9 }
 0x9d9   :  { %v8757_v30 = vpop.eup %8756  ;;  %v10817_v52 = vadd.f32 %v4078_v12, %v4074_v58  ;;  %v4037_v4 = vadd.f32 1.0, %v8755_v0  ;;  %8774 = vrcp.f32 %v4062_v41 }
 0x9da   :  { %v8759_v25 = vpop.eup %8758  ;;  %v4079_v45 = vmul.f32 %v8757_v30, %v8745_v17 }
 0x9db   :  { %v8761_v15 = vpop.eup %8760  ;;  %8776 = vtanh.f32 %v10817_v52  ;;  %v4075_v7 = vmul.f32 0.0, %v8759_v25 }
 0x9dc   :  { %v8763_v26 = vpop.eup %8762  ;;  %8778 = vrcp.f32 %v4037_v4  ;;  %v4064_v40 = vadd.f32 1.0, %v8761_v15 }
 0x9dd   :  { %v8765_v35 = vpop.eup %8764  ;;  %v10820_v57 = vadd.f32 %v4079_v45, %v4075_v7  ;;  %8780 = vrcp.f32 %v4063_v13 }
 0x9de   :  { %v8767_v6 = vpop.eup %8766  ;;  %v4080_v8 = vmul.f32 %v8765_v35, %v8763_v26 }
 0x9df   :  { %8782 = vtanh.f32 %v10820_v57  ;;  %v4076_v60 = vmul.f32 0.0, %v8767_v6  ;;  %v8769_v36 = vpop.eup %8768 }
 0x9e0   :  { %8784 = vrcp.f32 %v4064_v40 }
 0x9e1   :  { %v8771_v19 = vpop.eup %8770  ;;  %v10823_v17 = vadd.f32 %v4080_v8, %v4076_v60 }
 0x9e2   :  { %v4081_v42 = vmul.f32 %v8771_v19, %v8769_v36  ;;  %v8773_v44 = vpop.eup %8772 }
 0x9e3   :  { %8786 = vtanh.f32 %v10823_v17  ;;  %v8775_v23 = vpop.eup %8774  ;;  %v4065_v41 = vadd.f32 1.0, %v8773_v44 }
 0x9e5   :  { %v8777_v32 = vpop.eup %8776  ;;  %8788 = vrcp.f32 %v4065_v41 }
 0x9e6   :  { %v8779_v12 = vpop.eup %8778  ;;  %v4090_v9 = vmul.f32 %v8777_v32, %v8775_v23 }
 0x9e7   :  { %v4077_v58 = vmul.f32 0.0, %v8779_v12  ;;  %v8781_v0 = vpop.eup %8780 }
 0x9e8   :  { %4159 = vmatmul.mubr.f32.vlgmr.msra.gmra.mrb[72].mxu0 %v4090_v9  ;;  %4248 = vmatmul.mubr.f32.vlgmr.msra.gmra.mrb[78].mxu1 %v4090_v9 }
 0x9e9   :  { %v8783_v30 = vpop.eup %8782  ;;  %v10826_v4 = vadd.f32 %v4081_v42, %v4077_v58  ;;  %4164 = vmatprep.mubr.f32.mxu0 %v11409_v16  ;;  %4253 = vmatprep.mubr.f32.mxu1 %v11409_v16 }
 0x9ea   :  { %v4091_v25 = vmul.f32 %v8783_v30, %v8781_v0  ;;  %7280 = vmatpush1.bf16.msra.mxu0 %v10495_v49  ;;  %7312 = vmatpush1.bf16.msra.mxu1 %v10498_v21  ;;  %v8785_v45 = vpop.eup %8784 }
 0x9eb   :  { %8790 = vtanh.f32 %v10826_v4  ;;  %7282 = vmatprep.subr.bf16.mxu0 %v10500_v11  ;;  %7314 = vmatprep.subr.bf16.mxu1 %v10502_v24 }
 0x9ec   :  { %4165 = vmatmul.mubr.f32.gmra.mrb[74].mxu0 %v4091_v25  ;;  %4254 = vmatmul.mubr.f32.gmra.mrb[80].mxu1 %v4091_v25 }
 0x9ed   :  { %v8787_v13 = vpop.eup %8786  ;;  %4170 = vmatprep.mubr.f32.mxu0 %v11409_v16  ;;  %4259 = vmatprep.mubr.f32.mxu1 %v11409_v16 }
 0x9ee   :  { %v4092_v15 = vmul.f32 %v8787_v13, %v8785_v45  ;;  %7284 = vmatpush1.bf16.msra.mxu0 %v10510_v47  ;;  %7316 = vmatpush1.bf16.msra.mxu1 %v10512_v56 }
 0x9ef   :  { %7286 = vmatprep.subr.bf16.mxu0 %v10516_v29  ;;  %7318 = vmatprep.subr.bf16.mxu1 %v10518_v14  ;;  %v8789_v7 = vpop.eup %8788 }
 0x9f0   :  { %4171 = vmatmul.mubr.f32.gmra.mrb[76].mxu0 %v4092_v15  ;;  %4260 = vmatmul.mubr.f32.gmra.mrb[82].mxu1 %v4092_v15 }
 0x9f1   :  { %4176 = vmatprep.mubr.f32.mxu0 %v11409_v16  ;;  %4265 = vmatprep.mubr.f32.mxu1 %v11409_v16 }
 0x9f2   :  { %7288 = vmatpush1.bf16.msra.mxu0 %v10526_v53  ;;  %7320 = vmatpush1.bf16.msra.mxu1 %v10528_v1 }
 0x9f3   :  { %7290 = vmatprep.subr.bf16.mxu0 %v10532_v3  ;;  %7322 = vmatprep.subr.bf16.mxu1 %v10534_v20 }
 0x9f5   :  { %v8791_v26 = vpop.eup %8790 }
 0x9f6   :  { %v4093_v35 = vmul.f32 %v8791_v26, %v8789_v7  ;;  %7292 = vmatpush1.bf16.msra.mxu0 %v10542_v54  ;;  %7324 = vmatpush1.bf16.msra.mxu1 %v10544_v5 }
 0x9f7   :  { %7294 = vmatprep.subr.bf16.mxu0 %v10548_v59  ;;  %7326 = vmatprep.subr.bf16.mxu1 %v10652_v51 }
 0x9f8   :  { %4177 = vmatmul.mubr.f32.gmra.mrb[78].mxu0 %v4093_v35  ;;  %4266 = vmatmul.mubr.f32.gmra.mrb[84].mxu1 %v4093_v35 }
 0x9f9   :  { %4448 = vmatprep.mubr.f32.mxu0 %v11409_v16  ;;  %4537 = vmatprep.mubr.f32.mxu1 %v11409_v16 }
 0x9fa   :  { %7296 = vmatpush1.bf16.msra.mxu0 %v10621_v22  ;;  %7328 = vmatpush1.bf16.msra.mxu1 %v10656_v48 }
 0x9fb   :  { %7298 = vmatprep.subr.bf16.mxu0 %v10654_v37  ;;  %7330 = vmatprep.subr.bf16.mxu1 %v10664_v33 }
 0x9fe   :  { %7300 = vmatpush1.bf16.msra.mxu0 %v10660_v46  ;;  %7332 = vmatpush1.bf16.msra.mxu1 %v10670_v50 }
 0x9ff   :  { %7302 = vmatprep.subr.bf16.mxu0 %v10666_v39  ;;  %7334 = vmatprep.subr.bf16.mxu1 %v10676_v18 }
 0xa02   :  { %7304 = vmatpush1.bf16.msra.mxu0 %v10674_v10  ;;  %7336 = vmatpush1.bf16.msra.mxu1 %v10684_v62 }
 0xa03   :  { %7306 = vmatprep.subr.bf16.mxu0 %v10680_v31  ;;  %7338 = vmatprep.subr.bf16.mxu1 %v10693_v28 }
 0xa06   :  { %7308 = vmatpush1.bf16.msra.mxu0 %v10686_v63  ;;  %7340 = vmatpush1.bf16.msra.mxu1 %v10695_v38 }
 0xa07   :  { %7342 = vmatprep.subr.bf16.mxu0 %v10488_v27  ;;  %7374 = vmatprep.subr.bf16.mxu1 %v10490_v55 }
 0xabb   :  { %v4160_v6 = vpop.f32.mrb[72].mxu0  ;;  %v4249_v8 = vpop.f32.mrb[78].mxu1 }
 0xabc   :  { %v7837_v40 = vadd.f32 %v4160_v6, %v10787_v43  ;;  %v4162_v60 = vpop.f32.mrb[73].mxu0  ;;  %v4251_v36 = vpop.f32.mrb[79].mxu1 }
 0xabd   :  { %v7838_v19 = vadd.f32 %v4162_v60, %v10791_v34  ;;  %v7902_v0 = vadd.f32 %v4251_v36, %v10797_v61  ;;  %v7901_v60 = vadd.f32 %v4249_v8, %v10801_v2 }
 0xabe   :  { %v6430_v42 = vmul.f32 -1.442695, %v7837_v40 }
 0xabf   :  { %v6434_v44 = vmul.f32 -1.442695, %v7838_v19  ;;  %v4166_v23 = vpop.f32.mrb[74].mxu0  ;;  %v4255_v32 = vpop.f32.mrb[80].mxu1  ;;  %v6438_v6 = vmul.f32 -1.442695, %v7902_v0 }
 0xac0   :  { %8792 = vpow2.f32 %v6430_v42  ;;  %v7839_v12 = vadd.f32 %v4166_v23, %v10787_v43  ;;  %v4168_v41 = vpop.f32.mrb[75].mxu0  ;;  %v4257_v9 = vpop.f32.mrb[81].mxu1  ;;  %v7903_v36 = vadd.f32 %v4255_v32, %v10801_v2 }
 0xac1   :  { %8794 = vpow2.f32 %v6434_v44  ;;  %v7840_v58 = vadd.f32 %v4168_v41, %v10791_v34  ;;  %v7904_v19 = vadd.f32 %v4257_v9, %v10797_v61 }
 0xac2   :  { %v6431_v30 = vmul.f32 -1.442695, %v7839_v12 }
 0xac3   :  { %v6435_v25 = vmul.f32 -1.442695, %v7840_v58  ;;  %v4172_v45 = vpop.f32.mrb[76].mxu0  ;;  %v4261_v13 = vpop.f32.mrb[82].mxu1  ;;  %v6439_v41 = vmul.f32 -1.442695, %v7904_v19 }
 0xac4   :  { %8796 = vpow2.f32 %v6431_v30  ;;  %v7841_v15 = vadd.f32 %v4172_v45, %v10787_v43  ;;  %v4174_v7 = vpop.f32.mrb[77].mxu0  ;;  %v4263_v26 = vpop.f32.mrb[83].mxu1 }
 0xac5   :  { %8798 = vpow2.f32 %v6435_v25  ;;  %v7842_v35 = vadd.f32 %v4174_v7, %v10791_v34  ;;  %v7906_v0 = vadd.f32 %v4263_v26, %v10797_v61 }
 0xac6   :  { %v6432_v40 = vmul.f32 -1.442695, %v7841_v15 }
 0xac7   :  { %v6436_v42 = vmul.f32 -1.442695, %v7842_v35 }
 0xac8   :  { %8800 = vpow2.f32 %v6432_v40 }
 0xac9   :  { %8802 = vpow2.f32 %v6436_v42 }
 0xaca   :  { %v8793_v44 = vpop.eup %8792  ;;  %8804 = vpow2.f32 %v6438_v6  ;;  %v7905_v6 = vadd.f32 %v4261_v13, %v10801_v2 }
 0xacb   :  { %v8795_v23 = vpop.eup %8794  ;;  %v4300_v12 = vadd.f32 1.0, %v8793_v44  ;;  %8806 = vtanh.f32 %v7901_v60  ;;  %v4178_v58 = vpop.f32.mrb[78].mxu0  ;;  %v6440_v60 = vmul.f32 -1.442695, %v7906_v0 }
 0xacc   :  { %v4267_v30 = vpop.f32.mrb[84].mxu1  ;;  %v4324_v25 = vadd.f32 1.0, %v8795_v23  ;;  %8808 = vtanh.f32 %v7903_v36  ;;  %v7843_v8 = vadd.f32 %v4178_v58, %v10787_v43  ;;  %v4180_v9 = vpop.f32.mrb[79].mxu0 }
 0xacd   :  { %v4269_v45 = vpop.f32.mrb[85].mxu1  ;;  %8810 = vrcp.f32 %v4300_v12  ;;  %v7844_v19 = vadd.f32 %v4180_v9, %v10791_v34  ;;  %v7907_v9 = vadd.f32 %v4267_v30, %v10801_v2 }
 0xace   :  { %v8797_v32 = vpop.eup %8796  ;;  %8812 = vrcp.f32 %v4324_v25  ;;  %v6433_v15 = vmul.f32 -1.442695, %v7843_v8 }
 0xacf   :  { %v8799_v7 = vpop.eup %8798  ;;  %v4301_v35 = vadd.f32 1.0, %v8797_v32  ;;  %8814 = vpow2.f32 %v6439_v41  ;;  %v6437_v12 = vmul.f32 -1.442695, %v7844_v19 }
 0xad0   :  { %v4325_v40 = vadd.f32 1.0, %v8799_v7  ;;  %8816 = vpow2.f32 %v6433_v15 }
 0xad1   :  { %8818 = vrcp.f32 %v4301_v35  ;;  %v7908_v35 = vadd.f32 %v4269_v45, %v10797_v61 }
 0xad2   :  { %v8801_v26 = vpop.eup %8800  ;;  %8820 = vrcp.f32 %v4325_v40 }
 0xad3   :  { %v8803_v42 = vpop.eup %8802  ;;  %v4302_v36 = vadd.f32 1.0, %v8801_v26  ;;  %8822 = vtanh.f32 %v7905_v6 }
 0xad4   :  { %v8805_v44 = vpop.eup %8804  ;;  %v4326_v23 = vadd.f32 1.0, %v8803_v42  ;;  %8824 = vpow2.f32 %v6440_v60 }
 0xad5   :  { %v8807_v58 = vpop.eup %8806  ;;  %8826 = vrcp.f32 %v4302_v36  ;;  %v4352_v25 = vadd.f32 1.0, %v8805_v44 }
 0xad6   :  { %v8809_v41 = vpop.eup %8808  ;;  %8828 = vrcp.f32 %v4326_v23 }
 0xad7   :  { %v8811_v13 = vpop.eup %8810  ;;  %8830 = vpow2.f32 %v6437_v12 }
 0xad8   :  { %v8813_v0 = vpop.eup %8812  ;;  %v4368_v8 = vmul.f32 %v8811_v13, %v8807_v58  ;;  %8832 = vrcp.f32 %v4352_v25 }
 0xad9   :  { %v8815_v32 = vpop.eup %8814  ;;  %v4364_v15 = vmul.f32 %v8813_v0, %v10817_v52  ;;  %8834 = vtanh.f32 %v7907_v9  ;;  %v6441_v52 = vmul.f32 -1.442695, %v7908_v35 }
 0xada   :  { %v8817_v7 = vpop.eup %8816  ;;  %v4353_v42 = vadd.f32 1.0, %v8815_v32 }
 0xadb   :  { %v8819_v6 = vpop.eup %8818  ;;  %v10886_v40 = vadd.f32 %v4368_v8, %v4364_v15  ;;  %v4303_v60 = vadd.f32 1.0, %v8817_v7 }
 0xadc   :  { %v8821_v19 = vpop.eup %8820  ;;  %v4369_v26 = vmul.f32 %v8819_v6, %v8809_v41 }
 0xadd   :  { %v8823_v36 = vpop.eup %8822  ;;  %8836 = vtanh.f32 %v10886_v40  ;;  %v4365_v30 = vmul.f32 %v8821_v19, %v10820_v57 }
 0xade   :  { %v8825_v44 = vpop.eup %8824  ;;  %8838 = vrcp.f32 %v4303_v60 }
 0xadf   :  { %v8827_v23 = vpop.eup %8826  ;;  %v10890_v12 = vadd.f32 %v4369_v26, %v4365_v30  ;;  %8840 = vrcp.f32 %v4353_v42  ;;  %v4354_v25 = vadd.f32 1.0, %v8825_v44 }
 0xae0   :  { %v8829_v45 = vpop.eup %8828  ;;  %v4370_v58 = vmul.f32 %v8827_v23, %v8823_v36 }
 0xae1   :  { %v4366_v13 = vmul.f32 %v8829_v45, %v10823_v17  ;;  %8842 = vtanh.f32 %v10890_v12  ;;  %v8831_v41 = vpop.eup %8830 }
 0xae2   :  { %8844 = vpow2.f32 %v6441_v52  ;;  %v4327_v0 = vadd.f32 1.0, %v8831_v41  ;;  %v8833_v57 = vpop.eup %8832 }
 0xae3   :  { %v10894_v8 = vadd.f32 %v4370_v58, %v4366_v13  ;;  %v8835_v9 = vpop.eup %8834 }
 0xae4   :  { %8846 = vrcp.f32 %v4327_v0 }
 0xae5   :  { %8848 = vrcp.f32 %v4354_v25 }
 0xae6   :  { %8850 = vtanh.f32 %v10894_v8 }
 0xae7   :  { %v8837_v32 = vpop.eup %8836 }
 0xae8   :  { %v8839_v15 = vpop.eup %8838  ;;  %v4380_v7 = vmul.f32 %v8837_v32, %v8833_v57 }
 0xae9   :  { %v4371_v35 = vmul.f32 %v8839_v15, %v8835_v9  ;;  %v8841_v6 = vpop.eup %8840 }
 0xaea   :  { %4449 = vmatmul.mubr.f32.vlgmr.msra.gmra.mrb[80].mxu0 %v4380_v7  ;;  %4538 = vmatmul.mubr.f32.vlgmr.msra.gmra.mrb[86].mxu1 %v4380_v7 }
 0xaeb   :  { %v8843_v17 = vpop.eup %8842  ;;  %4454 = vmatprep.mubr.f32.mxu0 %v11409_v16  ;;  %4543 = vmatprep.mubr.f32.mxu1 %v11409_v16 }
 0xaec   :  { %v8845_v60 = vpop.eup %8844  ;;  %v4381_v19 = vmul.f32 %v8843_v17, %v8841_v6  ;;  %7344 = vmatpush1.bf16.msra.mxu0 %v10495_v49  ;;  %7376 = vmatpush1.bf16.msra.mxu1 %v10498_v21 }
 0xaed   :  { %7346 = vmatprep.subr.bf16.mxu0 %v10500_v11  ;;  %7378 = vmatprep.subr.bf16.mxu1 %v10502_v24  ;;  %v4355_v42 = vadd.f32 1.0, %v8845_v60 }
 0xaee   :  { %4455 = vmatmul.mubr.f32.gmra.mrb[82].mxu0 %v4381_v19  ;;  %4544 = vmatmul.mubr.f32.gmra.mrb[88].mxu1 %v4381_v19  ;;  %v8847_v26 = vpop.eup %8846 }
 0xaef   :  { %4460 = vmatprep.mubr.f32.mxu0 %v11409_v16  ;;  %4549 = vmatprep.mubr.f32.mxu1 %v11409_v16  ;;  %v8849_v36 = vpop.eup %8848  ;;  %v4367_v30 = vmul.f32 %v8847_v26, %v10826_v4  ;;  %8852 = vrcp.f32 %v4355_v42 }
 0xaf0   :  { %7348 = vmatpush1.bf16.msra.mxu0 %v10510_v47  ;;  %7380 = vmatpush1.bf16.msra.mxu1 %v10512_v56  ;;  %v8851_v44 = vpop.eup %8850 }
 0xaf1   :  { %7350 = vmatprep.subr.bf16.mxu0 %v10516_v29  ;;  %7382 = vmatprep.subr.bf16.mxu1 %v10518_v14  ;;  %v4382_v52 = vmul.f32 %v8851_v44, %v8849_v36  ;;  %v10910_v23 = vadd.f32 %v4371_v35, %v4367_v30 }
 0xaf3   :  { %4461 = vmatmul.mubr.f32.gmra.mrb[84].mxu0 %v4382_v52  ;;  %4550 = vmatmul.mubr.f32.gmra.mrb[90].mxu1 %v4382_v52  ;;  %8854 = vtanh.f32 %v10910_v23 }
 0xaf4   :  { %4466 = vmatprep.mubr.f32.mxu0 %v11409_v16  ;;  %4555 = vmatprep.mubr.f32.mxu1 %v11409_v16 }
 0xaf5   :  { %7352 = vmatpush1.bf16.msra.mxu0 %v10526_v53  ;;  %7384 = vmatpush1.bf16.msra.mxu1 %v10528_v1 }
 0xaf6   :  { %7354 = vmatprep.subr.bf16.mxu0 %v10532_v3  ;;  %7386 = vmatprep.subr.bf16.mxu1 %v10534_v20 }
 0xaf9   :  { %7356 = vmatpush1.bf16.msra.mxu0 %v10542_v54  ;;  %7388 = vmatpush1.bf16.msra.mxu1 %v10544_v5  ;;  %v8853_v4 = vpop.eup %8852 }
 0xafa   :  { %7358 = vmatprep.subr.bf16.mxu0 %v10548_v59  ;;  %7390 = vmatprep.subr.bf16.mxu1 %v10652_v51 }
 0xafd   :  { %v8855_v45 = vpop.eup %8854  ;;  %7360 = vmatpush1.bf16.msra.mxu0 %v10621_v22  ;;  %7392 = vmatpush1.bf16.msra.mxu1 %v10656_v48 }
 0xafe   :  { %v4383_v58 = vmul.f32 %v8855_v45, %v8853_v4  ;;  %7362 = vmatprep.subr.bf16.mxu0 %v10654_v37  ;;  %7394 = vmatprep.subr.bf16.mxu1 %v10664_v33 }
 0xb00   :  { %4467 = vmatmul.mubr.f32.gmra.mrb[86].mxu0 %v4383_v58  ;;  %4556 = vmatmul.mubr.f32.gmra.mrb[92].mxu1 %v4383_v58 }
 0xb01   :  { %7364 = vmatpush1.bf16.msra.mxu0 %v10660_v46  ;;  %7396 = vmatpush1.bf16.msra.mxu1 %v10670_v50 }
 0xb02   :  { %7366 = vmatprep.subr.bf16.mxu0 %v10666_v39  ;;  %7398 = vmatprep.subr.bf16.mxu1 %v10676_v18 }
 0xb03   :  { %4738 = vmatprep.mubr.f32.mxu0 %v11409_v16  ;;  %4827 = vmatprep.mubr.f32.mxu1 %v11409_v16 }
 0xb05   :  { %7368 = vmatpush1.bf16.msra.mxu0 %v10674_v10  ;;  %7400 = vmatpush1.bf16.msra.mxu1 %v10684_v62 }
 0xb06   :  { %7370 = vmatprep.subr.bf16.mxu0 %v10680_v31  ;;  %7402 = vmatprep.subr.bf16.mxu1 %v10693_v28 }
 0xb09   :  { %7372 = vmatpush1.bf16.msra.mxu0 %v10686_v63  ;;  %7404 = vmatpush1.bf16.msra.mxu1 %v10695_v38 }
 0xb0a   :  { %7406 = vmatprep.subr.bf16.mxu0 %v10488_v27  ;;  %7438 = vmatprep.subr.bf16.mxu1 %v10490_v55 }
 0xbbd   :  { %v4450_v13 = vpop.f32.mrb[80].mxu0  ;;  %v4539_v41 = vpop.f32.mrb[86].mxu1 }
 0xbbe   :  { %v7845_v25 = vadd.f32 %v4450_v13, %v10787_v43  ;;  %v4452_v0 = vpop.f32.mrb[81].mxu0  ;;  %v4541_v57 = vpop.f32.mrb[87].mxu1 }
 0xbbf   :  { %v7846_v9 = vadd.f32 %v4452_v0, %v10791_v34  ;;  %v7910_v19 = vadd.f32 %v4541_v57, %v10797_v61  ;;  %v7909_v0 = vadd.f32 %v4539_v41, %v10801_v2 }
 0xbc0   :  { %v6442_v32 = vmul.f32 -1.442695, %v7845_v25 }
 0xbc1   :  { %v6446_v15 = vmul.f32 -1.442695, %v7846_v9  ;;  %v4456_v7 = vpop.f32.mrb[82].mxu0  ;;  %v4545_v35 = vpop.f32.mrb[88].mxu1  ;;  %v6450_v30 = vmul.f32 -1.442695, %v7910_v19 }
 0xbc2   :  { %8856 = vpow2.f32 %v6442_v32  ;;  %v7847_v6 = vadd.f32 %v4456_v7, %v10787_v43  ;;  %v4458_v17 = vpop.f32.mrb[83].mxu0  ;;  %v4547_v60 = vpop.f32.mrb[89].mxu1  ;;  %v7911_v19 = vadd.f32 %v4545_v35, %v10801_v2 }
 0xbc3   :  { %8858 = vpow2.f32 %v6446_v15  ;;  %v7848_v26 = vadd.f32 %v4458_v17, %v10791_v34  ;;  %v7912_v13 = vadd.f32 %v4547_v60, %v10797_v61 }
 0xbc4   :  { %v6443_v42 = vmul.f32 -1.442695, %v7847_v6 }
 0xbc5   :  { %v6447_v36 = vmul.f32 -1.442695, %v7848_v26  ;;  %v6451_v6 = vmul.f32 -1.442695, %v7912_v13 }
 0xbc6   :  { %8860 = vpow2.f32 %v6443_v42  ;;  %v4462_v44 = vpop.f32.mrb[84].mxu0  ;;  %v4551_v52 = vpop.f32.mrb[90].mxu1 }
 0xbc7   :  { %8862 = vpow2.f32 %v6447_v36  ;;  %v7849_v4 = vadd.f32 %v4462_v44, %v10787_v43  ;;  %v4464_v45 = vpop.f32.mrb[85].mxu0  ;;  %v4553_v58 = vpop.f32.mrb[91].mxu1 }
 0xbc8   :  { %v7850_v25 = vadd.f32 %v4464_v45, %v10791_v34  ;;  %8864 = vpow2.f32 %v6450_v30  ;;  %v7914_v60 = vadd.f32 %v4553_v58, %v10797_v61  ;;  %v7913_v30 = vadd.f32 %v4551_v52, %v10801_v2 }
 0xbc9   :  { %v6444_v57 = vmul.f32 -1.442695, %v7849_v4 }
 0xbca   :  { %v6448_v9 = vmul.f32 -1.442695, %v7850_v25  ;;  %v6452_v44 = vmul.f32 -1.442695, %v7914_v60 }
 0xbcb   :  { %8866 = vpow2.f32 %v6444_v57 }
 0xbcc   :  { %v8857_v32 = vpop.eup %8856  ;;  %8868 = vpow2.f32 %v6448_v9 }
 0xbcd   :  { %v8859_v15 = vpop.eup %8858  ;;  %v4590_v7 = vadd.f32 1.0, %v8857_v32  ;;  %8870 = vtanh.f32 %v7909_v0 }
 0xbce   :  { %v4614_v17 = vadd.f32 1.0, %v8859_v15 }
 0xbcf   :  { %8872 = vrcp.f32 %v4590_v7 }
 0xbd0   :  { %v8861_v26 = vpop.eup %8860  ;;  %8874 = vrcp.f32 %v4614_v17 }
 0xbd1   :  { %v8863_v42 = vpop.eup %8862  ;;  %v4591_v41 = vadd.f32 1.0, %v8861_v26  ;;  %8876 = vpow2.f32 %v6451_v6 }
 0xbd2   :  { %8878 = vtanh.f32 %v7911_v19  ;;  %v4615_v36 = vadd.f32 1.0, %v8863_v42  ;;  %v8865_v13 = vpop.eup %8864 }
 0xbd3   :  { %8880 = vrcp.f32 %v4591_v41  ;;  %v4468_v4 = vpop.f32.mrb[86].mxu0  ;;  %v4557_v45 = vpop.f32.mrb[92].mxu1  ;;  %v4642_v60 = vadd.f32 1.0, %v8865_v13 }
 0xbd4   :  { %8882 = vrcp.f32 %v4615_v36  ;;  %v7851_v35 = vadd.f32 %v4468_v4, %v10787_v43  ;;  %v4470_v25 = vpop.f32.mrb[87].mxu0  ;;  %v4559_v0 = vpop.f32.mrb[93].mxu1 }
 0xbd5   :  { %v8867_v57 = vpop.eup %8866  ;;  %v7852_v58 = vadd.f32 %v4470_v25, %v10791_v34  ;;  %8884 = vtanh.f32 %v7913_v30  ;;  %v7916_v13 = vadd.f32 %v4559_v0, %v10797_v61 }
 0xbd6   :  { %v8869_v9 = vpop.eup %8868  ;;  %v4592_v32 = vadd.f32 1.0, %v8867_v57  ;;  %8886 = vpow2.f32 %v6452_v44  ;;  %v6445_v6 = vmul.f32 -1.442695, %v7851_v35 }
 0xbd7   :  { %v8871_v15 = vpop.eup %8870  ;;  %v4616_v7 = vadd.f32 1.0, %v8869_v9  ;;  %v6449_v17 = vmul.f32 -1.442695, %v7852_v58 }
 0xbd8   :  { %8888 = vrcp.f32 %v4592_v32 }
 0xbd9   :  { %v8873_v52 = vpop.eup %8872  ;;  %8890 = vrcp.f32 %v4616_v7 }
 0xbda   :  { %v8875_v19 = vpop.eup %8874  ;;  %v4658_v26 = vmul.f32 %v8873_v52, %v8871_v15  ;;  %8892 = vpow2.f32 %v6445_v6  ;;  %v6453_v15 = vmul.f32 -1.442695, %v7916_v13  ;;  %v7915_v52 = vadd.f32 %v4557_v45, %v10801_v2 }
 0xbdb   :  { %v8877_v42 = vpop.eup %8876  ;;  %v4654_v41 = vmul.f32 %v8875_v19, %v10886_v40  ;;  %8894 = vpow2.f32 %v6449_v17 }
 0xbdc   :  { %v8879_v36 = vpop.eup %8878  ;;  %8896 = vrcp.f32 %v4642_v60  ;;  %v4643_v35 = vadd.f32 1.0, %v8877_v42 }
 0xbdd   :  { %v8881_v4 = vpop.eup %8880  ;;  %v10956_v25 = vadd.f32 %v4658_v26, %v4654_v41 }
 0xbde   :  { %v8883_v30 = vpop.eup %8882  ;;  %v4659_v44 = vmul.f32 %v8881_v4, %v8879_v36 }
 0xbdf   :  { %8898 = vtanh.f32 %v10956_v25  ;;  %v4655_v57 = vmul.f32 %v8883_v30, %v10890_v12  ;;  %v8885_v58 = vpop.eup %8884 }
 0xbe0   :  { %v8887_v40 = vpop.eup %8886  ;;  %8900 = vrcp.f32 %v4643_v35 }
 0xbe1   :  { %v10961_v9 = vadd.f32 %v4659_v44, %v4655_v57  ;;  %v4644_v12 = vadd.f32 1.0, %v8887_v40 }
 0xbe2   :  { %v8889_v32 = vpop.eup %8888 }
 0xbe3   :  { %8902 = vtanh.f32 %v10961_v9  ;;  %v8891_v7 = vpop.eup %8890  ;;  %v4660_v6 = vmul.f32 %v8889_v32, %v8885_v58 }
 0xbe4   :  { %v4656_v17 = vmul.f32 %v8891_v7, %v10894_v8  ;;  %v8893_v19 = vpop.eup %8892  ;;  %8904 = vpow2.f32 %v6453_v15 }
 0xbe5   :  { %v8895_v26 = vpop.eup %8894  ;;  %v4593_v60 = vadd.f32 1.0, %v8893_v19  ;;  %8906 = vtanh.f32 %v7915_v52 }
 0xbe6   :  { %v10966_v0 = vadd.f32 %v4660_v6, %v4656_v17  ;;  %v8897_v42 = vpop.eup %8896  ;;  %v4617_v41 = vadd.f32 1.0, %v8895_v26 }
 0xbe7   :  { %8908 = vrcp.f32 %v4593_v60 }
 0xbe8   :  { %8910 = vrcp.f32 %v4617_v41 }
 0xbe9   :  { %v8899_v36 = vpop.eup %8898  ;;  %8912 = vrcp.f32 %v4644_v12 }
 0xbea   :  { %v4670_v4 = vmul.f32 %v8899_v36, %v8897_v42  ;;  %v8901_v30 = vpop.eup %8900  ;;  %8914 = vtanh.f32 %v10966_v0 }
 0xbec   :  { %4739 = vmatmul.mubr.f32.vlgmr.msra.gmra.mrb[88].mxu0 %v4670_v4  ;;  %4828 = vmatmul.mubr.f32.vlgmr.msra.gmra.mrb[94].mxu1 %v4670_v4 }
 0xbed   :  { %v8903_v8 = vpop.eup %8902  ;;  %4744 = vmatprep.mubr.f32.mxu0 %v11409_v16  ;;  %4833 = vmatprep.mubr.f32.mxu1 %v11409_v16 }
 0xbee   :  { %v4671_v45 = vmul.f32 %v8903_v8, %v8901_v30  ;;  %7408 = vmatpush1.bf16.msra.mxu0 %v10495_v49  ;;  %7440 = vmatpush1.bf16.msra.mxu1 %v10498_v21  ;;  %v8905_v44 = vpop.eup %8904 }
 0xbef   :  { %7410 = vmatprep.subr.bf16.mxu0 %v10500_v11  ;;  %7442 = vmatprep.subr.bf16.mxu1 %v10502_v24  ;;  %v8907_v35 = vpop.eup %8906  ;;  %v4645_v40 = vadd.f32 1.0, %v8905_v44 }
 0xbf0   :  { %4745 = vmatmul.mubr.f32.gmra.mrb[90].mxu0 %v4671_v45  ;;  %4834 = vmatmul.mubr.f32.gmra.mrb[96].mxu1 %v4671_v45 }
 0xbf1   :  { %4750 = vmatprep.mubr.f32.mxu0 %v11409_v16  ;;  %4839 = vmatprep.mubr.f32.mxu1 %v11409_v16  ;;  %v8909_v57 = vpop.eup %8908  ;;  %8916 = vrcp.f32 %v4645_v40 }
 0xbf2   :  { %7412 = vmatpush1.bf16.msra.mxu0 %v10510_v47  ;;  %7444 = vmatpush1.bf16.msra.mxu1 %v10512_v56  ;;  %v8911_v13 = vpop.eup %8910  ;;  %v4661_v58 = vmul.f32 %v8909_v57, %v8907_v35 }
 0xbf3   :  { %7414 = vmatprep.subr.bf16.mxu0 %v10516_v29  ;;  %7446 = vmatprep.subr.bf16.mxu1 %v10518_v14  ;;  %v8913_v32 = vpop.eup %8912  ;;  %v4657_v15 = vmul.f32 %v8911_v13, %v10910_v23 }
 0xbf4   :  { %v8915_v7 = vpop.eup %8914 }
 0xbf5   :  { %v4672_v6 = vmul.f32 %v8915_v7, %v8913_v32  ;;  %v10984_v52 = vadd.f32 %v4661_v58, %v4657_v15 }
 0xbf6   :  { %7416 = vmatpush1.bf16.msra.mxu0 %v10526_v53  ;;  %7448 = vmatpush1.bf16.msra.mxu1 %v10528_v1 }
 0xbf7   :  { %7418 = vmatprep.subr.bf16.mxu0 %v10532_v3  ;;  %7450 = vmatprep.subr.bf16.mxu1 %v10534_v20  ;;  %8918 = vtanh.f32 %v10984_v52 }
 0xbf8   :  { %4751 = vmatmul.mubr.f32.gmra.mrb[92].mxu0 %v4672_v6  ;;  %4840 = vmatmul.mubr.f32.gmra.mrb[98].mxu1 %v4672_v6 }
 0xbf9   :  { %4756 = vmatprep.mubr.f32.mxu0 %v11409_v16  ;;  %4845 = vmatprep.mubr.f32.mxu1 %v11409_v16 }
 0xbfa   :  { %7420 = vmatpush1.bf16.msra.mxu0 %v10542_v54  ;;  %7452 = vmatpush1.bf16.msra.mxu1 %v10544_v5 }
 0xbfb   :  { %7422 = vmatprep.subr.bf16.mxu0 %v10548_v59  ;;  %7454 = vmatprep.subr.bf16.mxu1 %v10652_v51  ;;  %v8917_v23 = vpop.eup %8916 }
 0xbfe   :  { %7424 = vmatpush1.bf16.msra.mxu0 %v10621_v22  ;;  %7456 = vmatpush1.bf16.msra.mxu1 %v10656_v48 }
 0xbff   :  { %7426 = vmatprep.subr.bf16.mxu0 %v10654_v37  ;;  %7458 = vmatprep.subr.bf16.mxu1 %v10664_v33 }
 0xc01   :  { %v8919_v17 = vpop.eup %8918 }
 0xc02   :  { %7428 = vmatpush1.bf16.msra.mxu0 %v10660_v46  ;;  %7460 = vmatpush1.bf16.msra.mxu1 %v10670_v50  ;;  %v4673_v19 = vmul.f32 %v8919_v17, %v8917_v23 }
 0xc03   :  { %7430 = vmatprep.subr.bf16.mxu0 %v10666_v39  ;;  %7462 = vmatprep.subr.bf16.mxu1 %v10676_v18 }
 0xc04   :  { %4757 = vmatmul.mubr.f32.gmra.mrb[94].mxu0 %v4673_v19  ;;  %4846 = vmatmul.mubr.f32.gmra.mrb[100].mxu1 %v4673_v19 }
 0xc05   :  { %5028 = vmatprep.mubr.f32.mxu0 %v11409_v16  ;;  %5117 = vmatprep.mubr.f32.mxu1 %v11409_v16 }
 0xc06   :  { %7432 = vmatpush1.bf16.msra.mxu0 %v10674_v10  ;;  %7464 = vmatpush1.bf16.msra.mxu1 %v10684_v62 }
 0xc07   :  { %7434 = vmatprep.subr.bf16.mxu0 %v10680_v31  ;;  %7466 = vmatprep.subr.bf16.mxu1 %v10693_v28 }
 0xc0a   :  { %7436 = vmatpush1.bf16.msra.mxu0 %v10686_v63  ;;  %7468 = vmatpush1.bf16.msra.mxu1 %v10695_v38 }
 0xc0b   :  { %7470 = vmatprep.subr.bf16.mxu0 %v10488_v27  ;;  %7502 = vmatprep.subr.bf16.mxu1 %v10490_v55 }
 0xcbf   :  { %v4740_v26 = vpop.f32.mrb[88].mxu0  ;;  %v4829_v12 = vpop.f32.mrb[94].mxu1 }
 0xcc0   :  { %v7853_v60 = vadd.f32 %v4740_v26, %v10787_v43  ;;  %v4742_v42 = vpop.f32.mrb[89].mxu0  ;;  %v4831_v41 = vpop.f32.mrb[95].mxu1  ;;  %v7917_v7 = vadd.f32 %v4829_v12, %v10801_v2 }
 0xcc1   :  { %v7854_v36 = vadd.f32 %v4742_v42, %v10791_v34  ;;  %v7918_v44 = vadd.f32 %v4831_v41, %v10797_v61 }
 0xcc2   :  { %v6454_v4 = vmul.f32 -1.442695, %v7853_v60 }
 0xcc3   :  { %v6458_v30 = vmul.f32 -1.442695, %v7854_v36  ;;  %v4746_v8 = vpop.f32.mrb[90].mxu0  ;;  %v4835_v45 = vpop.f32.mrb[96].mxu1  ;;  %v6462_v15 = vmul.f32 -1.442695, %v7918_v44 }
 0xcc4   :  { %8920 = vpow2.f32 %v6454_v4  ;;  %v7855_v35 = vadd.f32 %v4746_v8, %v10787_v43  ;;  %v4748_v57 = vpop.f32.mrb[91].mxu0  ;;  %v4837_v13 = vpop.f32.mrb[97].mxu1  ;;  %v7919_v23 = vadd.f32 %v4835_v45, %v10801_v2 }
 0xcc5   :  { %8922 = vpow2.f32 %v6458_v30  ;;  %v7856_v58 = vadd.f32 %v4748_v57, %v10791_v34  ;;  %v7920_v6 = vadd.f32 %v4837_v13, %v10797_v61 }
 0xcc6   :  { %v6455_v40 = vmul.f32 -1.442695, %v7855_v35 }
 0xcc7   :  { %v6459_v32 = vmul.f32 -1.442695, %v7856_v58  ;;  %v6463_v30 = vmul.f32 -1.442695, %v7920_v6 }
 0xcc8   :  { %8924 = vpow2.f32 %v6455_v40 }
 0xcc9   :  { %8926 = vpow2.f32 %v6459_v32 }
 0xcca   :  { %8928 = vpow2.f32 %v6462_v15 }
 0xccb   :  { %v4752_v17 = vpop.f32.mrb[92].mxu0  ;;  %v4841_v19 = vpop.f32.mrb[98].mxu1  ;;  %8930 = vtanh.f32 %v7917_v7 }
 0xccc   :  { %v7857_v26 = vadd.f32 %v4752_v17, %v10787_v43  ;;  %v4754_v60 = vpop.f32.mrb[93].mxu0  ;;  %v4843_v42 = vpop.f32.mrb[99].mxu1  ;;  %8932 = vtanh.f32 %v7919_v23  ;;  %v7921_v32 = vadd.f32 %v4841_v19, %v10801_v2 }
 0xccd   :  { %v7858_v12 = vadd.f32 %v4754_v60, %v10791_v34  ;;  %v7922_v15 = vadd.f32 %v4843_v42, %v10797_v61 }
 0xcce   :  { %v8921_v41 = vpop.eup %8920  ;;  %v6456_v44 = vmul.f32 -1.442695, %v7857_v26 }
 0xccf   :  { %v8923_v36 = vpop.eup %8922  ;;  %v4880_v4 = vadd.f32 1.0, %v8921_v41  ;;  %v6460_v58 = vmul.f32 -1.442695, %v7858_v12  ;;  %v6464_v12 = vmul.f32 -1.442695, %v7922_v15 }
 0xcd0   :  { %v4904_v8 = vadd.f32 1.0, %v8923_v36 }
 0xcd1   :  { %8934 = vrcp.f32 %v4880_v4 }
 0xcd2   :  { %v8925_v35 = vpop.eup %8924  ;;  %8936 = vrcp.f32 %v4904_v8 }
 0xcd3   :  { %v8927_v45 = vpop.eup %8926  ;;  %v4881_v57 = vadd.f32 1.0, %v8925_v35  ;;  %8938 = vpow2.f32 %v6463_v30 }
 0xcd4   :  { %v4905_v13 = vadd.f32 1.0, %v8927_v45  ;;  %8940 = vpow2.f32 %v6456_v44  ;;  %v8929_v40 = vpop.eup %8928 }
 0xcd5   :  { %8942 = vrcp.f32 %v4881_v57  ;;  %v8931_v7 = vpop.eup %8930  ;;  %v4932_v6 = vadd.f32 1.0, %v8929_v40 }
 0xcd6   :  { %8944 = vrcp.f32 %v4905_v13  ;;  %v8933_v26 = vpop.eup %8932 }
 0xcd7   :  { %8946 = vpow2.f32 %v6460_v58  ;;  %v4758_v23 = vpop.f32.mrb[94].mxu0  ;;  %v4847_v17 = vpop.f32.mrb[100].mxu1 }
 0xcd8   :  { %v7859_v60 = vadd.f32 %v4758_v23, %v10787_v43  ;;  %v4760_v41 = vpop.f32.mrb[95].mxu0  ;;  %v4849_v36 = vpop.f32.mrb[101].mxu1  ;;  %8948 = vtanh.f32 %v7921_v32 }
 0xcd9   :  { %v7860_v30 = vadd.f32 %v4760_v41, %v10791_v34  ;;  %8950 = vrcp.f32 %v4932_v6  ;;  %v7924_v15 = vadd.f32 %v4849_v36, %v10797_v61 }
 0xcda   :  { %v6457_v19 = vmul.f32 -1.442695, %v7859_v60 }
 0xcdb   :  { %v8935_v4 = vpop.eup %8934  ;;  %v6461_v45 = vmul.f32 -1.442695, %v7860_v30  ;;  %v6465_v41 = vmul.f32 -1.442695, %v7924_v15  ;;  %v7923_v30 = vadd.f32 %v4847_v17, %v10801_v2 }
 0xcdc   :  { %v8937_v8 = vpop.eup %8936  ;;  %v4948_v44 = vmul.f32 %v8935_v4, %v8931_v7  ;;  %8952 = vpow2.f32 %v6457_v19 }
 0xcdd   :  { %v8939_v35 = vpop.eup %8938  ;;  %v4944_v42 = vmul.f32 %v8937_v8, %v10956_v25  ;;  %8954 = vpow2.f32 %v6461_v45 }
 0xcde   :  { %v8941_v57 = vpop.eup %8940  ;;  %8956 = vpow2.f32 %v6464_v12  ;;  %v4933_v25 = vadd.f32 1.0, %v8939_v35 }
 0xcdf   :  { %v8943_v13 = vpop.eup %8942  ;;  %v11028_v58 = vadd.f32 %v4948_v44, %v4944_v42  ;;  %v4882_v40 = vadd.f32 1.0, %v8941_v57 }
 0xce0   :  { %v8945_v23 = vpop.eup %8944  ;;  %v4949_v43 = vmul.f32 %v8943_v13, %v8933_v26 }
 0xce1   :  { %8958 = vtanh.f32 %v11028_v58  ;;  %v4945_v32 = vmul.f32 %v8945_v23, %v10961_v9  ;;  %v8947_v7 = vpop.eup %8946 }
 0xce2   :  { %8960 = vrcp.f32 %v4882_v40  ;;  %v4906_v6 = vadd.f32 1.0, %v8947_v7  ;;  %v8949_v4 = vpop.eup %8948 }
 0xce3   :  { %v11033_v60 = vadd.f32 %v4949_v43, %v4945_v32  ;;  %v8951_v26 = vpop.eup %8950 }
 0xce4   :  { %8962 = vrcp.f32 %v4906_v6 }
 0xce5   :  { %8964 = vrcp.f32 %v4933_v25 }
 0xce6   :  { %8966 = vtanh.f32 %v11033_v60  ;;  %v8953_v8 = vpop.eup %8952 }
 0xce7   :  { %v8955_v44 = vpop.eup %8954  ;;  %v4883_v9 = vadd.f32 1.0, %v8953_v8  ;;  %8968 = vpow2.f32 %v6465_v41 }
 0xce8   :  { %v8957_v36 = vpop.eup %8956  ;;  %8970 = vtanh.f32 %v7923_v30  ;;  %v4907_v12 = vadd.f32 1.0, %v8955_v44 }
 0xce9   :  { %8972 = vrcp.f32 %v4883_v9  ;;  %v4934_v17 = vadd.f32 1.0, %v8957_v36 }
 0xcea   :  { %8974 = vrcp.f32 %v4907_v12 }
 0xceb   :  { %v8959_v19 = vpop.eup %8958  ;;  %8976 = vrcp.f32 %v4934_v17 }
 0xcec   :  { %v8961_v43 = vpop.eup %8960  ;;  %v4960_v35 = vmul.f32 %v8959_v19, %v8951_v26 }
 0xced   :  { %v4950_v42 = vmul.f32 %v8961_v43, %v8949_v4  ;;  %v11456_v43 = vld [vmem:[#allocation19_spill] sm:$0xff] }
 0xcee   :  { %5029 = vmatmul.mubr.f32.vlgmr.msra.gmra.mrb[96].mxu0 %v4960_v35  ;;  %5118 = vmatmul.mubr.f32.vlgmr.msra.gmra.mrb[102].mxu1 %v4960_v35  ;;  %v8963_v45 = vpop.eup %8962 }
 0xcef   :  { %5034 = vmatprep.mubr.f32.mxu0 %v11409_v16  ;;  %5123 = vmatprep.mubr.f32.mxu1 %v11409_v16  ;;  %v8965_v57 = vpop.eup %8964  ;;  %v4946_v13 = vmul.f32 %v8963_v45, %v10966_v0 }
 0xcf0   :  { %7472 = vmatpush1.bf16.msra.mxu0 %v10495_v49  ;;  %7504 = vmatpush1.bf16.msra.mxu1 %v10498_v21  ;;  %v8967_v40 = vpop.eup %8966 }
 0xcf1   :  { %7474 = vmatprep.subr.bf16.mxu0 %v10500_v11  ;;  %7506 = vmatprep.subr.bf16.mxu1 %v10502_v24  ;;  %v4961_v23 = vmul.f32 %v8967_v40, %v8965_v57  ;;  %v11044_v32 = vadd.f32 %v4950_v42, %v4946_v13  ;;  %v8969_v15 = vpop.eup %8968 }
 0xcf2   :  { %v8971_v7 = vpop.eup %8970  ;;  %v4935_v41 = vadd.f32 1.0, %v8969_v15 }
 0xcf3   :  { %5035 = vmatmul.mubr.f32.gmra.mrb[98].mxu0 %v4961_v23  ;;  %5124 = vmatmul.mubr.f32.gmra.mrb[104].mxu1 %v4961_v23  ;;  %8978 = vtanh.f32 %v11044_v32  ;;  %v8973_v0 = vpop.eup %8972 }
 0xcf4   :  { %5040 = vmatprep.mubr.f32.mxu0 %v11409_v16  ;;  %5129 = vmatprep.mubr.f32.mxu1 %v11409_v16  ;;  %v8975_v25 = vpop.eup %8974  ;;  %v4951_v6 = vmul.f32 %v8973_v0, %v8971_v7  ;;  %8980 = vrcp.f32 %v4935_v41 }
 0xcf5   :  { %7476 = vmatpush1.bf16.msra.mxu0 %v10510_v47  ;;  %7508 = vmatpush1.bf16.msra.mxu1 %v10512_v56  ;;  %v4947_v4 = vmul.f32 %v8975_v25, %v10984_v52  ;;  %v8977_v26 = vpop.eup %8976 }
 0xcf6   :  { %7478 = vmatprep.subr.bf16.mxu0 %v10516_v29  ;;  %7510 = vmatprep.subr.bf16.mxu1 %v10518_v14 }
 0xcf7   :  { %v11054_v30 = vadd.f32 %v4951_v6, %v4947_v4 }
 0xcf9   :  { %7480 = vmatpush1.bf16.msra.mxu0 %v10526_v53  ;;  %7512 = vmatpush1.bf16.msra.mxu1 %v10528_v1  ;;  %8982 = vtanh.f32 %v11054_v30 }
 0xcfa   :  { %7482 = vmatprep.subr.bf16.mxu0 %v10532_v3  ;;  %7514 = vmatprep.subr.bf16.mxu1 %v10534_v20 }
 0xcfd   :  { %v8979_v8 = vpop.eup %8978  ;;  %7484 = vmatpush1.bf16.msra.mxu0 %v10542_v54  ;;  %7516 = vmatpush1.bf16.msra.mxu1 %v10544_v5 }
 0xcfe   :  { %v4962_v52 = vmul.f32 %v8979_v8, %v8977_v26  ;;  %7486 = vmatprep.subr.bf16.mxu0 %v10548_v59  ;;  %7518 = vmatprep.subr.bf16.mxu1 %v10652_v51  ;;  %v8981_v44 = vpop.eup %8980 }
 0xd00   :  { %5041 = vmatmul.mubr.f32.gmra.mrb[100].mxu0 %v4962_v52  ;;  %5130 = vmatmul.mubr.f32.gmra.mrb[106].mxu1 %v4962_v52 }
 0xd01   :  { %5046 = vmatprep.mubr.f32.mxu0 %v11409_v16  ;;  %5135 = vmatprep.mubr.f32.mxu1 %v11409_v16 }
 0xd02   :  { %7488 = vmatpush1.bf16.msra.mxu0 %v10621_v22  ;;  %7520 = vmatpush1.bf16.msra.mxu1 %v10656_v48 }
 0xd03   :  { %7490 = vmatprep.subr.bf16.mxu0 %v10654_v37  ;;  %7522 = vmatprep.subr.bf16.mxu1 %v10664_v33  ;;  %v8983_v9 = vpop.eup %8982 }
 0xd04   :  { %v4963_v36 = vmul.f32 %v8983_v9, %v8981_v44 }
 0xd06   :  { %7492 = vmatpush1.bf16.msra.mxu0 %v10660_v46  ;;  %7524 = vmatpush1.bf16.msra.mxu1 %v10670_v50 }
 0xd07   :  { %5047 = vmatmul.mubr.f32.gmra.mrb[102].mxu0 %v4963_v36  ;;  %5136 = vmatmul.mubr.f32.gmra.mrb[108].mxu1 %v4963_v36 }
 0xd08   :  { %7494 = vmatprep.subr.bf16.mxu0 %v10666_v39  ;;  %7526 = vmatprep.subr.bf16.mxu1 %v10676_v18 }
 0xd09   :  { %5318 = vmatprep.mubr.f32.mxu0 %v11409_v16  ;;  %5407 = vmatprep.mubr.f32.mxu1 %v11409_v16 }
 0xd0a   :  { %7496 = vmatpush1.bf16.msra.mxu0 %v10674_v10  ;;  %7528 = vmatpush1.bf16.msra.mxu1 %v10684_v62 }
 0xd0b   :  { %7498 = vmatprep.subr.bf16.mxu0 %v10680_v31  ;;  %7530 = vmatprep.subr.bf16.mxu1 %v10693_v28 }
 0xd0e   :  { %7500 = vmatpush1.bf16.msra.mxu0 %v10686_v63  ;;  %7532 = vmatpush1.bf16.msra.mxu1 %v10695_v38 }
 0xd0f   :  { %7534 = vmatprep.subr.bf16.mxu0 %v10488_v27  ;;  %7566 = vmatprep.subr.bf16.mxu1 %v10490_v55 }
 0xdc1   :  { %v5030_v12 = vpop.f32.mrb[96].mxu0  ;;  %v5119_v19 = vpop.f32.mrb[102].mxu1 }
 0xdc2   :  { %v7861_v35 = vadd.f32 %v5030_v12, %v11456_v43  ;;  %v5032_v42 = vpop.f32.mrb[97].mxu0  ;;  %v5121_v45 = vpop.f32.mrb[103].mxu1  ;;  %v7925_v52 = vadd.f32 %v5119_v19, %v10801_v2 }
 0xdc3   :  { %v7862_v17 = vadd.f32 %v5032_v42, %v10791_v34  ;;  %v7926_v25 = vadd.f32 %v5121_v45, %v10797_v61 }
 0xdc4   :  { %v6466_v57 = vmul.f32 -1.442695, %v7861_v35 }
 0xdc5   :  { %v6470_v13 = vmul.f32 -1.442695, %v7862_v17  ;;  %v6474_v26 = vmul.f32 -1.442695, %v7926_v25 }
 0xdc6   :  { %8984 = vpow2.f32 %v6466_v57  ;;  %v5036_v40 = vpop.f32.mrb[98].mxu0  ;;  %v5125_v23 = vpop.f32.mrb[104].mxu1 }
 0xdc7   :  { %8986 = vpow2.f32 %v6470_v13  ;;  %v7863_v15 = vadd.f32 %v5036_v40, %v11456_v43  ;;  %v5038_v7 = vpop.f32.mrb[99].mxu0  ;;  %v5127_v0 = vpop.f32.mrb[105].mxu1  ;;  %v7927_v42 = vadd.f32 %v5125_v23, %v10801_v2 }
 0xdc8   :  { %v7864_v6 = vadd.f32 %v5038_v7, %v10791_v34  ;;  %v7928_v8 = vadd.f32 %v5127_v0, %v10797_v61 }
 0xdc9   :  { %v6467_v41 = vmul.f32 -1.442695, %v7863_v15 }
 0xdca   :  { %v6471_v4 = vmul.f32 -1.442695, %v7864_v6  ;;  %v6475_v12 = vmul.f32 -1.442695, %v7928_v8 }
 0xdcb   :  { %8988 = vpow2.f32 %v6467_v41 }
 0xdcc   :  { %8990 = vpow2.f32 %v6471_v4 }
 0xdcd   :  { %8992 = vpow2.f32 %v6474_v26 }
 0xdce   :  { %8994 = vtanh.f32 %v7925_v52 }
 0xdd0   :  { %v8985_v44 = vpop.eup %8984 }
 0xdd1   :  { %v8987_v9 = vpop.eup %8986  ;;  %v5170_v36 = vadd.f32 1.0, %v8985_v44 }
 0xdd2   :  { %v5194_v35 = vadd.f32 1.0, %v8987_v9 }
 0xdd3   :  { %8996 = vrcp.f32 %v5170_v36  ;;  %v5042_v45 = vpop.f32.mrb[100].mxu0  ;;  %v5131_v17 = vpop.f32.mrb[106].mxu1 }
 0xdd4   :  { %8998 = vrcp.f32 %v5194_v35  ;;  %v7865_v57 = vadd.f32 %v5042_v45, %v11456_v43  ;;  %v5044_v13 = vpop.f32.mrb[101].mxu0  ;;  %v5133_v40 = vpop.f32.mrb[107].mxu1 }
 0xdd5   :  { %9000 = vpow2.f32 %v6475_v12  ;;  %v8989_v15 = vpop.eup %8988  ;;  %v7866_v19 = vadd.f32 %v5044_v13, %v10791_v34 }
 0xdd6   :  { %v8991_v7 = vpop.eup %8990  ;;  %v5171_v0 = vadd.f32 1.0, %v8989_v15  ;;  %9002 = vtanh.f32 %v7927_v42  ;;  %v6468_v6 = vmul.f32 -1.442695, %v7865_v57 }
 0xdd7   :  { %v5195_v25 = vadd.f32 1.0, %v8991_v7  ;;  %v6472_v41 = vmul.f32 -1.442695, %v7866_v19  ;;  %v8993_v4 = vpop.eup %8992  ;;  %v7930_v19 = vadd.f32 %v5133_v40, %v10797_v61 }
 0xdd8   :  { %9004 = vrcp.f32 %v5171_v0  ;;  %v8995_v8 = vpop.eup %8994  ;;  %v5222_v45 = vadd.f32 1.0, %v8993_v4 }
 0xdd9   :  { %9006 = vrcp.f32 %v5195_v25  ;;  %v7929_v25 = vadd.f32 %v5131_v17, %v10801_v2  ;;  %v6476_v4 = vmul.f32 -1.442695, %v7930_v19 }
 0xdda   :  { %v5048_v23 = vpop.f32.mrb[102].mxu0  ;;  %v5137_v26 = vpop.f32.mrb[108].mxu1  ;;  %9008 = vpow2.f32 %v6468_v6 }
 0xddb   :  { %v7867_v52 = vadd.f32 %v5048_v23, %v11456_v43  ;;  %v5050_v44 = vpop.f32.mrb[103].mxu0  ;;  %v5139_v9 = vpop.f32.mrb[109].mxu1  ;;  %9010 = vpow2.f32 %v6472_v41  ;;  %v7931_v40 = vadd.f32 %v5137_v26, %v10801_v2 }
 0xddc   :  { %v7868_v12 = vadd.f32 %v5050_v44, %v10791_v34 }
 0xddd   :  { %v8997_v36 = vpop.eup %8996  ;;  %v6469_v57 = vmul.f32 -1.442695, %v7867_v52 }
 0xdde   :  { %v8999_v35 = vpop.eup %8998  ;;  %v5238_v42 = vmul.f32 %v8997_v36, %v8995_v8  ;;  %v6473_v7 = vmul.f32 -1.442695, %v7868_v12  ;;  %v7932_v8 = vadd.f32 %v5139_v9, %v10797_v61 }
 0xddf   :  { %v9001_v13 = vpop.eup %9000  ;;  %v5234_v15 = vmul.f32 %v8999_v35, %v11028_v58  ;;  %9012 = vpow2.f32 %v6469_v57 }
 0xde0   :  { %9014 = vpow2.f32 %v6473_v7  ;;  %v9003_v6 = vpop.eup %9002  ;;  %v5223_v41 = vadd.f32 1.0, %v9001_v13  ;;  %v6477_v35 = vmul.f32 -1.442695, %v7932_v8 }
 0xde1   :  { %v11099_v0 = vadd.f32 %v5238_v42, %v5234_v15  ;;  %9016 = vrcp.f32 %v5222_v45 }
 0xde2   :  { %v9005_v23 = vpop.eup %9004 }
 0xde3   :  { %9018 = vtanh.f32 %v11099_v0  ;;  %v9007_v52 = vpop.eup %9006  ;;  %v5239_v58 = vmul.f32 %v9005_v23, %v9003_v6 }
 0xde4   :  { %v5235_v44 = vmul.f32 %v9007_v52, %v11033_v60  ;;  %9020 = vtanh.f32 %v7929_v25  ;;  %v9009_v36 = vpop.eup %9008 }
 0xde5   :  { %9022 = vrcp.f32 %v5223_v41  ;;  %v9011_v17 = vpop.eup %9010  ;;  %v5172_v12 = vadd.f32 1.0, %v9009_v36 }
 0xde6   :  { %9024 = vpow2.f32 %v6476_v4  ;;  %v11106_v42 = vadd.f32 %v5239_v58, %v5235_v44  ;;  %v5196_v45 = vadd.f32 1.0, %v9011_v17 }
 0xde7   :  { %9026 = vtanh.f32 %v7931_v40 }
 0xde8   :  { %9028 = vrcp.f32 %v5172_v12 }
 0xde9   :  { %v9013_v57 = vpop.eup %9012  ;;  %9030 = vrcp.f32 %v5196_v45 }
 0xdea   :  { %v9015_v9 = vpop.eup %9014  ;;  %v5173_v13 = vadd.f32 1.0, %v9013_v57  ;;  %9032 = vpow2.f32 %v6477_v35 }
 0xdeb   :  { %v9017_v26 = vpop.eup %9016  ;;  %v5197_v15 = vadd.f32 1.0, %v9015_v9  ;;  %9034 = vtanh.f32 %v11106_v42 }
 0xdec   :  { %9036 = vrcp.f32 %v5173_v13 }
 0xded   :  { %v9019_v60 = vpop.eup %9018  ;;  %9038 = vrcp.f32 %v5197_v15 }
 0xdee   :  { %v5250_v19 = vmul.f32 %v9019_v60, %v9017_v26  ;;  %v9021_v7 = vpop.eup %9020 }
 0xdef   :  { %v9023_v25 = vpop.eup %9022 }
 0xdf0   :  { %5319 = vmatmul.mubr.f32.vlgmr.msra.gmra.mrb[104].mxu0 %v5250_v19  ;;  %5408 = vmatmul.mubr.f32.vlgmr.msra.gmra.mrb[110].mxu1 %v5250_v19  ;;  %v9025_v6 = vpop.eup %9024 }
 0xdf1   :  { %5324 = vmatprep.mubr.f32.mxu0 %v11409_v16  ;;  %5413 = vmatprep.mubr.f32.mxu1 %v11409_v16  ;;  %v9027_v41 = vpop.eup %9026  ;;  %v5224_v52 = vadd.f32 1.0, %v9025_v6 }
 0xdf2   :  { %7536 = vmatpush1.bf16.msra.mxu0 %v10495_v49  ;;  %7568 = vmatpush1.bf16.msra.mxu1 %v10498_v21  ;;  %v9029_v23 = vpop.eup %9028 }
 0xdf3   :  { %7538 = vmatprep.subr.bf16.mxu0 %v10500_v11  ;;  %7570 = vmatprep.subr.bf16.mxu1 %v10502_v24  ;;  %v9031_v4 = vpop.eup %9030  ;;  %v5240_v8 = vmul.f32 %v9029_v23, %v9021_v7  ;;  %9040 = vrcp.f32 %v5224_v52 }
 0xdf4   :  { %v9033_v58 = vpop.eup %9032  ;;  %v5236_v40 = vmul.f32 %v9031_v4, %v11044_v32 }
 0xdf5   :  { %v9035_v44 = vpop.eup %9034  ;;  %v5225_v57 = vadd.f32 1.0, %v9033_v58 }
 0xdf6   :  { %7540 = vmatpush1.bf16.msra.mxu0 %v10510_v47  ;;  %7572 = vmatpush1.bf16.msra.mxu1 %v10512_v56  ;;  %v9037_v36 = vpop.eup %9036  ;;  %v5251_v17 = vmul.f32 %v9035_v44, %v9023_v25  ;;  %v11118_v12 = vadd.f32 %v5240_v8, %v5236_v40 }
 0xdf7   :  { %7542 = vmatprep.subr.bf16.mxu0 %v10516_v29  ;;  %7574 = vmatprep.subr.bf16.mxu1 %v10518_v14  ;;  %v9039_v35 = vpop.eup %9038  ;;  %v5241_v45 = vmul.f32 %v9037_v36, %v9027_v41 }
 0xdf8   :  { %v5237_v9 = vmul.f32 %v9039_v35, %v11054_v30  ;;  %5325 = vmatmul.mubr.f32.gmra.mrb[106].mxu0 %v5251_v17  ;;  %5414 = vmatmul.mubr.f32.gmra.mrb[112].mxu1 %v5251_v17  ;;  %9042 = vtanh.f32 %v11118_v12 }
 0xdf9   :  { %5330 = vmatprep.mubr.f32.mxu0 %v11409_v16  ;;  %5419 = vmatprep.mubr.f32.mxu1 %v11409_v16  ;;  %9044 = vrcp.f32 %v5225_v57 }
 0xdfa   :  { %v11126_v32 = vadd.f32 %v5241_v45, %v5237_v9  ;;  %7544 = vmatpush1.bf16.msra.mxu0 %v10526_v53  ;;  %7576 = vmatpush1.bf16.msra.mxu1 %v10528_v1 }
 0xdfb   :  { %7546 = vmatprep.subr.bf16.mxu0 %v10532_v3  ;;  %7578 = vmatprep.subr.bf16.mxu1 %v10534_v20 }
 0xdfc   :  { %9046 = vtanh.f32 %v11126_v32 }
 0xdfd   :  { %v9041_v30 = vpop.eup %9040 }
 0xdfe   :  { %7548 = vmatpush1.bf16.msra.mxu0 %v10542_v54  ;;  %7580 = vmatpush1.bf16.msra.mxu1 %v10544_v5 }
 0xdff   :  { %7550 = vmatprep.subr.bf16.mxu0 %v10548_v59  ;;  %7582 = vmatprep.subr.bf16.mxu1 %v10652_v51 }
 0xe02   :  { %v9043_v13 = vpop.eup %9042  ;;  %7552 = vmatpush1.bf16.msra.mxu0 %v10621_v22  ;;  %7584 = vmatpush1.bf16.msra.mxu1 %v10656_v48 }
 0xe03   :  { %v5252_v26 = vmul.f32 %v9043_v13, %v9041_v30  ;;  %7554 = vmatprep.subr.bf16.mxu0 %v10654_v37  ;;  %7586 = vmatprep.subr.bf16.mxu1 %v10664_v33  ;;  %v9045_v15 = vpop.eup %9044 }
 0xe05   :  { %5331 = vmatmul.mubr.f32.gmra.mrb[108].mxu0 %v5252_v26  ;;  %5420 = vmatmul.mubr.f32.gmra.mrb[114].mxu1 %v5252_v26 }
 0xe06   :  { %v9047_v60 = vpop.eup %9046  ;;  %5336 = vmatprep.mubr.f32.mxu0 %v11409_v16  ;;  %5425 = vmatprep.mubr.f32.mxu1 %v11409_v16 }
 0xe07   :  { %v5253_v19 = vmul.f32 %v9047_v60, %v9045_v15  ;;  %7556 = vmatpush1.bf16.msra.mxu0 %v10660_v46  ;;  %7588 = vmatpush1.bf16.msra.mxu1 %v10670_v50 }
 0xe08   :  { %7558 = vmatprep.subr.bf16.mxu0 %v10666_v39  ;;  %7590 = vmatprep.subr.bf16.mxu1 %v10676_v18 }
 0xe09   :  { %5337 = vmatmul.mubr.f32.gmra.mrb[110].mxu0 %v5253_v19  ;;  %5426 = vmatmul.mubr.f32.gmra.mrb[116].mxu1 %v5253_v19 }
 0xe0a   :  { %5608 = vmatprep.mubr.f32.mxu0 %v11409_v16  ;;  %5697 = vmatprep.mubr.f32.mxu1 %v11409_v16 }
 0xe0b   :  { %7560 = vmatpush1.bf16.msra.mxu0 %v10674_v10  ;;  %7592 = vmatpush1.bf16.msra.mxu1 %v10684_v62 }
 0xe0c   :  { %7562 = vmatprep.subr.bf16.mxu0 %v10680_v31  ;;  %7594 = vmatprep.subr.bf16.mxu1 %v10693_v28 }
 0xe0f   :  { %7564 = vmatpush1.bf16.msra.mxu0 %v10686_v63  ;;  %7596 = vmatpush1.bf16.msra.mxu1 %v10695_v38 }
 0xe10   :  { %7598 = vmatprep.subr.bf16.mxu0 %v10488_v27  ;;  %7630 = vmatprep.subr.bf16.mxu1 %v10490_v55 }
 0xec3   :  { %v5320_v7 = vpop.f32.mrb[104].mxu0  ;;  %v5409_v25 = vpop.f32.mrb[110].mxu1 }
 0xec4   :  { %v7869_v6 = vadd.f32 %v5320_v7, %v11456_v43  ;;  %v5322_v41 = vpop.f32.mrb[105].mxu0  ;;  %v5411_v23 = vpop.f32.mrb[111].mxu1  ;;  %v7933_v57 = vadd.f32 %v5409_v25, %v10801_v2 }
 0xec5   :  { %v7870_v4 = vadd.f32 %v5322_v41, %v10791_v34  ;;  %v7934_v58 = vadd.f32 %v5411_v23, %v10797_v61 }
 0xec6   :  { %v6478_v8 = vmul.f32 -1.442695, %v7869_v6 }
 0xec7   :  { %v6482_v52 = vmul.f32 -1.442695, %v7870_v4  ;;  %v6486_v40 = vmul.f32 -1.442695, %v7934_v58 }
 0xec8   :  { %9048 = vpow2.f32 %v6478_v8 }
 0xec9   :  { %9050 = vpow2.f32 %v6482_v52 }
 0xeca   :  { %9052 = vpow2.f32 %v6486_v40 }
 0xecb   :  { %v5326_v44 = vpop.f32.mrb[106].mxu0  ;;  %v5415_v36 = vpop.f32.mrb[112].mxu1 }
 0xecc   :  { %v7871_v27 = vadd.f32 %v5326_v44, %v11456_v43  ;;  %v5328_v55 = vpop.f32.mrb[107].mxu0  ;;  %v5417_v17 = vpop.f32.mrb[113].mxu1  ;;  %v7935_v7 = vadd.f32 %v5415_v36, %v10801_v2 }
 0xecd   :  { %v7872_v35 = vadd.f32 %v5328_v55, %v10791_v34  ;;  %v7936_v13 = vadd.f32 %v5417_v17, %v10797_v61 }
 0xece   :  { %v6479_v45 = vmul.f32 -1.442695, %v7871_v27 }
 0xecf   :  { %v6483_v9 = vmul.f32 -1.442695, %v7872_v35  ;;  %v6487_v19 = vmul.f32 -1.442695, %v7936_v13 }
 0xed0   :  { %9054 = vpow2.f32 %v6479_v45 }
 0xed1   :  { %9056 = vpow2.f32 %v6483_v9 }
 0xed2   :  { %v9049_v30 = vpop.eup %9048  ;;  %9058 = vtanh.f32 %v7933_v57 }
 0xed3   :  { %v9051_v26 = vpop.eup %9050  ;;  %v5460_v15 = vadd.f32 1.0, %v9049_v30 }
 0xed4   :  { %v5484_v60 = vadd.f32 1.0, %v9051_v26  ;;  %v9053_v23 = vpop.eup %9052 }
 0xed5   :  { %9060 = vrcp.f32 %v5460_v15  ;;  %v5512_v13 = vadd.f32 1.0, %v9053_v23 }
 0xed6   :  { %9062 = vrcp.f32 %v5484_v60 }
 0xed7   :  { %9064 = vpow2.f32 %v6487_v19 }
 0xed8   :  { %v5332_v6 = vpop.f32.mrb[108].mxu0  ;;  %v5421_v41 = vpop.f32.mrb[114].mxu1  ;;  %9066 = vtanh.f32 %v7935_v7 }
 0xed9   :  { %v7873_v25 = vadd.f32 %v5332_v6, %v11456_v43  ;;  %v5334_v4 = vpop.f32.mrb[109].mxu0  ;;  %v5423_v8 = vpop.f32.mrb[115].mxu1  ;;  %v7937_v23 = vadd.f32 %v5421_v41, %v10801_v2 }
 0xeda   :  { %v9055_v52 = vpop.eup %9054  ;;  %v7874_v58 = vadd.f32 %v5334_v4, %v10791_v34 }
 0xedb   :  { %v9057_v40 = vpop.eup %9056  ;;  %v5461_v44 = vadd.f32 1.0, %v9055_v52  ;;  %v6480_v55 = vmul.f32 -1.442695, %v7873_v25 }
 0xedc   :  { %v5485_v27 = vadd.f32 1.0, %v9057_v40  ;;  %v5338_v17 = vpop.f32.mrb[110].mxu0  ;;  %v9059_v35 = vpop.eup %9058  ;;  %v6484_v36 = vmul.f32 -1.442695, %v7874_v58  ;;  %v7938_v58 = vadd.f32 %v5423_v8, %v10797_v61 }
 0xedd   :  { %9068 = vrcp.f32 %v5461_v44  ;;  %v7875_v45 = vadd.f32 %v5338_v17, %v11456_v43  ;;  %v5427_v57 = vpop.f32.mrb[116].mxu1  ;;  %v5340_v9 = vpop.f32.mrb[111].mxu0 }
 0xede   :  { %9070 = vrcp.f32 %v5485_v27  ;;  %v7876_v26 = vadd.f32 %v5340_v9, %v10791_v34  ;;  %v5429_v15 = vpop.f32.mrb[117].mxu1  ;;  %v6488_v17 = vmul.f32 -1.442695, %v7938_v58 }
 0xedf   :  { %v9061_v30 = vpop.eup %9060  ;;  %v6481_v6 = vmul.f32 -1.442695, %v7875_v45  ;;  %9072 = vpow2.f32 %v6480_v55 }
 0xee0   :  { %v9063_v60 = vpop.eup %9062  ;;  %v5528_v19 = vmul.f32 %v9061_v30, %v9059_v35  ;;  %9074 = vpow2.f32 %v6484_v36  ;;  %v6485_v4 = vmul.f32 -1.442695, %v7876_v26  ;;  %v7939_v36 = vadd.f32 %v5427_v57, %v10801_v2 }
 0xee1   :  { %v5524_v7 = vmul.f32 %v9063_v60, %v11099_v0  ;;  %9076 = vrcp.f32 %v5512_v13  ;;  %v9065_v52 = vpop.eup %9064  ;;  %v7940_v0 = vadd.f32 %v5429_v15, %v10797_v61 }
 0xee2   :  { %9078 = vpow2.f32 %v6481_v6  ;;  %v9067_v40 = vpop.eup %9066  ;;  %v5513_v44 = vadd.f32 1.0, %v9065_v52 }
 0xee3   :  { %v11170_v25 = vadd.f32 %v5528_v19, %v5524_v7  ;;  %v6489_v41 = vmul.f32 -1.442695, %v7940_v0 }
 0xee5   :  { %9080 = vtanh.f32 %v11170_v25 }
 0xee6   :  { %9082 = vpow2.f32 %v6485_v4 }
 0xee7   :  { %v9069_v27 = vpop.eup %9068  ;;  %9084 = vtanh.f32 %v7937_v23 }
 0xee8   :  { %v9071_v55 = vpop.eup %9070  ;;  %v5529_v35 = vmul.f32 %v9069_v27, %v9067_v40  ;;  %9086 = vrcp.f32 %v5513_v44 }
 0xee9   :  { %v5525_v45 = vmul.f32 %v9071_v55, %v11106_v42  ;;  %v9073_v8 = vpop.eup %9072  ;;  %9088 = vpow2.f32 %v6488_v17 }
 0xeea   :  { %v9075_v9 = vpop.eup %9074  ;;  %v5462_v30 = vadd.f32 1.0, %v9073_v8  ;;  %9090 = vtanh.f32 %v7939_v36 }
 0xeeb   :  { %v11178_v13 = vadd.f32 %v5529_v35, %v5525_v45  ;;  %v9077_v26 = vpop.eup %9076  ;;  %v5486_v60 = vadd.f32 1.0, %v9075_v9 }
 0xeec   :  { %v9079_v19 = vpop.eup %9078  ;;  %9092 = vrcp.f32 %v5462_v30 }
 0xeed   :  { %9094 = vrcp.f32 %v5486_v60  ;;  %v5463_v6 = vadd.f32 1.0, %v9079_v19 }
 0xeee   :  { %9096 = vpow2.f32 %v6489_v41 }
 0xeef   :  { %v9081_v15 = vpop.eup %9080  ;;  %9098 = vrcp.f32 %v5463_v6 }
 0xef0   :  { %v5540_v57 = vmul.f32 %v9081_v15, %v9077_v26  ;;  %v9083_v42 = vpop.eup %9082  ;;  %9100 = vtanh.f32 %v11178_v13 }
 0xef1   :  { %v5487_v7 = vadd.f32 1.0, %v9083_v42  ;;  %v9085_v4 = vpop.eup %9084 }
 0xef2   :  { %5609 = vmatmul.mubr.f32.vlgmr.msra.gmra.mrb[112].mxu0 %v5540_v57  ;;  %5698 = vmatmul.mubr.f32.vlgmr.msra.gmra.mrb[118].mxu1 %v5540_v57  ;;  %v9087_v52 = vpop.eup %9086 }
 0xef3   :  { %5614 = vmatprep.mubr.f32.mxu0 %v11409_v16  ;;  %5703 = vmatprep.mubr.f32.mxu1 %v11409_v16  ;;  %9102 = vrcp.f32 %v5487_v7  ;;  %v9089_v58 = vpop.eup %9088 }
 0xef4   :  { %7600 = vmatpush1.bf16.msra.mxu0 %v10495_v49  ;;  %7632 = vmatpush1.bf16.msra.mxu1 %v10498_v21  ;;  %v9091_v23 = vpop.eup %9090  ;;  %v5514_v17 = vadd.f32 1.0, %v9089_v58 }
 0xef5   :  { %7602 = vmatprep.subr.bf16.mxu0 %v10500_v11  ;;  %7634 = vmatprep.subr.bf16.mxu1 %v10502_v24 }
 0xef6   :  { %v9093_v40 = vpop.eup %9092  ;;  %9104 = vrcp.f32 %v5514_v17 }
 0xef7   :  { %v9095_v44 = vpop.eup %9094  ;;  %v5530_v27 = vmul.f32 %v9093_v40, %v9085_v4 }
 0xef8   :  { %7604 = vmatpush1.bf16.msra.mxu0 %v10510_v47  ;;  %7636 = vmatpush1.bf16.msra.mxu1 %v10512_v56  ;;  %v9097_v49 = vpop.eup %9096  ;;  %v5526_v21 = vmul.f32 %v9095_v44, %v11118_v12 }
 0xef9   :  { %7606 = vmatprep.subr.bf16.mxu0 %v10516_v29  ;;  %7638 = vmatprep.subr.bf16.mxu1 %v10518_v14  ;;  %v9099_v11 = vpop.eup %9098  ;;  %v5515_v29 = vadd.f32 1.0, %v9097_v49 }
 0xefa   :  { %v9101_v0 = vpop.eup %9100  ;;  %v5531_v24 = vmul.f32 %v9099_v11, %v9091_v23  ;;  %v11192_v55 = vadd.f32 %v5530_v27, %v5526_v21 }
 0xefb   :  { %v5541_v47 = vmul.f32 %v9101_v0, %v9087_v52 }
 0xefc   :  { %7608 = vmatpush1.bf16.msra.mxu0 %v10526_v53  ;;  %7640 = vmatpush1.bf16.msra.mxu1 %v10528_v1  ;;  %9106 = vtanh.f32 %v11192_v55 }
 0xefd   :  { %7610 = vmatprep.subr.bf16.mxu0 %v10532_v3  ;;  %7642 = vmatprep.subr.bf16.mxu1 %v10534_v20  ;;  %v9103_v56 = vpop.eup %9102  ;;  %9108 = vrcp.f32 %v5515_v29 }
 0xefe   :  { %v5527_v14 = vmul.f32 %v9103_v56, %v11126_v32  ;;  %5615 = vmatmul.mubr.f32.gmra.mrb[114].mxu0 %v5541_v47  ;;  %5704 = vmatmul.mubr.f32.gmra.mrb[120].mxu1 %v5541_v47 }
 0xeff   :  { %5620 = vmatprep.mubr.f32.mxu0 %v11409_v16  ;;  %5709 = vmatprep.mubr.f32.mxu1 %v11409_v16 }
 0xf00   :  { %v11202_v53 = vadd.f32 %v5531_v24, %v5527_v14  ;;  %7612 = vmatpush1.bf16.msra.mxu0 %v10542_v54  ;;  %7644 = vmatpush1.bf16.msra.mxu1 %v10544_v5  ;;  %v9105_v1 = vpop.eup %9104 }
 0xf01   :  { %7614 = vmatprep.subr.bf16.mxu0 %v10548_v59  ;;  %7646 = vmatprep.subr.bf16.mxu1 %v10652_v51 }
 0xf02   :  { %9110 = vtanh.f32 %v11202_v53 }
 0xf04   :  { %7616 = vmatpush1.bf16.msra.mxu0 %v10621_v22  ;;  %7648 = vmatpush1.bf16.msra.mxu1 %v10656_v48 }
 0xf05   :  { %7618 = vmatprep.subr.bf16.mxu0 %v10654_v37  ;;  %7650 = vmatprep.subr.bf16.mxu1 %v10664_v33 }
 0xf06   :  { %v9107_v3 = vpop.eup %9106 }
 0xf07   :  { %v5542_v20 = vmul.f32 %v9107_v3, %v9105_v1  ;;  %v9109_v54 = vpop.eup %9108 }
 0xf08   :  { %7620 = vmatpush1.bf16.msra.mxu0 %v10660_v46  ;;  %7652 = vmatpush1.bf16.msra.mxu1 %v10670_v50 }
 0xf09   :  { %7622 = vmatprep.subr.bf16.mxu0 %v10666_v39  ;;  %7654 = vmatprep.subr.bf16.mxu1 %v10676_v18 }
 0xf0a   :  { %5621 = vmatmul.mubr.f32.gmra.mrb[116].mxu0 %v5542_v20  ;;  %5710 = vmatmul.mubr.f32.gmra.mrb[122].mxu1 %v5542_v20 }
 0xf0b   :  { %5626 = vmatprep.mubr.f32.mxu0 %v11409_v16  ;;  %5715 = vmatprep.mubr.f32.mxu1 %v11409_v16 }
 0xf0c   :  { %v9111_v5 = vpop.eup %9110  ;;  %7624 = vmatpush1.bf16.msra.mxu0 %v10674_v10  ;;  %7656 = vmatpush1.bf16.msra.mxu1 %v10684_v62 }
 0xf0d   :  { %v5543_v59 = vmul.f32 %v9111_v5, %v9109_v54  ;;  %7626 = vmatprep.subr.bf16.mxu0 %v10680_v31  ;;  %7658 = vmatprep.subr.bf16.mxu1 %v10693_v28 }
 0xf0f   :  { %5627 = vmatmul.mubr.f32.gmra.mrb[118].mxu0 %v5543_v59  ;;  %5716 = vmatmul.mubr.f32.gmra.mrb[124].mxu1 %v5543_v59 }
 0xf10   :  { %7628 = vmatpush1.bf16.msra.mxu0 %v10686_v63  ;;  %7660 = vmatpush1.bf16.msra.mxu1 %v10695_v38 }
 0xf11   :  { %5898 = vmatprep.mubr.f32.mxu0 %v11409_v16  ;;  %5987 = vmatprep.mubr.f32.mxu1 %v11409_v16 }
 0xfc5   :  { %v5610_v22 = vpop.f32.mrb[112].mxu0  ;;  %v5699_v51 = vpop.f32.mrb[118].mxu1 }
 0xfc6   :  { %v7877_v37 = vadd.f32 %v5610_v22, %v11456_v43  ;;  %v5612_v48 = vpop.f32.mrb[113].mxu0  ;;  %v5701_v46 = vpop.f32.mrb[119].mxu1  ;;  %v7941_v31 = vadd.f32 %v5699_v51, %v10801_v2 }
 0xfc7   :  { %v7878_v33 = vadd.f32 %v5612_v48, %v10791_v34  ;;  %v7942_v10 = vadd.f32 %v5701_v46, %v10797_v61 }
 0xfc8   :  { %v6490_v39 = vmul.f32 -1.442695, %v7877_v37 }
 0xfc9   :  { %v6494_v50 = vmul.f32 -1.442695, %v7878_v33  ;;  %v6498_v18 = vmul.f32 -1.442695, %v7942_v10 }
 0xfca   :  { %9112 = vpow2.f32 %v6490_v39 }
 0xfcb   :  { %9114 = vpow2.f32 %v6494_v50 }
 0xfcc   :  { %9116 = vpow2.f32 %v6498_v18 }
 0xfcd   :  { %9118 = vtanh.f32 %v7941_v31 }
 0xfd1   :  { %v5616_v62 = vpop.f32.mrb[114].mxu0  ;;  %v5705_v63 = vpop.f32.mrb[120].mxu1 }
 0xfd2   :  { %v7879_v28 = vadd.f32 %v5616_v62, %v11456_v43  ;;  %v5618_v38 = vpop.f32.mrb[115].mxu0  ;;  %v5707_v12 = vpop.f32.mrb[121].mxu1  ;;  %v7943_v26 = vadd.f32 %v5705_v63, %v10801_v2 }
 0xfd3   :  { %v7880_v35 = vadd.f32 %v5618_v38, %v10791_v34  ;;  %v7944_v60 = vadd.f32 %v5707_v12, %v10797_v61 }
 0xfd4   :  { %v9113_v32 = vpop.eup %9112  ;;  %v6491_v9 = vmul.f32 -1.442695, %v7879_v28 }
 0xfd5   :  { %v9115_v36 = vpop.eup %9114  ;;  %v5750_v45 = vadd.f32 1.0, %v9113_v32  ;;  %v6495_v30 = vmul.f32 -1.442695, %v7880_v35  ;;  %v6499_v27 = vmul.f32 -1.442695, %v7944_v60 }
 0xfd6   :  { %v5774_v8 = vadd.f32 1.0, %v9115_v36  ;;  %v9117_v41 = vpop.eup %9116 }
 0xfd7   :  { %9120 = vrcp.f32 %v5750_v45  ;;  %v9119_v7 = vpop.eup %9118  ;;  %v5802_v58 = vadd.f32 1.0, %v9117_v41 }
 0xfd8   :  { %9122 = vrcp.f32 %v5774_v8 }
 0xfd9   :  { %9124 = vpow2.f32 %v6491_v9 }
 0xfda   :  { %9126 = vpow2.f32 %v6495_v30 }
 0xfdb   :  { %9128 = vtanh.f32 %v7943_v26 }
 0xfdd   :  { %v5622_v19 = vpop.f32.mrb[116].mxu0  ;;  %v5711_v15 = vpop.f32.mrb[122].mxu1 }
 0xfde   :  { %v7881_v6 = vadd.f32 %v5622_v19, %v11456_v43  ;;  %v5624_v57 = vpop.f32.mrb[117].mxu0  ;;  %v5713_v42 = vpop.f32.mrb[123].mxu1  ;;  %v7945_v22 = vadd.f32 %v5711_v15, %v10801_v2 }
 0xfdf   :  { %v7882_v4 = vadd.f32 %v5624_v57, %v10791_v34 }
 0xfe0   :  { %v6492_v23 = vmul.f32 -1.442695, %v7881_v6 }
 0xfe1   :  { %v9121_v52 = vpop.eup %9120  ;;  %v6496_v17 = vmul.f32 -1.442695, %v7882_v4 }
 0xfe2   :  { %v9123_v40 = vpop.eup %9122  ;;  %v5818_v44 = vmul.f32 %v9121_v52, %v9119_v7  ;;  %9130 = vpow2.f32 %v6492_v23  ;;  %v5628_v21 = vpop.f32.mrb[118].mxu0 }
 0xfe3   :  { %v5814_v49 = vmul.f32 %v9123_v40, %v11170_v25  ;;  %v5717_v11 = vpop.f32.mrb[124].mxu1  ;;  %v9125_v0 = vpop.eup %9124  ;;  %9132 = vpow2.f32 %v6496_v17  ;;  %v7883_v24 = vadd.f32 %v5628_v21, %v11456_v43  ;;  %v7946_v25 = vadd.f32 %v5713_v42, %v10797_v61 }
 0xfe4   :  { %v5630_v47 = vpop.f32.mrb[119].mxu0  ;;  %v5719_v56 = vpop.f32.mrb[125].mxu1  ;;  %9134 = vrcp.f32 %v5802_v58  ;;  %v5751_v1 = vadd.f32 1.0, %v9125_v0  ;;  %v7947_v12 = vadd.f32 %v5717_v11, %v10801_v2 }
 0xfe5   :  { %v9127_v29 = vpop.eup %9126  ;;  %v11239_v14 = vadd.f32 %v5818_v44, %v5814_v49  ;;  %v7884_v3 = vadd.f32 %v5630_v47, %v10791_v34  ;;  %9136 = vpow2.f32 %v6499_v27  ;;  %v6493_v54 = vmul.f32 -1.442695, %v7883_v24  ;;  %v6124_v47 = vld [vmem:[%s11355_s7] sm:$0xff] }
 0xfe6   :  { %v5775_v20 = vadd.f32 1.0, %v9127_v29  ;;  %v6500_v59 = vmul.f32 -1.442695, %v7946_v25  ;;  %v9129_v51 = vpop.eup %9128  ;;  %v7948_v33 = vadd.f32 %v5719_v56, %v10797_v61  ;;  %v6125_v56 = vld [vmem:[%s11355_s7 + $0x8] sm:$0xff] }
 0xfe7   :  { %9138 = vtanh.f32 %v11239_v14  ;;  %v6497_v5 = vmul.f32 -1.442695, %v7884_v3  ;;  %v7661_v29 = vpack.c.bf16 %v6125_v56, %v6124_v47  ;;  %v6129_v25 = vld [vmem:[%s11355_s7 + $0x28] sm:$0xff] }
 0xfe8   :  { %9140 = vrcp.f32 %v5751_v1  ;;  %v6501_v62 = vmul.f32 -1.442695, %v7948_v33  ;;  %v6127_v1 = vld [vmem:[%s11355_s7 + $0x18] sm:$0xff] }
 0xfe9   :  { %9142 = vrcp.f32 %v5775_v20  ;;  %7662 = vmatprep.subr.bf16.mxu0 %v7661_v29  ;;  %v6128_v20 = vld [vmem:[%s11355_s7 + $0x20] sm:$0xff]  ;;  %v6135_v33 = vld [vmem:[%s11355_s7 + $0x58] sm:$0xff] }
 0xfea   :  { %9144 = vpow2.f32 %v6493_v54  ;;  %v7669_v54 = vpack.c.bf16 %v6129_v25, %v6128_v20 }
 0xfeb   :  { %9146 = vpow2.f32 %v6497_v5  ;;  %v6130_v5 = vld [vmem:[%s11355_s7 + $0x30] sm:$0xff] }
 0xfec   :  { %v9131_v37 = vpop.eup %9130  ;;  %9148 = vpow2.f32 %v6500_v59  ;;  %v6131_v59 = vld [vmem:[%s11355_s7 + $0x38] sm:$0xff] }
 0xfed   :  { %v9133_v48 = vpop.eup %9132  ;;  %v5752_v46 = vadd.f32 1.0, %v9131_v37  ;;  %9150 = vtanh.f32 %v7945_v22  ;;  %v7673_v22 = vpack.c.bf16 %v6131_v59, %v6130_v5  ;;  %v6133_v37 = vld [vmem:[%s11355_s7 + $0x48] sm:$0xff] }
 0xfee   :  { %v9135_v39 = vpop.eup %9134  ;;  %v5776_v50 = vadd.f32 1.0, %v9133_v48 }
 0xfef   :  { %v9137_v10 = vpop.eup %9136  ;;  %9152 = vrcp.f32 %v5752_v46  ;;  %v6134_v46 = vld [vmem:[%s11355_s7 + $0x50] sm:$0xff] }
 0xff0   :  { %9154 = vrcp.f32 %v5776_v50  ;;  %v5803_v45 = vadd.f32 1.0, %v9137_v10  ;;  %v6136_v50 = vld [vmem:[%s11355_s7 + $0x60] sm:$0xff]  ;;  %v6137_v10 = vld [vmem:[%s11355_s7 + $0x68] sm:$0xff] }
 0xff1   :  { %v9139_v18 = vpop.eup %9138  ;;  %9156 = vpow2.f32 %v6501_v62  ;;  %v6139_v62 = vld [vmem:[%s11355_s7 + $0x78] sm:$0xff] }
 0xff2   :  { %v9141_v31 = vpop.eup %9140  ;;  %v5830_v63 = vmul.f32 %v9139_v18, %v9135_v39  ;;  %9158 = vtanh.f32 %v7947_v12  ;;  %v7681_v39 = vpack.c.bf16 %v6135_v33, %v6134_v46  ;;  %v6138_v18 = vld [vmem:[%s11355_s7 + $0x70] sm:$0xff] }
 0xff3   :  { %v9143_v28 = vpop.eup %9142  ;;  %v5819_v38 = vmul.f32 %v9141_v31, %v9129_v51  ;;  %v6132_v51 = vld [vmem:[%s11355_s7 + $0x40] sm:$0xff]  ;;  %v7685_v31 = vpack.c.bf16 %v6137_v10, %v6136_v50 }
 0xff4   :  { %v5815_v32 = vmul.f32 %v9143_v28, %v11178_v13  ;;  %5899 = vmatmul.mubr.f32.vlgmr.msra.gmra.mrb[120].mxu0 %v5830_v63  ;;  %5988 = vmatmul.mubr.f32.vlgmr.msra.gmra.mrb[126].mxu1 %v5830_v63  ;;  %v9145_v35 = vpop.eup %9144  ;;  %v7677_v48 = vpack.c.bf16 %v6133_v37, %v6132_v51  ;;  %v7689_v63 = vpack.c.bf16 %v6139_v62, %v6138_v18 }
 0xff5   :  { %5904 = vmatprep.mubr.f32.mxu0 %v11409_v16  ;;  %5993 = vmatprep.mubr.f32.mxu1 %v11409_v16  ;;  %v9147_v36 = vpop.eup %9146  ;;  %v5753_v8 = vadd.f32 1.0, %v9145_v35 }
 0xff6   :  { %v11250_v9 = vadd.f32 %v5819_v38, %v5815_v32  ;;  %v5777_v30 = vadd.f32 1.0, %v9147_v36  ;;  %v9149_v41 = vpop.eup %9148  ;;  %7664 = vmatpush3.bf16.msra.mxu0 %v7661_v29 }
 0xff7   :  { %9160 = vrcp.f32 %v5753_v8  ;;  %v9151_v26 = vpop.eup %9150  ;;  %v5804_v15 = vadd.f32 1.0, %v9149_v41 }
 0xff8   :  { %9162 = vrcp.f32 %v5777_v30 }
 0xff9   :  { %v9153_v13 = vpop.eup %9152  ;;  %9164 = vrcp.f32 %v5803_v45 }
 0xffa   :  { %v9155_v60 = vpop.eup %9154  ;;  %v5820_v19 = vmul.f32 %v9153_v13, %v9151_v26  ;;  %9166 = vtanh.f32 %v11250_v9 }
 0xffb   :  { %v5816_v6 = vmul.f32 %v9155_v60, %v11192_v55  ;;  %9168 = vrcp.f32 %v5804_v15  ;;  %v9157_v42 = vpop.eup %9156 }
 0xffc   :  { %v9159_v7 = vpop.eup %9158  ;;  %v5805_v23 = vadd.f32 1.0, %v9157_v42 }
 0xffd   :  { %v11254_v57 = vadd.f32 %v5820_v19, %v5816_v6 }
 0xfff   :  { %9170 = vtanh.f32 %v11254_v57 }
0x1000   :  { %9172 = vrcp.f32 %v5805_v23 }
0x1001   :  { %v9161_v4 = vpop.eup %9160 }
0x1002   :  { %v9163_v52 = vpop.eup %9162  ;;  %v5821_v58 = vmul.f32 %v9161_v4, %v9159_v7 }
0x1003   :  { %v9165_v40 = vpop.eup %9164  ;;  %v5817_v44 = vmul.f32 %v9163_v52, %v11202_v53 }
0x1004   :  { %v9167_v27 = vpop.eup %9166 }
0x1005   :  { %v5831_v17 = vmul.f32 %v9167_v27, %v9165_v40  ;;  %v11258_v49 = vadd.f32 %v5821_v58, %v5817_v44  ;;  %v9169_v55 = vpop.eup %9168 }
0x1007   :  { %5905 = vmatmul.mubr.f32.gmra.mrb[122].mxu0 %v5831_v17  ;;  %5994 = vmatmul.mubr.f32.gmra.mrb[128].mxu1 %v5831_v17  ;;  %9174 = vtanh.f32 %v11258_v49 }
0x1008   :  { %5910 = vmatprep.mubr.f32.mxu0 %v11409_v16  ;;  %5999 = vmatprep.mubr.f32.mxu1 %v11409_v16 }
0x1009   :  { %v9171_v21 = vpop.eup %9170 }
0x100a   :  { %v5832_v11 = vmul.f32 %v9171_v21, %v9169_v55  ;;  %v9173_v53 = vpop.eup %9172 }
0x100c   :  { %5911 = vmatmul.mubr.f32.gmra.mrb[124].mxu0 %v5832_v11  ;;  %6000 = vmatmul.mubr.f32.gmra.mrb[130].mxu1 %v5832_v11 }
0x100d   :  { %5916 = vmatprep.mubr.f32.mxu0 %v11409_v16  ;;  %6005 = vmatprep.mubr.f32.mxu1 %v11409_v16  ;;  %v6126_v16 = vld [vmem:[%s11355_s7 + $0x10] sm:$0xff] }
0x100e   :  { %v7665_v3 = vpack.c.bf16 %v6127_v1, %v6126_v16 }
0x1010   :  { %7666 = vmatprep.subr.bf16.mxu0 %v7665_v3 }
0x1011   :  { %v9175_v0 = vpop.eup %9174  ;;  %7668 = vmatpush3.bf16.msra.mxu0 %v7665_v3 }
0x1012   :  { %v5833_v24 = vmul.f32 %v9175_v0, %v9173_v53  ;;  %7670 = vmatprep.subr.bf16.mxu0 %v7669_v54 }
0x1014   :  { %5917 = vmatmul.mubr.f32.gmra.mrb[126].mxu0 %v5833_v24  ;;  %6006 = vmatmul.mubr.f32.gmra.mrb[132].mxu1 %v5833_v24 }
0x1015   :  { %7672 = vmatpush3.bf16.msra.mxu0 %v7669_v54 }
0x1016   :  { %7674 = vmatprep.subr.bf16.mxu0 %v7673_v22 }
0x1019   :  { %7676 = vmatpush3.bf16.msra.mxu0 %v7673_v22 }
0x101a   :  { %7678 = vmatprep.subr.bf16.mxu0 %v7677_v48 }
0x101d   :  { %7680 = vmatpush3.bf16.msra.mxu0 %v7677_v48 }
0x101e   :  { %7682 = vmatprep.subr.bf16.mxu0 %v7681_v39 }
0x1021   :  { %7684 = vmatpush3.bf16.msra.mxu0 %v7681_v39 }
0x1022   :  { %7686 = vmatprep.subr.bf16.mxu0 %v7685_v31 }
0x1025   :  { %7688 = vmatpush3.bf16.msra.mxu0 %v7685_v31 }
0x1026   :  { %7690 = vmatprep.subr.bf16.mxu0 %v7689_v63 }
0x1029   :  { %7692 = vmatpush3.bf16.msra.mxu0 %v7689_v63 }
0x10c7   :  { %v5900_v28 = vpop.f32.mrb[120].mxu0  ;;  %v5989_v38 = vpop.f32.mrb[126].mxu1 }
0x10c8   :  { %v7885_v12 = vadd.f32 %v5900_v28, %v11456_v43  ;;  %v5902_v32 = vpop.f32.mrb[121].mxu0  ;;  %v5991_v35 = vpop.f32.mrb[127].mxu1  ;;  %v7949_v26 = vadd.f32 %v5989_v38, %v10801_v2 }
0x10c9   :  { %v7886_v36 = vadd.f32 %v5902_v32, %v10791_v34  ;;  %v7950_v30 = vadd.f32 %v5991_v35, %v10797_v61 }
0x10ca   :  { %v6502_v45 = vmul.f32 -1.442695, %v7885_v12 }
0x10cb   :  { %v6506_v8 = vmul.f32 -1.442695, %v7886_v36  ;;  %v6510_v41 = vmul.f32 -1.442695, %v7950_v30 }
0x10cc   :  { %9176 = vpow2.f32 %v6502_v45 }
0x10cd   :  { %9178 = vpow2.f32 %v6506_v8 }
0x10ce   :  { %9180 = vpow2.f32 %v6510_v41 }
0x10cf   :  { %9182 = vtanh.f32 %v7949_v26 }
0x10d6   :  { %v9177_v13 = vpop.eup %9176 }
0x10d7   :  { %v9179_v60 = vpop.eup %9178  ;;  %v6040_v19 = vadd.f32 1.0, %v9177_v13 }
0x10d8   :  { %v6064_v15 = vadd.f32 1.0, %v9179_v60  ;;  %v9181_v17 = vpop.eup %9180 }
0x10d9   :  { %9184 = vrcp.f32 %v6040_v19  ;;  %v9183_v53 = vpop.eup %9182  ;;  %v6092_v1 = vadd.f32 1.0, %v9181_v17 }
0x10da   :  { %9186 = vrcp.f32 %v6064_v15  ;;  %v5906_v6 = vpop.f32.mrb[122].mxu0  ;;  %v5995_v42 = vpop.f32.mrb[128].mxu1 }
0x10db   :  { %v7887_v7 = vadd.f32 %v5906_v6, %v11456_v43  ;;  %v5908_v4 = vpop.f32.mrb[123].mxu0  ;;  %v5997_v52 = vpop.f32.mrb[129].mxu1  ;;  %v7951_v54 = vadd.f32 %v5995_v42, %v10801_v2 }
0x10dc   :  { %v7888_v58 = vadd.f32 %v5908_v4, %v10791_v34  ;;  %v7952_v0 = vadd.f32 %v5997_v52, %v10797_v61 }
0x10dd   :  { %v6503_v23 = vmul.f32 -1.442695, %v7887_v7 }
0x10de   :  { %v6507_v40 = vmul.f32 -1.442695, %v7888_v58  ;;  %v6511_v25 = vmul.f32 -1.442695, %v7952_v0 }
0x10df   :  { %9188 = vpow2.f32 %v6503_v23  ;;  %v5912_v44 = vpop.f32.mrb[124].mxu0  ;;  %v6001_v27 = vpop.f32.mrb[130].mxu1 }
0x10e0   :  { %9190 = vpow2.f32 %v6507_v40  ;;  %v7889_v55 = vadd.f32 %v5912_v44, %v11456_v43  ;;  %v5914_v21 = vpop.f32.mrb[125].mxu0  ;;  %v6003_v11 = vpop.f32.mrb[131].mxu1  ;;  %v7953_v22 = vadd.f32 %v6001_v27, %v10801_v2 }
0x10e1   :  { %v7890_v24 = vadd.f32 %v5914_v21, %v10791_v34  ;;  %v7954_v5 = vadd.f32 %v6003_v11, %v10797_v61 }
0x10e2   :  { %v6504_v56 = vmul.f32 -1.442695, %v7889_v55 }
0x10e3   :  { %v9185_v47 = vpop.eup %9184  ;;  %v6508_v3 = vmul.f32 -1.442695, %v7890_v24  ;;  %v6512_v18 = vmul.f32 -1.442695, %v7954_v5  ;;  %v6514_v5 = vld [vmem:[%s11356_s8] ss:$0 sm:$0xff] }
0x10e4   :  { %v9187_v29 = vpop.eup %9186  ;;  %v6108_v16 = vmul.f32 %v9185_v47, %v9183_v53  ;;  %9192 = vpow2.f32 %v6504_v56 }
0x10e5   :  { %v6104_v20 = vmul.f32 %v9187_v29, %v11239_v14  ;;  %9194 = vpow2.f32 %v6508_v3 }
0x10e6   :  { %9196 = vrcp.f32 %v6092_v1 }
0x10e7   :  { %v6112_v59 = vadd.f32 %v6108_v16, %v6104_v20  ;;  %v5918_v51 = vpop.f32.mrb[126].mxu0  ;;  %v6007_v37 = vpop.f32.mrb[132].mxu1 }
0x10e8   :  { %v7891_v48 = vadd.f32 %v5918_v51, %v11456_v43  ;;  %v5920_v46 = vpop.f32.mrb[127].mxu0  ;;  %v6009_v33 = vpop.f32.mrb[133].mxu1  ;;  %v7955_v41 = vadd.f32 %v6007_v37, %v10801_v2 }
0x10e9   :  { %9198 = vtanh.f32 %v6112_v59  ;;  %v9189_v39 = vpop.eup %9188  ;;  %v7892_v14 = vadd.f32 %v5920_v46, %v10791_v34  ;;  %v7956_v36 = vadd.f32 %v6009_v33, %v10797_v61 }
0x10ea   :  { %9200 = vpow2.f32 %v6511_v25  ;;  %v9191_v50 = vpop.eup %9190  ;;  %v6041_v10 = vadd.f32 1.0, %v9189_v39  ;;  %v6505_v62 = vmul.f32 -1.442695, %v7891_v48 }
0x10eb   :  { %9202 = vtanh.f32 %v7951_v54  ;;  %v6065_v31 = vadd.f32 1.0, %v9191_v50  ;;  %v6509_v63 = vmul.f32 -1.442695, %v7892_v14  ;;  %v6513_v15 = vmul.f32 -1.442695, %v7956_v36 }
0x10ec   :  { %9204 = vtanh.f32 %v7953_v22 }
0x10ed   :  { %9206 = vrcp.f32 %v6041_v10 }
0x10ee   :  { %9208 = vrcp.f32 %v6065_v31  ;;  %v9193_v28 = vpop.eup %9192 }
0x10ef   :  { %9210 = vpow2.f32 %v6512_v18  ;;  %v9195_v43 = vpop.eup %9194  ;;  %v6042_v38 = vadd.f32 1.0, %v9193_v28 }
0x10f0   :  { %9212 = vpow2.f32 %v6505_v62  ;;  %v6066_v12 = vadd.f32 1.0, %v9195_v43  ;;  %v9197_v32 = vpop.eup %9196 }
0x10f1   :  { %9214 = vpow2.f32 %v6509_v63 }
0x10f2   :  { %9216 = vrcp.f32 %v6042_v38 }
0x10f3   :  { %v9199_v34 = vpop.eup %9198  ;;  %9218 = vrcp.f32 %v6066_v12 }
0x10f4   :  { %v9201_v35 = vpop.eup %9200  ;;  %v6120_v45 = vmul.f32 %v9199_v34, %v9197_v32  ;;  %9220 = vtanh.f32 %v7955_v41 }
0x10f5   :  { %v9203_v8 = vpop.eup %9202  ;;  %v6093_v13 = vadd.f32 1.0, %v9201_v35 }
0x10f6   :  { %v9205_v30 = vpop.eup %9204  ;;  %6567 = vmatprep.mubr.f32.mxu0 %v6120_v45 }
0x10f7   :  { %v9207_v26 = vpop.eup %9206  ;;  %9222 = vrcp.f32 %v6093_v13 }
0x10f8   :  { %v9209_v60 = vpop.eup %9208  ;;  %v6109_v19 = vmul.f32 %v9207_v26, %v9203_v8  ;;  %9224 = vpow2.f32 %v6513_v15 }
0x10f9   :  { %v9211_v6 = vpop.eup %9210  ;;  %v6105_v42 = vmul.f32 %v9209_v60, %v11250_v9 }
0x10fa   :  { %v9213_v7 = vpop.eup %9212  ;;  %v6094_v27 = vadd.f32 1.0, %v9211_v6 }
0x10fb   :  { %v9215_v4 = vpop.eup %9214  ;;  %v6113_v52 = vadd.f32 %v6109_v19, %v6105_v42  ;;  %v6043_v61 = vadd.f32 1.0, %v9213_v7 }
0x10fc   :  { %v9217_v58 = vpop.eup %9216  ;;  %v6067_v23 = vadd.f32 1.0, %v9215_v4 }
0x10fd   :  { %v9219_v40 = vpop.eup %9218  ;;  %9226 = vtanh.f32 %v6113_v52  ;;  %v6110_v2 = vmul.f32 %v9217_v58, %v9205_v30 }
0x10fe   :  { %v6106_v44 = vmul.f32 %v9219_v40, %v11254_v57  ;;  %9228 = vrcp.f32 %v6043_v61  ;;  %v9221_v9 = vpop.eup %9220 }
0x10ff   :  { %9230 = vrcp.f32 %v6067_v23 }
0x1100   :  { %v6114_v17 = vadd.f32 %v6110_v2, %v6106_v44  ;;  %9232 = vrcp.f32 %v6094_v27 }
0x1101   :  { %v9223_v55 = vpop.eup %9222 }
0x1102   :  { %9234 = vtanh.f32 %v6114_v17  ;;  %v9225_v21 = vpop.eup %9224 }
0x1103   :  { %v6095_v56 = vadd.f32 1.0, %v9225_v21 }
0x1105   :  { %9236 = vrcp.f32 %v6095_v56 }
0x1107   :  { %v9227_v11 = vpop.eup %9226 }
0x1108   :  { %v9229_v53 = vpop.eup %9228  ;;  %v6121_v0 = vmul.f32 %v9227_v11, %v9223_v55 }
0x1109   :  { %v9231_v24 = vpop.eup %9230  ;;  %v6111_v47 = vmul.f32 %v9229_v53, %v9221_v9 }
0x110a   :  { %v6107_v29 = vmul.f32 %v9231_v24, %v11258_v49  ;;  %6568 = vmatmul.mubr.f32.vlgmr.msra.gmra.mrb[128].mxu0 %v6121_v0  ;;  %v9233_v16 = vpop.eup %9232 }
0x110c   :  { %v6115_v57 = vadd.f32 %v6111_v47, %v6107_v29  ;;  %v9235_v1 = vpop.eup %9234 }
0x110d   :  { %v6122_v3 = vmul.f32 %v9235_v1, %v9233_v16 }
0x110e   :  { %9238 = vtanh.f32 %v6115_v57 }
0x110f   :  { %6570 = vmatprep.mubr.f32.mxu0 %v6122_v3  ;;  %v9237_v20 = vpop.eup %9236 }
0x1118   :  { %v9239_v25 = vpop.eup %9238 }
0x1119   :  { %v6123_v54 = vmul.f32 %v9239_v25, %v9237_v20 }
0x111b   :  { %6571 = vmatmul.mubr.f32.gmra.mrb[130].mxu0 %v6123_v54 }
0x11dd   :  { %v6569_v59 = vpop.f32.mrb[128].mxu0 }
0x11de   :  { %v6219_v22 = vadd.f32 %v6569_v59, %v6514_v5  ;;  %v6213_v51 = vpop.f32.mrb[129].mxu0 }
0x11df   :  { %v6214_v49 = vadd.f32 %v6514_v5, %v6213_v51 }
0x11e0   :  { %6233 = vst [vmem:[#allocation8 + $0x8] sm:$0xff] %v6219_v22 }
0x11e1   :  { %6232 = vst [vmem:[#allocation8] sm:$0xff] %v6214_v49 }
0x11ee   :  { %v6572_v37 = vpop.f32.mrb[130].mxu0 }
0x11ef   :  { %v6229_v48 = vadd.f32 %v6572_v37, %v6514_v5  ;;  %v6223_v46 = vpop.f32.mrb[131].mxu0 }
0x11f0   :  { %v6224_v33 = vadd.f32 %v6514_v5, %v6223_v46 }
0x11f1   :  { %6235 = vst [vmem:[#allocation8 + $0x18] sm:$0xff] %v6229_v48 }
0x11f2   :  { %6234 = vst [vmem:[#allocation8 + $0x10] sm:$0xff] %v6224_v33 }
0x11f3   :  { %9317 = shalt.err (!%p9314_p0)
}
0x11f4   :  { %s9318_s22 = scalar_lea.hbm %s11357_s9, 512 }
0x11f5   :  { %p9319_p1 = scmp.ne.s32.totalorder %s11357_s9, %s9318_s22  ;;  %p9322_p2 = scmp.lt.u32.totalorder %s9318_s22, %s11357_s9 }
0x11f7   :  { %p9324_p3 = pnand %p9322_p2, %p9319_p1 }
0x11f9   :  { %9327 = shalt.err (!%p9324_p3)
}
0x11fa   :  { %s9341_s14 = smov 128   ;;  %s9342_s15 = smov 8  }
0x11fb   :  { %6247 = dma.vmem_to_hbm [thread:$0]  %s6242_s30, 512, %s11357_s9, [#allocation4], %s9341_s14, %s9341_s14, %s9342_s15  }
0x11fc   :  { %9332 = dma.done.wait [#allocation4], 512  }
0x11fd   :  { %9333 = vsyncadd [#allocation4], 4294966784 }
0x11fe   :  { %6251 = vsyncpa [#allocation3], 1 }
0x11ff   :  { %6252 = vsyncpa [#allocation6], 1 }
0x1200   :  { %6253 = vsyncpa [#allocation4], 1 }

</bundles_post_ra>
